<compile_context>
chip_gen: v5e
topology: v5e:2x2
jax: 0.10.0
libtpu: 0.0.40
codegen_flags: <defaults>
</compile_context>

<pallas_src>
import math

import jax
import jax.numpy as jnp
from jax.experimental import pallas as pl
from jax.experimental.pallas import tpu as pltpu

B, S, D = 2, 8, 64          # batch, seq, hidden_size
BS = B * S
N_LAYERS = 4                # synthetic "distributed" transformer layers
ADAPTER_DIM = 32
N_CLASSES = 2
MLP_DIM = 4 * D
EPS = 1e-5

# ----- packed weight slab column layout: (L, D, 768) bf16 -------------------
C_QKV = 0                   # [0:192)   Wq | Wk | Wv
C_WO = 3 * D                # [192:256) Wo
C_UP = 4 * D                # [256:512) W_up
C_DN = 4 * D + MLP_DIM      # [512:768) W_dn^T   (stored transposed, (D, MLP))
W_COLS = 4 * D + 2 * MLP_DIM

# ----- packed per-layer bias/gain slab row layout: (L, 8, 256) f32 ----------
V_BQKV, V_BO, V_G1, V_BE1, V_G2, V_BE2, V_BUP, V_BDN = range(8)

# ----- packed constants buffer row layout: (200, 128) f32 -------------------
R_MASK = 0                  # (BS, BS)       additive causal+block-diag mask
R_POOL = 16                 # (8, BS)        mean-pool matrix (rows >= B zero)
R_AW1 = 24                  # (D, 32)        adapter Linear 1
R_AW2 = 88                  # (32, D)        adapter Linear 2
R_AB = 120                  # row 120: ab1 (1,32); row 121: ab2 (1,D)
R_HW = 128                  # (D, 128)       head weight, zero-padded classes
R_HB = 192                  # (1, 128)       head bias,   zero-padded classes
CONST_ROWS = 200
CONST_COLS = 128


# ---------------------------------------------------------------------------
# Fused forward kernel: whole model in one invocation, no grid.
# ---------------------------------------------------------------------------
def _fused_forward_kernel(x_ref, w_ref, vec_ref, const_ref, out_ref):
    h = x_ref[...]                                        # (BS, D) f32

    inv_sqrt_d = jnp.float32(1.0 / math.sqrt(D))
    mask_add = const_ref[R_MASK:R_MASK + BS, 0:BS]        # (BS, BS) f32

    def layer_norm(z, g, b):
        mu = jnp.mean(z, axis=-1, keepdims=True)
        var = jnp.mean((z - mu) ** 2, axis=-1, keepdims=True)
        return (z - mu) * jax.lax.rsqrt(var + EPS) * g + b

    def wdot(a_f32, w_bf16):
        # bf16 MXU operands, f32 accumulate; elementwise math stays f32.
        return jnp.dot(a_f32.astype(jnp.bfloat16), w_bf16,
                       preferred_element_type=jnp.float32)

    def block(h, l):
        g1 = vec_ref[l, V_G1:V_G1 + 1, 0:D]
        be1 = vec_ref[l, V_BE1:V_BE1 + 1, 0:D]
        g2 = vec_ref[l, V_G2:V_G2 + 1, 0:D]
        be2 = vec_ref[l, V_BE2:V_BE2 + 1, 0:D]

        # --- pre-LN single-head causal self-attention (fused QKV matmul) ---
        xn = layer_norm(h, g1, be1)
        qkv = wdot(xn, w_ref[l, :, C_QKV:C_QKV + 3 * D]) \
            + vec_ref[l, V_BQKV:V_BQKV + 1, 0:3 * D]       # (BS, 3D) f32
        q = qkv[:, 0:D]
        k = qkv[:, D:2 * D]
        v = qkv[:, 2 * D:3 * D]
        # q @ k^T without materializing a transpose; additive mask (one add).
        scores = jax.lax.dot_general(
            q, k, dimension_numbers=(((1,), (1,)), ((), ())),
            preferred_element_type=jnp.float32) * inv_sqrt_d + mask_add
        scores = scores - jnp.max(scores, axis=-1, keepdims=True)
        p = jnp.exp(scores)
        p = p * pl.reciprocal(jnp.sum(p, axis=-1, keepdims=True), approx=True)
        ctx = jnp.dot(p, v, preferred_element_type=jnp.float32)
        h = h + wdot(ctx, w_ref[l, :, C_WO:C_WO + D]) \
              + vec_ref[l, V_BO:V_BO + 1, 0:D]

        # --- pre-LN MLP (gelu, tanh approximation) ---
        hn = layer_norm(h, g2, be2)
        up = wdot(hn, w_ref[l, :, C_UP:C_UP + MLP_DIM]) \
            + vec_ref[l, V_BUP:V_BUP + 1, 0:MLP_DIM]
        up = jax.nn.gelu(up, approximate=True)
        dn = jax.lax.dot_general(                          # up @ W_dn (stored W_dn^T)
            up.astype(jnp.bfloat16), w_ref[l, :, C_DN:C_DN + MLP_DIM],
            dimension_numbers=(((1,), (1,)), ((), ())),
            preferred_element_type=jnp.float32)
        return h + dn + vec_ref[l, V_BDN:V_BDN + 1, 0:D]

    mid = N_LAYERS // 2

    # distributed_layers[:mid_block]  (unrolled, static layer indices)
    for l in range(mid):
        h = block(h, l)

    # adapter: Linear(D, 32) -> Linear(32, D), intermediates never leave VMEM
    h = jnp.dot(h, const_ref[R_AW1:R_AW1 + D, 0:ADAPTER_DIM],
                preferred_element_type=jnp.float32) \
        + const_ref[R_AB:R_AB + 1, 0:ADAPTER_DIM]
    h = jnp.dot(h, const_ref[R_AW2:R_AW2 + ADAPTER_DIM, 0:D],
                preferred_element_type=jnp.float32) \
        + const_ref[R_AB + 1:R_AB + 2, 0:D]

    # distributed_layers[mid_block:]
    for l in range(mid, N_LAYERS):
        h = block(h, l)

    # mean pool over seq as a precomputed (8, BS) matmul (rows >= B are zero),
    # then the (lane-padded) classification head -> full (8,128) tile store.
    pooled = jnp.dot(const_ref[R_POOL:R_POOL + 8, 0:BS], h,
                     preferred_element_type=jnp.float32)          # (8, D)
    out_ref[...] = jnp.dot(pooled, const_ref[R_HW:R_HW + D, :],
                           preferred_element_type=jnp.float32) \
        + const_ref[R_HB:R_HB + 1, :]


# ---------------------------------------------------------------------------
# Host-side packing of the 22 parameter tensors into 3 resident buffers.
# ---------------------------------------------------------------------------
def pack_params(p):
    # (L, D, 768) bf16 matmul-weight slab: Wqkv | Wo | Wup | Wdn^T
    wqkv = jnp.concatenate([p["wq"], p["wk"], p["wv"]], axis=-1)       # (L,D,3D)
    w_dn_t = jnp.swapaxes(p["w_dn"], 1, 2)                             # (L,D,MLP)
    w_big = jnp.concatenate([wqkv, p["wo"], p["w_up"], w_dn_t],
                            axis=-1).astype(jnp.bfloat16)              # (L,D,768)

    # (L, 8, 256) f32 bias/gain slab
    def pad_row(v):
        return jnp.pad(v, ((0, 0), (0, 0), (0, MLP_DIM - v.shape[-1])))
    b_qkv = jnp.concatenate([p["bq"], p["bk"], p["bv"]], axis=-1)      # (L,1,3D)
    vec = jnp.concatenate(
        [pad_row(b_qkv), pad_row(p["bo"]), pad_row(p["g1"]), pad_row(p["be1"]),
         pad_row(p["g2"]), pad_row(p["be2"]), pad_row(p["b_up"]),
         pad_row(p["b_dn"])], axis=1).astype(jnp.float32)              # (L,8,256)

    # (200, 128) f32 constants buffer: mask, pool, adapter, padded head
    consts = jnp.zeros((CONST_ROWS, CONST_COLS), jnp.float32)
    rows = jnp.arange(BS)
    cols = jnp.arange(BS)
    allowed = (rows[:, None] // S == cols[None, :] // S) & \
              (cols[None, :] <= rows[:, None])
    mask_add = jnp.where(allowed, 0.0, -1e30).astype(jnp.float32)
    consts = consts.at[R_MASK:R_MASK + BS, 0:BS].set(mask_add)
    pool = (jnp.arange(8)[:, None] == (cols[None, :] // S)).astype(jnp.float32)
    consts = consts.at[R_POOL:R_POOL + 8, 0:BS].set(pool / S)
    consts = consts.at[R_AW1:R_AW1 + D, 0:ADAPTER_DIM].set(p["aw1"])
    consts = consts.at[R_AW2:R_AW2 + ADAPTER_DIM, 0:D].set(p["aw2"])
    consts = consts.at[R_AB:R_AB + 1, 0:ADAPTER_DIM].set(p["ab1"])
    consts = consts.at[R_AB + 1:R_AB + 2, 0:D].set(p["ab2"])
    consts = consts.at[R_HW:R_HW + D, 0:N_CLASSES].set(p["hw"])
    consts = consts.at[R_HB:R_HB + 1, 0:N_CLASSES].set(p["hb"])
    return w_big, vec, consts


# ---------------------------------------------------------------------------
# Pallas wrapper: single gridless pallas_call, everything resident in VMEM.
# ---------------------------------------------------------------------------
def llm_classifier_forward(embeddings, packed):
    w_big, vec, consts = packed
    x2d = embeddings.reshape(BS, D)
    vmem = pl.BlockSpec(memory_space=pltpu.MemorySpace.VMEM)
    out_pad = pl.pallas_call(
        _fused_forward_kernel,
        in_specs=[vmem, vmem, vmem, vmem],
        out_specs=vmem,
        out_shape=jax.ShapeDtypeStruct((8, CONST_COLS), jnp.float32),
    )(x2d, w_big, vec, consts)
    return out_pad[:B, :N_CLASSES]


# ---------------------------------------------------------------------------
# Pure-JAX reference (mirrors the kernel's bf16-operand weight matmuls)
# ---------------------------------------------------------------------------
def forward_ref(embeddings, p):
    bf = lambda a: a.astype(jnp.bfloat16).astype(jnp.float32)

    def ln(z, g, b):
        mu = jnp.mean(z, axis=-1, keepdims=True)
        var = jnp.mean((z - mu) ** 2, axis=-1, keepdims=True)
        return (z - mu) * jax.lax.rsqrt(var + EPS) * g + b

    def wmm(a, w):
        return jnp.dot(bf(a), bf(w), preferred_element_type=jnp.float32)

    def block(x, l):
        xn = ln(x, p["g1"][l], p["be1"][l])
        q = wmm(xn, p["wq"][l]) + p["bq"][l]
        k = wmm(xn, p["wk"][l]) + p["bk"][l]
        v = wmm(xn, p["wv"][l]) + p["bv"][l]
        scores = jnp.einsum("bqd,bkd->bqk", q, k,
                            preferred_element_type=jnp.float32) / jnp.float32(math.sqrt(D))
        mask = jnp.tril(jnp.ones((S, S), dtype=bool))
        scores = jnp.where(mask, scores, jnp.float32(-1e30))
        pr = jax.nn.softmax(scores, axis=-1)
        ctx = jnp.einsum("bqk,bkd->bqd", pr, v,
                         preferred_element_type=jnp.float32)
        h = x + wmm(ctx, p["wo"][l]) + p["bo"][l]
        hn = ln(h, p["g2"][l], p["be2"][l])
        up = jax.nn.gelu(wmm(hn, p["w_up"][l]) + p["b_up"][l], approximate=True)
        return h + wmm(up, p["w_dn"][l]) + p["b_dn"][l]

    mid = N_LAYERS // 2
    h = embeddings
    for l in range(mid):
        h = block(h, l)
    h = (h @ p["aw1"] + p["ab1"]) @ p["aw2"] + p["ab2"]
    for l in range(mid, N_LAYERS):
        h = block(h, l)
    pooled = jnp.mean(h, axis=1)
    return pooled @ p["hw"] + p["hb"]


# ---------------------------------------------------------------------------
# Deterministic parameter construction (per-layer weights stacked on axis 0)
# ---------------------------------------------------------------------------
def init_params(key):
    def w(k, shape, scale=0.02):
        return (scale * jax.random.normal(k, shape)).astype(jnp.float32)

    L = N_LAYERS
    keys = jax.random.split(key, 9)
    zeros = lambda *shape: jnp.zeros(shape, jnp.float32)
    ones = lambda *shape: jnp.ones(shape, jnp.float32)
    return dict(
        wq=w(keys[0], (L, D, D)), wk=w(keys[1], (L, D, D)), wv=w(keys[2], (L, D, D)),
        bq=zeros(L, 1, D), bk=zeros(L, 1, D), bv=zeros(L, 1, D),
        wo=w(keys[3], (L, D, D)), bo=zeros(L, 1, D),
        g1=ones(L, 1, D), be1=zeros(L, 1, D),
        g2=ones(L, 1, D), be2=zeros(L, 1, D),
        w_up=w(keys[4], (L, D, MLP_DIM)), b_up=zeros(L, 1, MLP_DIM),
        w_dn=w(keys[5], (L, MLP_DIM, D)), b_dn=zeros(L, 1, D),
        aw1=w(keys[6], (D, ADAPTER_DIM)), ab1=zeros(1, ADAPTER_DIM),
        aw2=w(keys[7], (ADAPTER_DIM, D)), ab2=zeros(1, D),
        hw=w(keys[8], (D, N_CLASSES)), hb=zeros(1, N_CLASSES),
    )


if __name__ == "__main__":
    key = jax.random.PRNGKey(0)
    k_emb, k_par = jax.random.split(key)
    embeddings = jax.random.normal(k_emb, (B, S, D), dtype=jnp.float32)
    params = init_params(k_par)
    packed = pack_params(params)

    logits = jax.block_until_ready(llm_classifier_forward(embeddings, packed))
    ref = jax.block_until_ready(forward_ref(embeddings, params))

    assert logits.shape == (B, N_CLASSES)
    assert jnp.all(jnp.isfinite(logits))
    assert jnp.allclose(logits, ref, rtol=1e-2, atol=1e-2), (logits, ref)
    print("KERNEL_OK")
</pallas_src>

<mosaic_0001>
module attributes {stable_mosaic.version = 11 : i64} {
  func.func @_fused_forward_kernel(%arg0: memref<16x64xf32, #tpu.memory_space<vmem>>, %arg1: memref<4x64x768xbf16, #tpu.memory_space<vmem>>, %arg2: memref<4x8x256xf32, #tpu.memory_space<vmem>>, %arg3: memref<200x128xf32, #tpu.memory_space<vmem>>, %arg4: memref<8x128xf32, #tpu.memory_space<vmem>>) attributes {dimension_semantics = [], scalar_prefetch = 0 : i64, scratch_operands = 0 : i64, tpu.core_type = #tpu.core_type<tc>} {
    %c0 = arith.constant 0 : index
    %c0_0 = arith.constant 0 : index
    %0 = vector.load %arg0[%c0, %c0_0] : memref<16x64xf32, #tpu.memory_space<vmem>>, vector<16x64xf32>
    %c0_1 = arith.constant 0 : index
    %c0_2 = arith.constant 0 : index
    %1 = vector.load %arg3[%c0_1, %c0_2] : memref<200x128xf32, #tpu.memory_space<vmem>>, vector<16x16xf32>
    %c0_3 = arith.constant 0 : index
    %c2 = arith.constant 2 : index
    %c0_4 = arith.constant 0 : index
    %2 = vector.load %arg2[%c0_3, %c2, %c0_4] : memref<4x8x256xf32, #tpu.memory_space<vmem>>, vector<1x1x64xf32>
    %3 = vector.shape_cast %2 : vector<1x1x64xf32> to vector<1x64xf32>
    %c0_5 = arith.constant 0 : index
    %c3 = arith.constant 3 : index
    %c0_6 = arith.constant 0 : index
    %4 = vector.load %arg2[%c0_5, %c3, %c0_6] : memref<4x8x256xf32, #tpu.memory_space<vmem>>, vector<1x1x64xf32>
    %5 = vector.shape_cast %4 : vector<1x1x64xf32> to vector<1x64xf32>
    %c0_7 = arith.constant 0 : index
    %c4 = arith.constant 4 : index
    %c0_8 = arith.constant 0 : index
    %6 = vector.load %arg2[%c0_7, %c4, %c0_8] : memref<4x8x256xf32, #tpu.memory_space<vmem>>, vector<1x1x64xf32>
    %7 = vector.shape_cast %6 : vector<1x1x64xf32> to vector<1x64xf32>
    %c0_9 = arith.constant 0 : index
    %c5 = arith.constant 5 : index
    %c0_10 = arith.constant 0 : index
    %8 = vector.load %arg2[%c0_9, %c5, %c0_10] : memref<4x8x256xf32, #tpu.memory_space<vmem>>, vector<1x1x64xf32>
    %9 = vector.shape_cast %8 : vector<1x1x64xf32> to vector<1x64xf32>
    %cst = arith.constant dense<0.000000e+00> : vector<16xf32>
    %10 = vector.multi_reduction <add>, %0, %cst [1] : vector<16x64xf32> to vector<16xf32>
    %11 = vector.shape_cast %10 : vector<16xf32> to vector<16x1xf32>
    %cst_11 = arith.constant 6.400000e+01 : f32
    %12 = vector.broadcast %cst_11 : f32 to vector<16x1xf32>
    %13 = arith.divf %11, %12 : vector<16x1xf32>
    %14 = vector.broadcast %13 : vector<16x1xf32> to vector<16x64xf32>
    %15 = arith.subf %0, %14 : vector<16x64xf32>
    %16 = arith.mulf %15, %15 : vector<16x64xf32>
    %cst_12 = arith.constant dense<0.000000e+00> : vector<16xf32>
    %17 = vector.multi_reduction <add>, %16, %cst_12 [1] : vector<16x64xf32> to vector<16xf32>
    %18 = vector.shape_cast %17 : vector<16xf32> to vector<16x1xf32>
    %cst_13 = arith.constant 6.400000e+01 : f32
    %19 = vector.broadcast %cst_13 : f32 to vector<16x1xf32>
    %20 = arith.divf %18, %19 : vector<16x1xf32>
    %21 = vector.broadcast %13 : vector<16x1xf32> to vector<16x64xf32>
    %22 = arith.subf %0, %21 : vector<16x64xf32>
    %cst_14 = arith.constant 9.99999974E-6 : f32
    %23 = vector.broadcast %cst_14 : f32 to vector<16x1xf32>
    %24 = arith.addf %20, %23 : vector<16x1xf32>
    %25 = math.rsqrt %24 : vector<16x1xf32>
    %26 = vector.broadcast %25 : vector<16x1xf32> to vector<16x64xf32>
    %27 = arith.mulf %22, %26 : vector<16x64xf32>
    %28 = vector.broadcast %3 : vector<1x64xf32> to vector<16x64xf32>
    %29 = arith.mulf %27, %28 : vector<16x64xf32>
    %30 = vector.broadcast %5 : vector<1x64xf32> to vector<16x64xf32>
    %31 = arith.addf %29, %30 : vector<16x64xf32>
    %c0_15 = arith.constant 0 : index
    %c0_16 = arith.constant 0 : index
    %c0_17 = arith.constant 0 : index
    %32 = vector.load %arg1[%c0_15, %c0_16, %c0_17] : memref<4x64x768xbf16, #tpu.memory_space<vmem>>, vector<1x64x192xbf16>
    %33 = vector.shape_cast %32 : vector<1x64x192xbf16> to vector<64x192xbf16>
    %34 = arith.truncf %31 : vector<16x64xf32> to vector<16x64xbf16>
    %cst_18 = arith.constant dense<0.000000e+00> : vector<16x192xf32>
    %35 = tpu.matmul %34, %33, %cst_18 {dimension_numbers = #tpu.dot_dimension_numbers<[1], [0], [0], [1], [0, 0, 1, 1], [], []>} : vector<16x64xbf16>, vector<64x192xbf16>, vector<16x192xf32> -> vector<16x192xf32>
    %c0_19 = arith.constant 0 : index
    %c0_20 = arith.constant 0 : index
    %c0_21 = arith.constant 0 : index
    %36 = vector.load %arg2[%c0_19, %c0_20, %c0_21] : memref<4x8x256xf32, #tpu.memory_space<vmem>>, vector<1x1x192xf32>
    %37 = vector.shape_cast %36 : vector<1x1x192xf32> to vector<1x192xf32>
    %38 = vector.broadcast %37 : vector<1x192xf32> to vector<16x192xf32>
    %39 = arith.addf %35, %38 : vector<16x192xf32>
    %40 = vector.extract_strided_slice %39 {offsets = [0, 0], sizes = [16, 64], strides = [1, 1]} : vector<16x192xf32> to vector<16x64xf32>
    %41 = vector.extract_strided_slice %39 {offsets = [0, 64], sizes = [16, 64], strides = [1, 1]} : vector<16x192xf32> to vector<16x64xf32>
    %42 = vector.extract_strided_slice %39 {offsets = [0, 128], sizes = [16, 64], strides = [1, 1]} : vector<16x192xf32> to vector<16x64xf32>
    %cst_22 = arith.constant dense<0.000000e+00> : vector<16x16xf32>
    %43 = tpu.matmul %40, %41, %cst_22 {dimension_numbers = #tpu.dot_dimension_numbers<[1], [1], [0], [0], [0, 0, 1, 0], [], []>} : vector<16x64xf32>, vector<16x64xf32>, vector<16x16xf32> -> vector<16x16xf32>
    %cst_23 = arith.constant 1.250000e-01 : f32
    %44 = vector.broadcast %cst_23 : f32 to vector<16x16xf32>
    %45 = arith.mulf %43, %44 : vector<16x16xf32>
    %46 = arith.addf %45, %1 : vector<16x16xf32>
    %cst_24 = arith.constant dense<0xFF800000> : vector<16xf32>
    %47 = vector.multi_reduction <maximumf>, %46, %cst_24 [1] : vector<16x16xf32> to vector<16xf32>
    %48 = vector.shape_cast %47 : vector<16xf32> to vector<16x1xf32>
    %49 = vector.broadcast %48 : vector<16x1xf32> to vector<16x16xf32>
    %50 = arith.subf %46, %49 : vector<16x16xf32>
    %51 = math.exp %50 : vector<16x16xf32>
    %cst_25 = arith.constant dense<0.000000e+00> : vector<16xf32>
    %52 = vector.multi_reduction <add>, %51, %cst_25 [1] : vector<16x16xf32> to vector<16xf32>
    %53 = vector.shape_cast %52 : vector<16xf32> to vector<16x1xf32>
    %54 = tpu.reciprocal %53 {approx = true} : vector<16x1xf32> -> vector<16x1xf32>
    %55 = vector.broadcast %54 : vector<16x1xf32> to vector<16x16xf32>
    %56 = arith.mulf %51, %55 : vector<16x16xf32>
    %cst_26 = arith.constant dense<0.000000e+00> : vector<16x64xf32>
    %57 = tpu.matmul %56, %42, %cst_26 {dimension_numbers = #tpu.dot_dimension_numbers<[1], [0], [0], [1], [0, 0, 1, 1], [], []>} : vector<16x16xf32>, vector<16x64xf32>, vector<16x64xf32> -> vector<16x64xf32>
    %c0_27 = arith.constant 0 : index
    %c0_28 = arith.constant 0 : index
    %c192 = arith.constant 192 : index
    %58 = vector.load %arg1[%c0_27, %c0_28, %c192] : memref<4x64x768xbf16, #tpu.memory_space<vmem>>, vector<1x64x64xbf16>
    %59 = vector.shape_cast %58 : vector<1x64x64xbf16> to vector<64x64xbf16>
    %60 = arith.truncf %57 : vector<16x64xf32> to vector<16x64xbf16>
    %cst_29 = arith.constant dense<0.000000e+00> : vector<16x64xf32>
    %61 = tpu.matmul %60, %59, %cst_29 {dimension_numbers = #tpu.dot_dimension_numbers<[1], [0], [0], [1], [0, 0, 1, 1], [], []>} : vector<16x64xbf16>, vector<64x64xbf16>, vector<16x64xf32> -> vector<16x64xf32>
    %62 = arith.addf %0, %61 : vector<16x64xf32>
    %c0_30 = arith.constant 0 : index
    %c1 = arith.constant 1 : index
    %c0_31 = arith.constant 0 : index
    %63 = vector.load %arg2[%c0_30, %c1, %c0_31] : memref<4x8x256xf32, #tpu.memory_space<vmem>>, vector<1x1x64xf32>
    %64 = vector.shape_cast %63 : vector<1x1x64xf32> to vector<1x64xf32>
    %65 = vector.broadcast %64 : vector<1x64xf32> to vector<16x64xf32>
    %66 = arith.addf %62, %65 : vector<16x64xf32>
    %cst_32 = arith.constant dense<0.000000e+00> : vector<16xf32>
    %67 = vector.multi_reduction <add>, %66, %cst_32 [1] : vector<16x64xf32> to vector<16xf32>
    %68 = vector.shape_cast %67 : vector<16xf32> to vector<16x1xf32>
    %cst_33 = arith.constant 6.400000e+01 : f32
    %69 = vector.broadcast %cst_33 : f32 to vector<16x1xf32>
    %70 = arith.divf %68, %69 : vector<16x1xf32>
    %71 = vector.broadcast %70 : vector<16x1xf32> to vector<16x64xf32>
    %72 = arith.subf %66, %71 : vector<16x64xf32>
    %73 = arith.mulf %72, %72 : vector<16x64xf32>
    %cst_34 = arith.constant dense<0.000000e+00> : vector<16xf32>
    %74 = vector.multi_reduction <add>, %73, %cst_34 [1] : vector<16x64xf32> to vector<16xf32>
    %75 = vector.shape_cast %74 : vector<16xf32> to vector<16x1xf32>
    %cst_35 = arith.constant 6.400000e+01 : f32
    %76 = vector.broadcast %cst_35 : f32 to vector<16x1xf32>
    %77 = arith.divf %75, %76 : vector<16x1xf32>
    %78 = vector.broadcast %70 : vector<16x1xf32> to vector<16x64xf32>
    %79 = arith.subf %66, %78 : vector<16x64xf32>
    %cst_36 = arith.constant 9.99999974E-6 : f32
    %80 = vector.broadcast %cst_36 : f32 to vector<16x1xf32>
    %81 = arith.addf %77, %80 : vector<16x1xf32>
    %82 = math.rsqrt %81 : vector<16x1xf32>
    %83 = vector.broadcast %82 : vector<16x1xf32> to vector<16x64xf32>
    %84 = arith.mulf %79, %83 : vector<16x64xf32>
    %85 = vector.broadcast %7 : vector<1x64xf32> to vector<16x64xf32>
    %86 = arith.mulf %84, %85 : vector<16x64xf32>
    %87 = vector.broadcast %9 : vector<1x64xf32> to vector<16x64xf32>
    %88 = arith.addf %86, %87 : vector<16x64xf32>
    %c0_37 = arith.constant 0 : index
    %c0_38 = arith.constant 0 : index
    %c256 = arith.constant 256 : index
    %89 = vector.load %arg1[%c0_37, %c0_38, %c256] : memref<4x64x768xbf16, #tpu.memory_space<vmem>>, vector<1x64x256xbf16>
    %90 = vector.shape_cast %89 : vector<1x64x256xbf16> to vector<64x256xbf16>
    %91 = arith.truncf %88 : vector<16x64xf32> to vector<16x64xbf16>
    %cst_39 = arith.constant dense<0.000000e+00> : vector<16x256xf32>
    %92 = tpu.matmul %91, %90, %cst_39 {dimension_numbers = #tpu.dot_dimension_numbers<[1], [0], [0], [1], [0, 0, 1, 1], [], []>} : vector<16x64xbf16>, vector<64x256xbf16>, vector<16x256xf32> -> vector<16x256xf32>
    %c0_40 = arith.constant 0 : index
    %c6 = arith.constant 6 : index
    %c0_41 = arith.constant 0 : index
    %93 = vector.load %arg2[%c0_40, %c6, %c0_41] : memref<4x8x256xf32, #tpu.memory_space<vmem>>, vector<1x1x256xf32>
    %94 = vector.shape_cast %93 : vector<1x1x256xf32> to vector<1x256xf32>
    %95 = vector.broadcast %94 : vector<1x256xf32> to vector<16x256xf32>
    %96 = arith.addf %92, %95 : vector<16x256xf32>
    %97 = arith.mulf %96, %96 : vector<16x256xf32>
    %98 = arith.mulf %96, %97 : vector<16x256xf32>
    %cst_42 = arith.constant 4.471500e-02 : f32
    %99 = vector.broadcast %cst_42 : f32 to vector<16x256xf32>
    %100 = arith.mulf %99, %98 : vector<16x256xf32>
    %101 = arith.addf %96, %100 : vector<16x256xf32>
    %cst_43 = arith.constant 0.797884583 : f32
    %102 = vector.broadcast %cst_43 : f32 to vector<16x256xf32>
    %103 = arith.mulf %102, %101 : vector<16x256xf32>
    %104 = math.tanh %103 : vector<16x256xf32>
    %cst_44 = arith.constant 1.000000e+00 : f32
    %105 = vector.broadcast %cst_44 : f32 to vector<16x256xf32>
    %106 = arith.addf %105, %104 : vector<16x256xf32>
    %cst_45 = arith.constant 5.000000e-01 : f32
    %107 = vector.broadcast %cst_45 : f32 to vector<16x256xf32>
    %108 = arith.mulf %107, %106 : vector<16x256xf32>
    %109 = arith.mulf %96, %108 : vector<16x256xf32>
    %110 = arith.truncf %109 : vector<16x256xf32> to vector<16x256xbf16>
    %c0_46 = arith.constant 0 : index
    %c0_47 = arith.constant 0 : index
    %c512 = arith.constant 512 : index
    %111 = vector.load %arg1[%c0_46, %c0_47, %c512] : memref<4x64x768xbf16, #tpu.memory_space<vmem>>, vector<1x64x256xbf16>
    %112 = vector.shape_cast %111 : vector<1x64x256xbf16> to vector<64x256xbf16>
    %cst_48 = arith.constant dense<0.000000e+00> : vector<16x64xf32>
    %113 = tpu.matmul %110, %112, %cst_48 {dimension_numbers = #tpu.dot_dimension_numbers<[1], [1], [0], [0], [0, 0, 1, 0], [], []>} : vector<16x256xbf16>, vector<64x256xbf16>, vector<16x64xf32> -> vector<16x64xf32>
    %114 = arith.addf %66, %113 : vector<16x64xf32>
    %c0_49 = arith.constant 0 : index
    %c7 = arith.constant 7 : index
    %c0_50 = arith.constant 0 : index
    %115 = vector.load %arg2[%c0_49, %c7, %c0_50] : memref<4x8x256xf32, #tpu.memory_space<vmem>>, vector<1x1x64xf32>
    %116 = vector.shape_cast %115 : vector<1x1x64xf32> to vector<1x64xf32>
    %117 = vector.broadcast %116 : vector<1x64xf32> to vector<16x64xf32>
    %118 = arith.addf %114, %117 : vector<16x64xf32>
    %c1_51 = arith.constant 1 : index
    %c2_52 = arith.constant 2 : index
    %c0_53 = arith.constant 0 : index
    %119 = vector.load %arg2[%c1_51, %c2_52, %c0_53] : memref<4x8x256xf32, #tpu.memory_space<vmem>>, vector<1x1x64xf32>
    %120 = vector.shape_cast %119 : vector<1x1x64xf32> to vector<1x64xf32>
    %c1_54 = arith.constant 1 : index
    %c3_55 = arith.constant 3 : index
    %c0_56 = arith.constant 0 : index
    %121 = vector.load %arg2[%c1_54, %c3_55, %c0_56] : memref<4x8x256xf32, #tpu.memory_space<vmem>>, vector<1x1x64xf32>
    %122 = vector.shape_cast %121 : vector<1x1x64xf32> to vector<1x64xf32>
    %c1_57 = arith.constant 1 : index
    %c4_58 = arith.constant 4 : index
    %c0_59 = arith.constant 0 : index
    %123 = vector.load %arg2[%c1_57, %c4_58, %c0_59] : memref<4x8x256xf32, #tpu.memory_space<vmem>>, vector<1x1x64xf32>
    %124 = vector.shape_cast %123 : vector<1x1x64xf32> to vector<1x64xf32>
    %c1_60 = arith.constant 1 : index
    %c5_61 = arith.constant 5 : index
    %c0_62 = arith.constant 0 : index
    %125 = vector.load %arg2[%c1_60, %c5_61, %c0_62] : memref<4x8x256xf32, #tpu.memory_space<vmem>>, vector<1x1x64xf32>
    %126 = vector.shape_cast %125 : vector<1x1x64xf32> to vector<1x64xf32>
    %cst_63 = arith.constant dense<0.000000e+00> : vector<16xf32>
    %127 = vector.multi_reduction <add>, %118, %cst_63 [1] : vector<16x64xf32> to vector<16xf32>
    %128 = vector.shape_cast %127 : vector<16xf32> to vector<16x1xf32>
    %cst_64 = arith.constant 6.400000e+01 : f32
    %129 = vector.broadcast %cst_64 : f32 to vector<16x1xf32>
    %130 = arith.divf %128, %129 : vector<16x1xf32>
    %131 = vector.broadcast %130 : vector<16x1xf32> to vector<16x64xf32>
    %132 = arith.subf %118, %131 : vector<16x64xf32>
    %133 = arith.mulf %132, %132 : vector<16x64xf32>
    %cst_65 = arith.constant dense<0.000000e+00> : vector<16xf32>
    %134 = vector.multi_reduction <add>, %133, %cst_65 [1] : vector<16x64xf32> to vector<16xf32>
    %135 = vector.shape_cast %134 : vector<16xf32> to vector<16x1xf32>
    %cst_66 = arith.constant 6.400000e+01 : f32
    %136 = vector.broadcast %cst_66 : f32 to vector<16x1xf32>
    %137 = arith.divf %135, %136 : vector<16x1xf32>
    %138 = vector.broadcast %130 : vector<16x1xf32> to vector<16x64xf32>
    %139 = arith.subf %118, %138 : vector<16x64xf32>
    %cst_67 = arith.constant 9.99999974E-6 : f32
    %140 = vector.broadcast %cst_67 : f32 to vector<16x1xf32>
    %141 = arith.addf %137, %140 : vector<16x1xf32>
    %142 = math.rsqrt %141 : vector<16x1xf32>
    %143 = vector.broadcast %142 : vector<16x1xf32> to vector<16x64xf32>
    %144 = arith.mulf %139, %143 : vector<16x64xf32>
    %145 = vector.broadcast %120 : vector<1x64xf32> to vector<16x64xf32>
    %146 = arith.mulf %144, %145 : vector<16x64xf32>
    %147 = vector.broadcast %122 : vector<1x64xf32> to vector<16x64xf32>
    %148 = arith.addf %146, %147 : vector<16x64xf32>
    %c1_68 = arith.constant 1 : index
    %c0_69 = arith.constant 0 : index
    %c0_70 = arith.constant 0 : index
    %149 = vector.load %arg1[%c1_68, %c0_69, %c0_70] : memref<4x64x768xbf16, #tpu.memory_space<vmem>>, vector<1x64x192xbf16>
    %150 = vector.shape_cast %149 : vector<1x64x192xbf16> to vector<64x192xbf16>
    %151 = arith.truncf %148 : vector<16x64xf32> to vector<16x64xbf16>
    %cst_71 = arith.constant dense<0.000000e+00> : vector<16x192xf32>
    %152 = tpu.matmul %151, %150, %cst_71 {dimension_numbers = #tpu.dot_dimension_numbers<[1], [0], [0], [1], [0, 0, 1, 1], [], []>} : vector<16x64xbf16>, vector<64x192xbf16>, vector<16x192xf32> -> vector<16x192xf32>
    %c1_72 = arith.constant 1 : index
    %c0_73 = arith.constant 0 : index
    %c0_74 = arith.constant 0 : index
    %153 = vector.load %arg2[%c1_72, %c0_73, %c0_74] : memref<4x8x256xf32, #tpu.memory_space<vmem>>, vector<1x1x192xf32>
    %154 = vector.shape_cast %153 : vector<1x1x192xf32> to vector<1x192xf32>
    %155 = vector.broadcast %154 : vector<1x192xf32> to vector<16x192xf32>
    %156 = arith.addf %152, %155 : vector<16x192xf32>
    %157 = vector.extract_strided_slice %156 {offsets = [0, 0], sizes = [16, 64], strides = [1, 1]} : vector<16x192xf32> to vector<16x64xf32>
    %158 = vector.extract_strided_slice %156 {offsets = [0, 64], sizes = [16, 64], strides = [1, 1]} : vector<16x192xf32> to vector<16x64xf32>
    %159 = vector.extract_strided_slice %156 {offsets = [0, 128], sizes = [16, 64], strides = [1, 1]} : vector<16x192xf32> to vector<16x64xf32>
    %cst_75 = arith.constant dense<0.000000e+00> : vector<16x16xf32>
    %160 = tpu.matmul %157, %158, %cst_75 {dimension_numbers = #tpu.dot_dimension_numbers<[1], [1], [0], [0], [0, 0, 1, 0], [], []>} : vector<16x64xf32>, vector<16x64xf32>, vector<16x16xf32> -> vector<16x16xf32>
    %cst_76 = arith.constant 1.250000e-01 : f32
    %161 = vector.broadcast %cst_76 : f32 to vector<16x16xf32>
    %162 = arith.mulf %160, %161 : vector<16x16xf32>
    %163 = arith.addf %162, %1 : vector<16x16xf32>
    %cst_77 = arith.constant dense<0xFF800000> : vector<16xf32>
    %164 = vector.multi_reduction <maximumf>, %163, %cst_77 [1] : vector<16x16xf32> to vector<16xf32>
    %165 = vector.shape_cast %164 : vector<16xf32> to vector<16x1xf32>
    %166 = vector.broadcast %165 : vector<16x1xf32> to vector<16x16xf32>
    %167 = arith.subf %163, %166 : vector<16x16xf32>
    %168 = math.exp %167 : vector<16x16xf32>
    %cst_78 = arith.constant dense<0.000000e+00> : vector<16xf32>
    %169 = vector.multi_reduction <add>, %168, %cst_78 [1] : vector<16x16xf32> to vector<16xf32>
    %170 = vector.shape_cast %169 : vector<16xf32> to vector<16x1xf32>
    %171 = tpu.reciprocal %170 {approx = true} : vector<16x1xf32> -> vector<16x1xf32>
    %172 = vector.broadcast %171 : vector<16x1xf32> to vector<16x16xf32>
    %173 = arith.mulf %168, %172 : vector<16x16xf32>
    %cst_79 = arith.constant dense<0.000000e+00> : vector<16x64xf32>
    %174 = tpu.matmul %173, %159, %cst_79 {dimension_numbers = #tpu.dot_dimension_numbers<[1], [0], [0], [1], [0, 0, 1, 1], [], []>} : vector<16x16xf32>, vector<16x64xf32>, vector<16x64xf32> -> vector<16x64xf32>
    %c1_80 = arith.constant 1 : index
    %c0_81 = arith.constant 0 : index
    %c192_82 = arith.constant 192 : index
    %175 = vector.load %arg1[%c1_80, %c0_81, %c192_82] : memref<4x64x768xbf16, #tpu.memory_space<vmem>>, vector<1x64x64xbf16>
    %176 = vector.shape_cast %175 : vector<1x64x64xbf16> to vector<64x64xbf16>
    %177 = arith.truncf %174 : vector<16x64xf32> to vector<16x64xbf16>
    %cst_83 = arith.constant dense<0.000000e+00> : vector<16x64xf32>
    %178 = tpu.matmul %177, %176, %cst_83 {dimension_numbers = #tpu.dot_dimension_numbers<[1], [0], [0], [1], [0, 0, 1, 1], [], []>} : vector<16x64xbf16>, vector<64x64xbf16>, vector<16x64xf32> -> vector<16x64xf32>
    %179 = arith.addf %118, %178 : vector<16x64xf32>
    %c1_84 = arith.constant 1 : index
    %c1_85 = arith.constant 1 : index
    %c0_86 = arith.constant 0 : index
    %180 = vector.load %arg2[%c1_84, %c1_85, %c0_86] : memref<4x8x256xf32, #tpu.memory_space<vmem>>, vector<1x1x64xf32>
    %181 = vector.shape_cast %180 : vector<1x1x64xf32> to vector<1x64xf32>
    %182 = vector.broadcast %181 : vector<1x64xf32> to vector<16x64xf32>
    %183 = arith.addf %179, %182 : vector<16x64xf32>
    %cst_87 = arith.constant dense<0.000000e+00> : vector<16xf32>
    %184 = vector.multi_reduction <add>, %183, %cst_87 [1] : vector<16x64xf32> to vector<16xf32>
    %185 = vector.shape_cast %184 : vector<16xf32> to vector<16x1xf32>
    %cst_88 = arith.constant 6.400000e+01 : f32
    %186 = vector.broadcast %cst_88 : f32 to vector<16x1xf32>
    %187 = arith.divf %185, %186 : vector<16x1xf32>
    %188 = vector.broadcast %187 : vector<16x1xf32> to vector<16x64xf32>
    %189 = arith.subf %183, %188 : vector<16x64xf32>
    %190 = arith.mulf %189, %189 : vector<16x64xf32>
    %cst_89 = arith.constant dense<0.000000e+00> : vector<16xf32>
    %191 = vector.multi_reduction <add>, %190, %cst_89 [1] : vector<16x64xf32> to vector<16xf32>
    %192 = vector.shape_cast %191 : vector<16xf32> to vector<16x1xf32>
    %cst_90 = arith.constant 6.400000e+01 : f32
    %193 = vector.broadcast %cst_90 : f32 to vector<16x1xf32>
    %194 = arith.divf %192, %193 : vector<16x1xf32>
    %195 = vector.broadcast %187 : vector<16x1xf32> to vector<16x64xf32>
    %196 = arith.subf %183, %195 : vector<16x64xf32>
    %cst_91 = arith.constant 9.99999974E-6 : f32
    %197 = vector.broadcast %cst_91 : f32 to vector<16x1xf32>
    %198 = arith.addf %194, %197 : vector<16x1xf32>
    %199 = math.rsqrt %198 : vector<16x1xf32>
    %200 = vector.broadcast %199 : vector<16x1xf32> to vector<16x64xf32>
    %201 = arith.mulf %196, %200 : vector<16x64xf32>
    %202 = vector.broadcast %124 : vector<1x64xf32> to vector<16x64xf32>
    %203 = arith.mulf %201, %202 : vector<16x64xf32>
    %204 = vector.broadcast %126 : vector<1x64xf32> to vector<16x64xf32>
    %205 = arith.addf %203, %204 : vector<16x64xf32>
    %c1_92 = arith.constant 1 : index
    %c0_93 = arith.constant 0 : index
    %c256_94 = arith.constant 256 : index
    %206 = vector.load %arg1[%c1_92, %c0_93, %c256_94] : memref<4x64x768xbf16, #tpu.memory_space<vmem>>, vector<1x64x256xbf16>
    %207 = vector.shape_cast %206 : vector<1x64x256xbf16> to vector<64x256xbf16>
    %208 = arith.truncf %205 : vector<16x64xf32> to vector<16x64xbf16>
    %cst_95 = arith.constant dense<0.000000e+00> : vector<16x256xf32>
    %209 = tpu.matmul %208, %207, %cst_95 {dimension_numbers = #tpu.dot_dimension_numbers<[1], [0], [0], [1], [0, 0, 1, 1], [], []>} : vector<16x64xbf16>, vector<64x256xbf16>, vector<16x256xf32> -> vector<16x256xf32>
    %c1_96 = arith.constant 1 : index
    %c6_97 = arith.constant 6 : index
    %c0_98 = arith.constant 0 : index
    %210 = vector.load %arg2[%c1_96, %c6_97, %c0_98] : memref<4x8x256xf32, #tpu.memory_space<vmem>>, vector<1x1x256xf32>
    %211 = vector.shape_cast %210 : vector<1x1x256xf32> to vector<1x256xf32>
    %212 = vector.broadcast %211 : vector<1x256xf32> to vector<16x256xf32>
    %213 = arith.addf %209, %212 : vector<16x256xf32>
    %214 = arith.mulf %213, %213 : vector<16x256xf32>
    %215 = arith.mulf %213, %214 : vector<16x256xf32>
    %cst_99 = arith.constant 4.471500e-02 : f32
    %216 = vector.broadcast %cst_99 : f32 to vector<16x256xf32>
    %217 = arith.mulf %216, %215 : vector<16x256xf32>
    %218 = arith.addf %213, %217 : vector<16x256xf32>
    %cst_100 = arith.constant 0.797884583 : f32
    %219 = vector.broadcast %cst_100 : f32 to vector<16x256xf32>
    %220 = arith.mulf %219, %218 : vector<16x256xf32>
    %221 = math.tanh %220 : vector<16x256xf32>
    %cst_101 = arith.constant 1.000000e+00 : f32
    %222 = vector.broadcast %cst_101 : f32 to vector<16x256xf32>
    %223 = arith.addf %222, %221 : vector<16x256xf32>
    %cst_102 = arith.constant 5.000000e-01 : f32
    %224 = vector.broadcast %cst_102 : f32 to vector<16x256xf32>
    %225 = arith.mulf %224, %223 : vector<16x256xf32>
    %226 = arith.mulf %213, %225 : vector<16x256xf32>
    %227 = arith.truncf %226 : vector<16x256xf32> to vector<16x256xbf16>
    %c1_103 = arith.constant 1 : index
    %c0_104 = arith.constant 0 : index
    %c512_105 = arith.constant 512 : index
    %228 = vector.load %arg1[%c1_103, %c0_104, %c512_105] : memref<4x64x768xbf16, #tpu.memory_space<vmem>>, vector<1x64x256xbf16>
    %229 = vector.shape_cast %228 : vector<1x64x256xbf16> to vector<64x256xbf16>
    %cst_106 = arith.constant dense<0.000000e+00> : vector<16x64xf32>
    %230 = tpu.matmul %227, %229, %cst_106 {dimension_numbers = #tpu.dot_dimension_numbers<[1], [1], [0], [0], [0, 0, 1, 0], [], []>} : vector<16x256xbf16>, vector<64x256xbf16>, vector<16x64xf32> -> vector<16x64xf32>
    %231 = arith.addf %183, %230 : vector<16x64xf32>
    %c1_107 = arith.constant 1 : index
    %c7_108 = arith.constant 7 : index
    %c0_109 = arith.constant 0 : index
    %232 = vector.load %arg2[%c1_107, %c7_108, %c0_109] : memref<4x8x256xf32, #tpu.memory_space<vmem>>, vector<1x1x64xf32>
    %233 = vector.shape_cast %232 : vector<1x1x64xf32> to vector<1x64xf32>
    %234 = vector.broadcast %233 : vector<1x64xf32> to vector<16x64xf32>
    %235 = arith.addf %231, %234 : vector<16x64xf32>
    %c24 = arith.constant 24 : index
    %c0_110 = arith.constant 0 : index
    %236 = vector.load %arg3[%c24, %c0_110] : memref<200x128xf32, #tpu.memory_space<vmem>>, vector<64x32xf32>
    %cst_111 = arith.constant dense<0.000000e+00> : vector<16x32xf32>
    %237 = tpu.matmul %235, %236, %cst_111 {dimension_numbers = #tpu.dot_dimension_numbers<[1], [0], [0], [1], [0, 0, 1, 1], [], []>} : vector<16x64xf32>, vector<64x32xf32>, vector<16x32xf32> -> vector<16x32xf32>
    %c120 = arith.constant 120 : index
    %c0_112 = arith.constant 0 : index
    %238 = vector.load %arg3[%c120, %c0_112] : memref<200x128xf32, #tpu.memory_space<vmem>>, vector<1x32xf32>
    %239 = vector.broadcast %238 : vector<1x32xf32> to vector<16x32xf32>
    %240 = arith.addf %237, %239 : vector<16x32xf32>
    %c88 = arith.constant 88 : index
    %c0_113 = arith.constant 0 : index
    %241 = vector.load %arg3[%c88, %c0_113] : memref<200x128xf32, #tpu.memory_space<vmem>>, vector<32x64xf32>
    %cst_114 = arith.constant dense<0.000000e+00> : vector<16x64xf32>
    %242 = tpu.matmul %240, %241, %cst_114 {dimension_numbers = #tpu.dot_dimension_numbers<[1], [0], [0], [1], [0, 0, 1, 1], [], []>} : vector<16x32xf32>, vector<32x64xf32>, vector<16x64xf32> -> vector<16x64xf32>
    %c121 = arith.constant 121 : index
    %c0_115 = arith.constant 0 : index
    %243 = vector.load %arg3[%c121, %c0_115] : memref<200x128xf32, #tpu.memory_space<vmem>>, vector<1x64xf32>
    %244 = vector.broadcast %243 : vector<1x64xf32> to vector<16x64xf32>
    %245 = arith.addf %242, %244 : vector<16x64xf32>
    %c2_116 = arith.constant 2 : index
    %c2_117 = arith.constant 2 : index
    %c0_118 = arith.constant 0 : index
    %246 = vector.load %arg2[%c2_116, %c2_117, %c0_118] : memref<4x8x256xf32, #tpu.memory_space<vmem>>, vector<1x1x64xf32>
    %247 = vector.shape_cast %246 : vector<1x1x64xf32> to vector<1x64xf32>
    %c2_119 = arith.constant 2 : index
    %c3_120 = arith.constant 3 : index
    %c0_121 = arith.constant 0 : index
    %248 = vector.load %arg2[%c2_119, %c3_120, %c0_121] : memref<4x8x256xf32, #tpu.memory_space<vmem>>, vector<1x1x64xf32>
    %249 = vector.shape_cast %248 : vector<1x1x64xf32> to vector<1x64xf32>
    %c2_122 = arith.constant 2 : index
    %c4_123 = arith.constant 4 : index
    %c0_124 = arith.constant 0 : index
    %250 = vector.load %arg2[%c2_122, %c4_123, %c0_124] : memref<4x8x256xf32, #tpu.memory_space<vmem>>, vector<1x1x64xf32>
    %251 = vector.shape_cast %250 : vector<1x1x64xf32> to vector<1x64xf32>
    %c2_125 = arith.constant 2 : index
    %c5_126 = arith.constant 5 : index
    %c0_127 = arith.constant 0 : index
    %252 = vector.load %arg2[%c2_125, %c5_126, %c0_127] : memref<4x8x256xf32, #tpu.memory_space<vmem>>, vector<1x1x64xf32>
    %253 = vector.shape_cast %252 : vector<1x1x64xf32> to vector<1x64xf32>
    %cst_128 = arith.constant dense<0.000000e+00> : vector<16xf32>
    %254 = vector.multi_reduction <add>, %245, %cst_128 [1] : vector<16x64xf32> to vector<16xf32>
    %255 = vector.shape_cast %254 : vector<16xf32> to vector<16x1xf32>
    %cst_129 = arith.constant 6.400000e+01 : f32
    %256 = vector.broadcast %cst_129 : f32 to vector<16x1xf32>
    %257 = arith.divf %255, %256 : vector<16x1xf32>
    %258 = vector.broadcast %257 : vector<16x1xf32> to vector<16x64xf32>
    %259 = arith.subf %245, %258 : vector<16x64xf32>
    %260 = arith.mulf %259, %259 : vector<16x64xf32>
    %cst_130 = arith.constant dense<0.000000e+00> : vector<16xf32>
    %261 = vector.multi_reduction <add>, %260, %cst_130 [1] : vector<16x64xf32> to vector<16xf32>
    %262 = vector.shape_cast %261 : vector<16xf32> to vector<16x1xf32>
    %cst_131 = arith.constant 6.400000e+01 : f32
    %263 = vector.broadcast %cst_131 : f32 to vector<16x1xf32>
    %264 = arith.divf %262, %263 : vector<16x1xf32>
    %265 = vector.broadcast %257 : vector<16x1xf32> to vector<16x64xf32>
    %266 = arith.subf %245, %265 : vector<16x64xf32>
    %cst_132 = arith.constant 9.99999974E-6 : f32
    %267 = vector.broadcast %cst_132 : f32 to vector<16x1xf32>
    %268 = arith.addf %264, %267 : vector<16x1xf32>
    %269 = math.rsqrt %268 : vector<16x1xf32>
    %270 = vector.broadcast %269 : vector<16x1xf32> to vector<16x64xf32>
    %271 = arith.mulf %266, %270 : vector<16x64xf32>
    %272 = vector.broadcast %247 : vector<1x64xf32> to vector<16x64xf32>
    %273 = arith.mulf %271, %272 : vector<16x64xf32>
    %274 = vector.broadcast %249 : vector<1x64xf32> to vector<16x64xf32>
    %275 = arith.addf %273, %274 : vector<16x64xf32>
    %c2_133 = arith.constant 2 : index
    %c0_134 = arith.constant 0 : index
    %c0_135 = arith.constant 0 : index
    %276 = vector.load %arg1[%c2_133, %c0_134, %c0_135] : memref<4x64x768xbf16, #tpu.memory_space<vmem>>, vector<1x64x192xbf16>
    %277 = vector.shape_cast %276 : vector<1x64x192xbf16> to vector<64x192xbf16>
    %278 = arith.truncf %275 : vector<16x64xf32> to vector<16x64xbf16>
    %cst_136 = arith.constant dense<0.000000e+00> : vector<16x192xf32>
    %279 = tpu.matmul %278, %277, %cst_136 {dimension_numbers = #tpu.dot_dimension_numbers<[1], [0], [0], [1], [0, 0, 1, 1], [], []>} : vector<16x64xbf16>, vector<64x192xbf16>, vector<16x192xf32> -> vector<16x192xf32>
    %c2_137 = arith.constant 2 : index
    %c0_138 = arith.constant 0 : index
    %c0_139 = arith.constant 0 : index
    %280 = vector.load %arg2[%c2_137, %c0_138, %c0_139] : memref<4x8x256xf32, #tpu.memory_space<vmem>>, vector<1x1x192xf32>
    %281 = vector.shape_cast %280 : vector<1x1x192xf32> to vector<1x192xf32>
    %282 = vector.broadcast %281 : vector<1x192xf32> to vector<16x192xf32>
    %283 = arith.addf %279, %282 : vector<16x192xf32>
    %284 = vector.extract_strided_slice %283 {offsets = [0, 0], sizes = [16, 64], strides = [1, 1]} : vector<16x192xf32> to vector<16x64xf32>
    %285 = vector.extract_strided_slice %283 {offsets = [0, 64], sizes = [16, 64], strides = [1, 1]} : vector<16x192xf32> to vector<16x64xf32>
    %286 = vector.extract_strided_slice %283 {offsets = [0, 128], sizes = [16, 64], strides = [1, 1]} : vector<16x192xf32> to vector<16x64xf32>
    %cst_140 = arith.constant dense<0.000000e+00> : vector<16x16xf32>
    %287 = tpu.matmul %284, %285, %cst_140 {dimension_numbers = #tpu.dot_dimension_numbers<[1], [1], [0], [0], [0, 0, 1, 0], [], []>} : vector<16x64xf32>, vector<16x64xf32>, vector<16x16xf32> -> vector<16x16xf32>
    %cst_141 = arith.constant 1.250000e-01 : f32
    %288 = vector.broadcast %cst_141 : f32 to vector<16x16xf32>
    %289 = arith.mulf %287, %288 : vector<16x16xf32>
    %290 = arith.addf %289, %1 : vector<16x16xf32>
    %cst_142 = arith.constant dense<0xFF800000> : vector<16xf32>
    %291 = vector.multi_reduction <maximumf>, %290, %cst_142 [1] : vector<16x16xf32> to vector<16xf32>
    %292 = vector.shape_cast %291 : vector<16xf32> to vector<16x1xf32>
    %293 = vector.broadcast %292 : vector<16x1xf32> to vector<16x16xf32>
    %294 = arith.subf %290, %293 : vector<16x16xf32>
    %295 = math.exp %294 : vector<16x16xf32>
    %cst_143 = arith.constant dense<0.000000e+00> : vector<16xf32>
    %296 = vector.multi_reduction <add>, %295, %cst_143 [1] : vector<16x16xf32> to vector<16xf32>
    %297 = vector.shape_cast %296 : vector<16xf32> to vector<16x1xf32>
    %298 = tpu.reciprocal %297 {approx = true} : vector<16x1xf32> -> vector<16x1xf32>
    %299 = vector.broadcast %298 : vector<16x1xf32> to vector<16x16xf32>
    %300 = arith.mulf %295, %299 : vector<16x16xf32>
    %cst_144 = arith.constant dense<0.000000e+00> : vector<16x64xf32>
    %301 = tpu.matmul %300, %286, %cst_144 {dimension_numbers = #tpu.dot_dimension_numbers<[1], [0], [0], [1], [0, 0, 1, 1], [], []>} : vector<16x16xf32>, vector<16x64xf32>, vector<16x64xf32> -> vector<16x64xf32>
    %c2_145 = arith.constant 2 : index
    %c0_146 = arith.constant 0 : index
    %c192_147 = arith.constant 192 : index
    %302 = vector.load %arg1[%c2_145, %c0_146, %c192_147] : memref<4x64x768xbf16, #tpu.memory_space<vmem>>, vector<1x64x64xbf16>
    %303 = vector.shape_cast %302 : vector<1x64x64xbf16> to vector<64x64xbf16>
    %304 = arith.truncf %301 : vector<16x64xf32> to vector<16x64xbf16>
    %cst_148 = arith.constant dense<0.000000e+00> : vector<16x64xf32>
    %305 = tpu.matmul %304, %303, %cst_148 {dimension_numbers = #tpu.dot_dimension_numbers<[1], [0], [0], [1], [0, 0, 1, 1], [], []>} : vector<16x64xbf16>, vector<64x64xbf16>, vector<16x64xf32> -> vector<16x64xf32>
    %306 = arith.addf %245, %305 : vector<16x64xf32>
    %c2_149 = arith.constant 2 : index
    %c1_150 = arith.constant 1 : index
    %c0_151 = arith.constant 0 : index
    %307 = vector.load %arg2[%c2_149, %c1_150, %c0_151] : memref<4x8x256xf32, #tpu.memory_space<vmem>>, vector<1x1x64xf32>
    %308 = vector.shape_cast %307 : vector<1x1x64xf32> to vector<1x64xf32>
    %309 = vector.broadcast %308 : vector<1x64xf32> to vector<16x64xf32>
    %310 = arith.addf %306, %309 : vector<16x64xf32>
    %cst_152 = arith.constant dense<0.000000e+00> : vector<16xf32>
    %311 = vector.multi_reduction <add>, %310, %cst_152 [1] : vector<16x64xf32> to vector<16xf32>
    %312 = vector.shape_cast %311 : vector<16xf32> to vector<16x1xf32>
    %cst_153 = arith.constant 6.400000e+01 : f32
    %313 = vector.broadcast %cst_153 : f32 to vector<16x1xf32>
    %314 = arith.divf %312, %313 : vector<16x1xf32>
    %315 = vector.broadcast %314 : vector<16x1xf32> to vector<16x64xf32>
    %316 = arith.subf %310, %315 : vector<16x64xf32>
    %317 = arith.mulf %316, %316 : vector<16x64xf32>
    %cst_154 = arith.constant dense<0.000000e+00> : vector<16xf32>
    %318 = vector.multi_reduction <add>, %317, %cst_154 [1] : vector<16x64xf32> to vector<16xf32>
    %319 = vector.shape_cast %318 : vector<16xf32> to vector<16x1xf32>
    %cst_155 = arith.constant 6.400000e+01 : f32
    %320 = vector.broadcast %cst_155 : f32 to vector<16x1xf32>
    %321 = arith.divf %319, %320 : vector<16x1xf32>
    %322 = vector.broadcast %314 : vector<16x1xf32> to vector<16x64xf32>
    %323 = arith.subf %310, %322 : vector<16x64xf32>
    %cst_156 = arith.constant 9.99999974E-6 : f32
    %324 = vector.broadcast %cst_156 : f32 to vector<16x1xf32>
    %325 = arith.addf %321, %324 : vector<16x1xf32>
    %326 = math.rsqrt %325 : vector<16x1xf32>
    %327 = vector.broadcast %326 : vector<16x1xf32> to vector<16x64xf32>
    %328 = arith.mulf %323, %327 : vector<16x64xf32>
    %329 = vector.broadcast %251 : vector<1x64xf32> to vector<16x64xf32>
    %330 = arith.mulf %328, %329 : vector<16x64xf32>
    %331 = vector.broadcast %253 : vector<1x64xf32> to vector<16x64xf32>
    %332 = arith.addf %330, %331 : vector<16x64xf32>
    %c2_157 = arith.constant 2 : index
    %c0_158 = arith.constant 0 : index
    %c256_159 = arith.constant 256 : index
    %333 = vector.load %arg1[%c2_157, %c0_158, %c256_159] : memref<4x64x768xbf16, #tpu.memory_space<vmem>>, vector<1x64x256xbf16>
    %334 = vector.shape_cast %333 : vector<1x64x256xbf16> to vector<64x256xbf16>
    %335 = arith.truncf %332 : vector<16x64xf32> to vector<16x64xbf16>
    %cst_160 = arith.constant dense<0.000000e+00> : vector<16x256xf32>
    %336 = tpu.matmul %335, %334, %cst_160 {dimension_numbers = #tpu.dot_dimension_numbers<[1], [0], [0], [1], [0, 0, 1, 1], [], []>} : vector<16x64xbf16>, vector<64x256xbf16>, vector<16x256xf32> -> vector<16x256xf32>
    %c2_161 = arith.constant 2 : index
    %c6_162 = arith.constant 6 : index
    %c0_163 = arith.constant 0 : index
    %337 = vector.load %arg2[%c2_161, %c6_162, %c0_163] : memref<4x8x256xf32, #tpu.memory_space<vmem>>, vector<1x1x256xf32>
    %338 = vector.shape_cast %337 : vector<1x1x256xf32> to vector<1x256xf32>
    %339 = vector.broadcast %338 : vector<1x256xf32> to vector<16x256xf32>
    %340 = arith.addf %336, %339 : vector<16x256xf32>
    %341 = arith.mulf %340, %340 : vector<16x256xf32>
    %342 = arith.mulf %340, %341 : vector<16x256xf32>
    %cst_164 = arith.constant 4.471500e-02 : f32
    %343 = vector.broadcast %cst_164 : f32 to vector<16x256xf32>
    %344 = arith.mulf %343, %342 : vector<16x256xf32>
    %345 = arith.addf %340, %344 : vector<16x256xf32>
    %cst_165 = arith.constant 0.797884583 : f32
    %346 = vector.broadcast %cst_165 : f32 to vector<16x256xf32>
    %347 = arith.mulf %346, %345 : vector<16x256xf32>
    %348 = math.tanh %347 : vector<16x256xf32>
    %cst_166 = arith.constant 1.000000e+00 : f32
    %349 = vector.broadcast %cst_166 : f32 to vector<16x256xf32>
    %350 = arith.addf %349, %348 : vector<16x256xf32>
    %cst_167 = arith.constant 5.000000e-01 : f32
    %351 = vector.broadcast %cst_167 : f32 to vector<16x256xf32>
    %352 = arith.mulf %351, %350 : vector<16x256xf32>
    %353 = arith.mulf %340, %352 : vector<16x256xf32>
    %354 = arith.truncf %353 : vector<16x256xf32> to vector<16x256xbf16>
    %c2_168 = arith.constant 2 : index
    %c0_169 = arith.constant 0 : index
    %c512_170 = arith.constant 512 : index
    %355 = vector.load %arg1[%c2_168, %c0_169, %c512_170] : memref<4x64x768xbf16, #tpu.memory_space<vmem>>, vector<1x64x256xbf16>
    %356 = vector.shape_cast %355 : vector<1x64x256xbf16> to vector<64x256xbf16>
    %cst_171 = arith.constant dense<0.000000e+00> : vector<16x64xf32>
    %357 = tpu.matmul %354, %356, %cst_171 {dimension_numbers = #tpu.dot_dimension_numbers<[1], [1], [0], [0], [0, 0, 1, 0], [], []>} : vector<16x256xbf16>, vector<64x256xbf16>, vector<16x64xf32> -> vector<16x64xf32>
    %358 = arith.addf %310, %357 : vector<16x64xf32>
    %c2_172 = arith.constant 2 : index
    %c7_173 = arith.constant 7 : index
    %c0_174 = arith.constant 0 : index
    %359 = vector.load %arg2[%c2_172, %c7_173, %c0_174] : memref<4x8x256xf32, #tpu.memory_space<vmem>>, vector<1x1x64xf32>
    %360 = vector.shape_cast %359 : vector<1x1x64xf32> to vector<1x64xf32>
    %361 = vector.broadcast %360 : vector<1x64xf32> to vector<16x64xf32>
    %362 = arith.addf %358, %361 : vector<16x64xf32>
    %c3_175 = arith.constant 3 : index
    %c2_176 = arith.constant 2 : index
    %c0_177 = arith.constant 0 : index
    %363 = vector.load %arg2[%c3_175, %c2_176, %c0_177] : memref<4x8x256xf32, #tpu.memory_space<vmem>>, vector<1x1x64xf32>
    %364 = vector.shape_cast %363 : vector<1x1x64xf32> to vector<1x64xf32>
    %c3_178 = arith.constant 3 : index
    %c3_179 = arith.constant 3 : index
    %c0_180 = arith.constant 0 : index
    %365 = vector.load %arg2[%c3_178, %c3_179, %c0_180] : memref<4x8x256xf32, #tpu.memory_space<vmem>>, vector<1x1x64xf32>
    %366 = vector.shape_cast %365 : vector<1x1x64xf32> to vector<1x64xf32>
    %c3_181 = arith.constant 3 : index
    %c4_182 = arith.constant 4 : index
    %c0_183 = arith.constant 0 : index
    %367 = vector.load %arg2[%c3_181, %c4_182, %c0_183] : memref<4x8x256xf32, #tpu.memory_space<vmem>>, vector<1x1x64xf32>
    %368 = vector.shape_cast %367 : vector<1x1x64xf32> to vector<1x64xf32>
    %c3_184 = arith.constant 3 : index
    %c5_185 = arith.constant 5 : index
    %c0_186 = arith.constant 0 : index
    %369 = vector.load %arg2[%c3_184, %c5_185, %c0_186] : memref<4x8x256xf32, #tpu.memory_space<vmem>>, vector<1x1x64xf32>
    %370 = vector.shape_cast %369 : vector<1x1x64xf32> to vector<1x64xf32>
    %cst_187 = arith.constant dense<0.000000e+00> : vector<16xf32>
    %371 = vector.multi_reduction <add>, %362, %cst_187 [1] : vector<16x64xf32> to vector<16xf32>
    %372 = vector.shape_cast %371 : vector<16xf32> to vector<16x1xf32>
    %cst_188 = arith.constant 6.400000e+01 : f32
    %373 = vector.broadcast %cst_188 : f32 to vector<16x1xf32>
    %374 = arith.divf %372, %373 : vector<16x1xf32>
    %375 = vector.broadcast %374 : vector<16x1xf32> to vector<16x64xf32>
    %376 = arith.subf %362, %375 : vector<16x64xf32>
    %377 = arith.mulf %376, %376 : vector<16x64xf32>
    %cst_189 = arith.constant dense<0.000000e+00> : vector<16xf32>
    %378 = vector.multi_reduction <add>, %377, %cst_189 [1] : vector<16x64xf32> to vector<16xf32>
    %379 = vector.shape_cast %378 : vector<16xf32> to vector<16x1xf32>
    %cst_190 = arith.constant 6.400000e+01 : f32
    %380 = vector.broadcast %cst_190 : f32 to vector<16x1xf32>
    %381 = arith.divf %379, %380 : vector<16x1xf32>
    %382 = vector.broadcast %374 : vector<16x1xf32> to vector<16x64xf32>
    %383 = arith.subf %362, %382 : vector<16x64xf32>
    %cst_191 = arith.constant 9.99999974E-6 : f32
    %384 = vector.broadcast %cst_191 : f32 to vector<16x1xf32>
    %385 = arith.addf %381, %384 : vector<16x1xf32>
    %386 = math.rsqrt %385 : vector<16x1xf32>
    %387 = vector.broadcast %386 : vector<16x1xf32> to vector<16x64xf32>
    %388 = arith.mulf %383, %387 : vector<16x64xf32>
    %389 = vector.broadcast %364 : vector<1x64xf32> to vector<16x64xf32>
    %390 = arith.mulf %388, %389 : vector<16x64xf32>
    %391 = vector.broadcast %366 : vector<1x64xf32> to vector<16x64xf32>
    %392 = arith.addf %390, %391 : vector<16x64xf32>
    %c3_192 = arith.constant 3 : index
    %c0_193 = arith.constant 0 : index
    %c0_194 = arith.constant 0 : index
    %393 = vector.load %arg1[%c3_192, %c0_193, %c0_194] : memref<4x64x768xbf16, #tpu.memory_space<vmem>>, vector<1x64x192xbf16>
    %394 = vector.shape_cast %393 : vector<1x64x192xbf16> to vector<64x192xbf16>
    %395 = arith.truncf %392 : vector<16x64xf32> to vector<16x64xbf16>
    %cst_195 = arith.constant dense<0.000000e+00> : vector<16x192xf32>
    %396 = tpu.matmul %395, %394, %cst_195 {dimension_numbers = #tpu.dot_dimension_numbers<[1], [0], [0], [1], [0, 0, 1, 1], [], []>} : vector<16x64xbf16>, vector<64x192xbf16>, vector<16x192xf32> -> vector<16x192xf32>
    %c3_196 = arith.constant 3 : index
    %c0_197 = arith.constant 0 : index
    %c0_198 = arith.constant 0 : index
    %397 = vector.load %arg2[%c3_196, %c0_197, %c0_198] : memref<4x8x256xf32, #tpu.memory_space<vmem>>, vector<1x1x192xf32>
    %398 = vector.shape_cast %397 : vector<1x1x192xf32> to vector<1x192xf32>
    %399 = vector.broadcast %398 : vector<1x192xf32> to vector<16x192xf32>
    %400 = arith.addf %396, %399 : vector<16x192xf32>
    %401 = vector.extract_strided_slice %400 {offsets = [0, 0], sizes = [16, 64], strides = [1, 1]} : vector<16x192xf32> to vector<16x64xf32>
    %402 = vector.extract_strided_slice %400 {offsets = [0, 64], sizes = [16, 64], strides = [1, 1]} : vector<16x192xf32> to vector<16x64xf32>
    %403 = vector.extract_strided_slice %400 {offsets = [0, 128], sizes = [16, 64], strides = [1, 1]} : vector<16x192xf32> to vector<16x64xf32>
    %cst_199 = arith.constant dense<0.000000e+00> : vector<16x16xf32>
    %404 = tpu.matmul %401, %402, %cst_199 {dimension_numbers = #tpu.dot_dimension_numbers<[1], [1], [0], [0], [0, 0, 1, 0], [], []>} : vector<16x64xf32>, vector<16x64xf32>, vector<16x16xf32> -> vector<16x16xf32>
    %cst_200 = arith.constant 1.250000e-01 : f32
    %405 = vector.broadcast %cst_200 : f32 to vector<16x16xf32>
    %406 = arith.mulf %404, %405 : vector<16x16xf32>
    %407 = arith.addf %406, %1 : vector<16x16xf32>
    %cst_201 = arith.constant dense<0xFF800000> : vector<16xf32>
    %408 = vector.multi_reduction <maximumf>, %407, %cst_201 [1] : vector<16x16xf32> to vector<16xf32>
    %409 = vector.shape_cast %408 : vector<16xf32> to vector<16x1xf32>
    %410 = vector.broadcast %409 : vector<16x1xf32> to vector<16x16xf32>
    %411 = arith.subf %407, %410 : vector<16x16xf32>
    %412 = math.exp %411 : vector<16x16xf32>
    %cst_202 = arith.constant dense<0.000000e+00> : vector<16xf32>
    %413 = vector.multi_reduction <add>, %412, %cst_202 [1] : vector<16x16xf32> to vector<16xf32>
    %414 = vector.shape_cast %413 : vector<16xf32> to vector<16x1xf32>
    %415 = tpu.reciprocal %414 {approx = true} : vector<16x1xf32> -> vector<16x1xf32>
    %416 = vector.broadcast %415 : vector<16x1xf32> to vector<16x16xf32>
    %417 = arith.mulf %412, %416 : vector<16x16xf32>
    %cst_203 = arith.constant dense<0.000000e+00> : vector<16x64xf32>
    %418 = tpu.matmul %417, %403, %cst_203 {dimension_numbers = #tpu.dot_dimension_numbers<[1], [0], [0], [1], [0, 0, 1, 1], [], []>} : vector<16x16xf32>, vector<16x64xf32>, vector<16x64xf32> -> vector<16x64xf32>
    %c3_204 = arith.constant 3 : index
    %c0_205 = arith.constant 0 : index
    %c192_206 = arith.constant 192 : index
    %419 = vector.load %arg1[%c3_204, %c0_205, %c192_206] : memref<4x64x768xbf16, #tpu.memory_space<vmem>>, vector<1x64x64xbf16>
    %420 = vector.shape_cast %419 : vector<1x64x64xbf16> to vector<64x64xbf16>
    %421 = arith.truncf %418 : vector<16x64xf32> to vector<16x64xbf16>
    %cst_207 = arith.constant dense<0.000000e+00> : vector<16x64xf32>
    %422 = tpu.matmul %421, %420, %cst_207 {dimension_numbers = #tpu.dot_dimension_numbers<[1], [0], [0], [1], [0, 0, 1, 1], [], []>} : vector<16x64xbf16>, vector<64x64xbf16>, vector<16x64xf32> -> vector<16x64xf32>
    %423 = arith.addf %362, %422 : vector<16x64xf32>
    %c3_208 = arith.constant 3 : index
    %c1_209 = arith.constant 1 : index
    %c0_210 = arith.constant 0 : index
    %424 = vector.load %arg2[%c3_208, %c1_209, %c0_210] : memref<4x8x256xf32, #tpu.memory_space<vmem>>, vector<1x1x64xf32>
    %425 = vector.shape_cast %424 : vector<1x1x64xf32> to vector<1x64xf32>
    %426 = vector.broadcast %425 : vector<1x64xf32> to vector<16x64xf32>
    %427 = arith.addf %423, %426 : vector<16x64xf32>
    %cst_211 = arith.constant dense<0.000000e+00> : vector<16xf32>
    %428 = vector.multi_reduction <add>, %427, %cst_211 [1] : vector<16x64xf32> to vector<16xf32>
    %429 = vector.shape_cast %428 : vector<16xf32> to vector<16x1xf32>
    %cst_212 = arith.constant 6.400000e+01 : f32
    %430 = vector.broadcast %cst_212 : f32 to vector<16x1xf32>
    %431 = arith.divf %429, %430 : vector<16x1xf32>
    %432 = vector.broadcast %431 : vector<16x1xf32> to vector<16x64xf32>
    %433 = arith.subf %427, %432 : vector<16x64xf32>
    %434 = arith.mulf %433, %433 : vector<16x64xf32>
    %cst_213 = arith.constant dense<0.000000e+00> : vector<16xf32>
    %435 = vector.multi_reduction <add>, %434, %cst_213 [1] : vector<16x64xf32> to vector<16xf32>
    %436 = vector.shape_cast %435 : vector<16xf32> to vector<16x1xf32>
    %cst_214 = arith.constant 6.400000e+01 : f32
    %437 = vector.broadcast %cst_214 : f32 to vector<16x1xf32>
    %438 = arith.divf %436, %437 : vector<16x1xf32>
    %439 = vector.broadcast %431 : vector<16x1xf32> to vector<16x64xf32>
    %440 = arith.subf %427, %439 : vector<16x64xf32>
    %cst_215 = arith.constant 9.99999974E-6 : f32
    %441 = vector.broadcast %cst_215 : f32 to vector<16x1xf32>
    %442 = arith.addf %438, %441 : vector<16x1xf32>
    %443 = math.rsqrt %442 : vector<16x1xf32>
    %444 = vector.broadcast %443 : vector<16x1xf32> to vector<16x64xf32>
    %445 = arith.mulf %440, %444 : vector<16x64xf32>
    %446 = vector.broadcast %368 : vector<1x64xf32> to vector<16x64xf32>
    %447 = arith.mulf %445, %446 : vector<16x64xf32>
    %448 = vector.broadcast %370 : vector<1x64xf32> to vector<16x64xf32>
    %449 = arith.addf %447, %448 : vector<16x64xf32>
    %c3_216 = arith.constant 3 : index
    %c0_217 = arith.constant 0 : index
    %c256_218 = arith.constant 256 : index
    %450 = vector.load %arg1[%c3_216, %c0_217, %c256_218] : memref<4x64x768xbf16, #tpu.memory_space<vmem>>, vector<1x64x256xbf16>
    %451 = vector.shape_cast %450 : vector<1x64x256xbf16> to vector<64x256xbf16>
    %452 = arith.truncf %449 : vector<16x64xf32> to vector<16x64xbf16>
    %cst_219 = arith.constant dense<0.000000e+00> : vector<16x256xf32>
    %453 = tpu.matmul %452, %451, %cst_219 {dimension_numbers = #tpu.dot_dimension_numbers<[1], [0], [0], [1], [0, 0, 1, 1], [], []>} : vector<16x64xbf16>, vector<64x256xbf16>, vector<16x256xf32> -> vector<16x256xf32>
    %c3_220 = arith.constant 3 : index
    %c6_221 = arith.constant 6 : index
    %c0_222 = arith.constant 0 : index
    %454 = vector.load %arg2[%c3_220, %c6_221, %c0_222] : memref<4x8x256xf32, #tpu.memory_space<vmem>>, vector<1x1x256xf32>
    %455 = vector.shape_cast %454 : vector<1x1x256xf32> to vector<1x256xf32>
    %456 = vector.broadcast %455 : vector<1x256xf32> to vector<16x256xf32>
    %457 = arith.addf %453, %456 : vector<16x256xf32>
    %458 = arith.mulf %457, %457 : vector<16x256xf32>
    %459 = arith.mulf %457, %458 : vector<16x256xf32>
    %cst_223 = arith.constant 4.471500e-02 : f32
    %460 = vector.broadcast %cst_223 : f32 to vector<16x256xf32>
    %461 = arith.mulf %460, %459 : vector<16x256xf32>
    %462 = arith.addf %457, %461 : vector<16x256xf32>
    %cst_224 = arith.constant 0.797884583 : f32
    %463 = vector.broadcast %cst_224 : f32 to vector<16x256xf32>
    %464 = arith.mulf %463, %462 : vector<16x256xf32>
    %465 = math.tanh %464 : vector<16x256xf32>
    %cst_225 = arith.constant 1.000000e+00 : f32
    %466 = vector.broadcast %cst_225 : f32 to vector<16x256xf32>
    %467 = arith.addf %466, %465 : vector<16x256xf32>
    %cst_226 = arith.constant 5.000000e-01 : f32
    %468 = vector.broadcast %cst_226 : f32 to vector<16x256xf32>
    %469 = arith.mulf %468, %467 : vector<16x256xf32>
    %470 = arith.mulf %457, %469 : vector<16x256xf32>
    %471 = arith.truncf %470 : vector<16x256xf32> to vector<16x256xbf16>
    %c3_227 = arith.constant 3 : index
    %c0_228 = arith.constant 0 : index
    %c512_229 = arith.constant 512 : index
    %472 = vector.load %arg1[%c3_227, %c0_228, %c512_229] : memref<4x64x768xbf16, #tpu.memory_space<vmem>>, vector<1x64x256xbf16>
    %473 = vector.shape_cast %472 : vector<1x64x256xbf16> to vector<64x256xbf16>
    %cst_230 = arith.constant dense<0.000000e+00> : vector<16x64xf32>
    %474 = tpu.matmul %471, %473, %cst_230 {dimension_numbers = #tpu.dot_dimension_numbers<[1], [1], [0], [0], [0, 0, 1, 0], [], []>} : vector<16x256xbf16>, vector<64x256xbf16>, vector<16x64xf32> -> vector<16x64xf32>
    %475 = arith.addf %427, %474 : vector<16x64xf32>
    %c3_231 = arith.constant 3 : index
    %c7_232 = arith.constant 7 : index
    %c0_233 = arith.constant 0 : index
    %476 = vector.load %arg2[%c3_231, %c7_232, %c0_233] : memref<4x8x256xf32, #tpu.memory_space<vmem>>, vector<1x1x64xf32>
    %477 = vector.shape_cast %476 : vector<1x1x64xf32> to vector<1x64xf32>
    %478 = vector.broadcast %477 : vector<1x64xf32> to vector<16x64xf32>
    %479 = arith.addf %475, %478 : vector<16x64xf32>
    %c16 = arith.constant 16 : index
    %c0_234 = arith.constant 0 : index
    %480 = vector.load %arg3[%c16, %c0_234] : memref<200x128xf32, #tpu.memory_space<vmem>>, vector<8x16xf32>
    %cst_235 = arith.constant dense<0.000000e+00> : vector<8x64xf32>
    %481 = tpu.matmul %480, %479, %cst_235 {dimension_numbers = #tpu.dot_dimension_numbers<[1], [0], [0], [1], [0, 0, 1, 1], [], []>} : vector<8x16xf32>, vector<16x64xf32>, vector<8x64xf32> -> vector<8x64xf32>
    %c128 = arith.constant 128 : index
    %c0_236 = arith.constant 0 : index
    %482 = vector.load %arg3[%c128, %c0_236] : memref<200x128xf32, #tpu.memory_space<vmem>>, vector<64x128xf32>
    %cst_237 = arith.constant dense<0.000000e+00> : vector<8x128xf32>
    %483 = tpu.matmul %481, %482, %cst_237 {dimension_numbers = #tpu.dot_dimension_numbers<[1], [0], [0], [1], [0, 0, 1, 1], [], []>} : vector<8x64xf32>, vector<64x128xf32>, vector<8x128xf32> -> vector<8x128xf32>
    %c192_238 = arith.constant 192 : index
    %c0_239 = arith.constant 0 : index
    %484 = vector.load %arg3[%c192_238, %c0_239] : memref<200x128xf32, #tpu.memory_space<vmem>>, vector<1x128xf32>
    %485 = vector.broadcast %484 : vector<1x128xf32> to vector<8x128xf32>
    %486 = arith.addf %483, %485 : vector<8x128xf32>
    %c0_240 = arith.constant 0 : index
    %c0_241 = arith.constant 0 : index
    %487 = vector.load %arg4[%c0_240, %c0_241] : memref<8x128xf32, #tpu.memory_space<vmem>>, vector<8x128xf32>
    tpu.vector_store %arg4[%c0_240, %c0_241], %486 {strides = array<i32>} : memref<8x128xf32, #tpu.memory_space<vmem>>, vector<8x128xf32>,
    return
  }
}

</mosaic_0001>

<bundles_post_ra>
// kernel: tpu_custom_call.1
= control target key start
LH: loop header
LB: loop body
LE: loop exit
PB: predicated region body
PF: predicated region fallthrough
CT: control target
= control target key end

     0   :  { %9 = vsyncpa [#allocation3], 0  ;;  %s3681_s0 = inlined_call_operand.hbm [shape: f32[16,64], index: 0, kind: input, shape index: {}]   ;;  %s3682_s1 = inlined_call_operand.hbm [shape: bf16[4,64,768], index: 1, kind: input, shape index: {}]   ;;  %s3683_s2 = inlined_call_operand.hbm [shape: f32[4,8,256], index: 2, kind: input, shape index: {}]   ;;  %s3684_s3 = inlined_call_operand.hbm [shape: f32[200,128], index: 3, kind: input, shape index: {}]   ;;  %s3685_s4 = inlined_call_operand.hbm [shape: f32[8,128], index: 4, kind: output, shape index: {}]  }
   0x1   :  { %10 = vsyncpa [#allocation6], 0 }
   0x2   :  { %11 = vsyncpa [#allocation9], 0  ;;  %s30_s17 = sshll.u32 %s3682_s1, 4  ;;  %s31_s17 = int_to_ptr.hbm [resolvable:$true] %s30_s17 }
   0x3   :  { %12 = vsyncpa [#allocation4], 0  ;;  %s3298_s18 = smov [#allocation5]   ;;  %s17_s22 = sshll.u32 %s3681_s0, 4  ;;  %s18_s22 = int_to_ptr.hbm [resolvable:$true] %s17_s22 }
   0x4   :  { %s32_s19 = sshll.u32 %s3298_s18, 4  ;;  %s3299_s23 = smov 384   ;;  %s33_s19 = int_to_ptr.vmem [resolvable:$true] %s32_s19 }
   0x5   :  { %s3300_s24 = smov 24   ;;  %s3301_s25 = smov [#allocation2]  }
   0x6   :  { %38 = dma.hbm_to_vmem [thread:$0]  %s31_s17, 12288, %s33_s19, [#allocation6], %s3299_s23, %s3299_s23, %s3300_s24  }
   0x7   :  { %s19_s26 = sshll.u32 %s3301_s25, 4  ;;  %s3302_s27 = smov 128   ;;  %s20_s26 = int_to_ptr.vmem [resolvable:$true] %s19_s26 }
   0x8   :  { %s3303_s28 = smov 8   ;;  %s43_s30 = sshll.u32 %s3683_s2, 4  ;;  %s44_s30 = int_to_ptr.hbm [resolvable:$true] %s43_s30 }
   0x9   :  { %25 = dma.hbm_to_vmem [thread:$0]  %s18_s22, 256, %s20_s26, [#allocation3], %s3302_s27, %s3302_s27, %s3303_s28  }
   0xa   :  { %s3304_s5 = smov [#allocation7]   ;;  %s56_s8 = sshll.u32 %s3684_s3, 4  ;;  %s57_s8 = int_to_ptr.hbm [resolvable:$true] %s56_s8 }
   0xb   :  { %s45_s6 = sshll.u32 %s3304_s5, 4  ;;  %s3305_s9 = smov 256   ;;  %s46_s6 = int_to_ptr.vmem [resolvable:$true] %s45_s6 }
   0xc   :  { %s3306_s10 = smov 16   ;;  %s3307_s11 = smov [#allocation8]  }
   0xd   :  { %51 = dma.hbm_to_vmem [thread:$0]  %s44_s30, 1024, %s46_s6, [#allocation6], %s3305_s9, %s3305_s9, %s3306_s10  }
   0xe   :  { %s58_s12 = sshll.u32 %s3307_s11, 4  ;;  %s59_s12 = int_to_ptr.vmem [resolvable:$true] %s58_s12 }
   0xf   :  { %64 = dma.hbm_to_vmem [thread:$0]  %s57_s8, 3200, %s59_s12, [#allocation9], %s3302_s27, %s3302_s27, %s3303_s28  }
  0x10   :  { %3290 = dma.done.wait [#allocation3], 256  }
  0x11   :  { %3291 = vsyncadd [#allocation3], 4294967040 }
  0x12   :  { %3292 = dma.done.wait [#allocation6], 13312  }
  0x13   :  { %3293 = vsyncadd [#allocation6], 4294953984 }
  0x14   :  { %3294 = dma.done.wait [#allocation9], 3200  }
  0x15   :  { %3295 = vsyncadd [#allocation9], 4294964096  ;;  %vm90_vm0 = vcmask 523264   ;;  %v3348_v0 = vld [vmem:[#allocation2] sm:$0xff]  ;;  %v3352_v2 = vld [vmem:[#allocation2 + $0x8] sm:$0xff]  ;;  %v3308_v4 = vmov 64.0  }
  0x16   :  { %v91_v1 = vsel %vm90_vm0, %v3348_v0, 0.0  ;;  %v94_v3 = vsel %vm90_vm0, %v3352_v2, 0.0  ;;  %3070 = vrcp.f32 %v3308_v4  ;;  %v2470_v21 = vld [vmem:[#allocation5 + $0x90] sm:$0xf]  ;;  %v2949_v22 = vld [vmem:[#allocation5 + $0xa4] sm:$0xf0] }
  0x17   :  { %92 = vadd.xlane.f32.xlu0 %v91_v1  ;;  %v2948_v23 = vld [vmem:[#allocation5 + $0x94] sm:$0xf]  ;;  %v2471_v24 = vor.u32 %v2949_v22, %v2470_v21  ;;  %v2472_v25 = vld [vmem:[#allocation5 + $0xa8] sm:$0xf0]  ;;  %v2462_v27 = vld [vmem:[#allocation5 + $0x60] sm:$0xf] }
  0x18   :  { %v2475_v26 = vor.u32 %v2948_v23, %v2472_v25  ;;  %v2947_v28 = vld [vmem:[#allocation5 + $0x74] sm:$0xf0]  ;;  %v2946_v29 = vld [vmem:[#allocation5 + $0x64] sm:$0xf]  ;;  %v2464_v31 = vld [vmem:[#allocation5 + $0x78] sm:$0xf0] }
  0x19   :  { %208 = vmatpush.bf16.msra.mxu0 %v2471_v24  ;;  %v2463_v30 = vor.u32 %v2947_v28, %v2462_v27  ;;  %v2467_v32 = vor.u32 %v2946_v29, %v2464_v31  ;;  %v2454_v33 = vld [vmem:[#allocation5 + $0x30] sm:$0xf]  ;;  %v2945_v34 = vld [vmem:[#allocation5 + $0x44] sm:$0xf0]  ;;  %v2944_v35 = vld [vmem:[#allocation5 + $0x34] sm:$0xf] }
  0x1a   :  { %222 = vmatpush.bf16.msra.mxu1 %v2475_v26  ;;  %v2455_v36 = vor.u32 %v2945_v34, %v2454_v33  ;;  %v2456_v37 = vld [vmem:[#allocation5 + $0x48] sm:$0xf0]  ;;  %v2446_v39 = vld [vmem:[#allocation5] sm:$0xf]  ;;  %v2943_v40 = vld [vmem:[#allocation5 + $0x14] sm:$0xf0] }
  0x1b   :  { %v2459_v38 = vor.u32 %v2944_v35, %v2456_v37  ;;  %v2942_v41 = vld [vmem:[#allocation5 + $0x4] sm:$0xf]  ;;  %v2447_v43 = vor.u32 %v2943_v40, %v2446_v39  ;;  %v2448_v44 = vld [vmem:[#allocation5 + $0x18] sm:$0xf0]  ;;  %s3309_s2 = smov 64   ;;  %vm273_vm8 = vcmask 130048  }
  0x1c   :  { %v3071_v5 = vpop.eup %3070  ;;  %v2451_v46 = vor.u32 %v2942_v41, %v2448_v44  ;;  %v3384_v27 = vld [vmem:[#allocation8] sm:$0xff]  ;;  %s3310_s3 = smov [#allocation10]   ;;  %s2429_s16 = sshll.u32 %s3685_s4, 4  ;;  %s2430_s16 = int_to_ptr.hbm [resolvable:$true] %s2429_s16 }
  0x1d   :  { %v98_v6 = vmul.f32 64.0, %v3071_v5  ;;  %vm102_vm1 = vweird.f32 %v3071_v5  ;;  %209 = vmatpush.bf16.msra.mxu0 %v2463_v30  ;;  %s2427_s13 = sshll.u32 %s3310_s3, 4  ;;  %s2428_s13 = int_to_ptr.vmem [resolvable:$true] %s2427_s13 }
  0x1e   :  { %223 = vmatpush.bf16.msra.mxu1 %v2467_v32  ;;  %v3388_v32 = vld [vmem:[#allocation8 + $0x8] sm:$0xff] }
  0x1f   :  { %95 = vadd.xlane.f32.xlu0 %v94_v3  ;;  %v99_v7 = vsub.f32 1.0, %v98_v6  ;;  %v86_v3 = vld [vmem:[#allocation7 + $0x2] ss:$0 sm:$0xff] }
  0x21   :  { %v100_v8 = vmul.f32 %v3071_v5, %v99_v7  ;;  %210 = vmatpush.bf16.msra.mxu0 %v2455_v36  ;;  %v87_v7 = vld [vmem:[#allocation7 + $0x3] ss:$0 sm:$0xff] }
  0x22   :  { %224 = vmatpush.bf16.msra.mxu1 %v2459_v38 }
  0x23   :  { %v101_v9 = vadd.f32 %v3071_v5, %v100_v8 }
  0x25   :  { %v3356_v10 = vsel %vm102_vm1, %v3071_v5, %v101_v9  ;;  %211 = vmatpush.bf16.msra.mxu0 %v2447_v43 }
  0x26   :  { %225 = vmatpush.bf16.msra.mxu1 %v2451_v46  ;;  %v2498_v46 = vld [vmem:[#allocation5 + $0x94] sm:$0xf] }
  0x8a   :  { %v93_v11 = vpop.xlane.xlu0 %92 }
  0x8b   :  { %v104_v12 = vmul.f32 %v3356_v10, %v93_v11 }
  0x8d   :  { %v3360_v13 = vsub.f32 %v3348_v0, %v104_v12 }
  0x8f   :  { %v108_v14 = vmul.f32 %v3360_v13, %v3360_v13 }
  0x91   :  { %v110_v15 = vsel %vm90_vm0, %v108_v14, 0.0 }
  0x92   :  { %111 = vadd.xlane.f32.xlu1 %v110_v15  ;;  %v96_v16 = vpop.xlane.xlu0 %95 }
  0x93   :  { %v105_v17 = vmul.f32 %v3356_v10, %v96_v16 }
  0x95   :  { %v3367_v18 = vsub.f32 %v3352_v2, %v105_v17 }
  0x97   :  { %v109_v19 = vmul.f32 %v3367_v18, %v3367_v18 }
  0x99   :  { %v113_v20 = vsel %vm90_vm0, %v109_v19, 0.0 }
  0x9a   :  { %114 = vadd.xlane.f32.xlu1 %v113_v20 }
 0x105   :  { %v112_v42 = vpop.xlane.xlu1 %111 }
 0x106   :  { %v116_v45 = vmul.f32 %v112_v42, %v3356_v10 }
 0x108   :  { %v118_v47 = vadd.f32 1e-05, %v116_v45 }
 0x10a   :  { %3072 = vrsqrt.f32 %v118_v47  ;;  %vm126_vm3 = vweird.f32 %v118_v47 }
 0x10d   :  { %v115_v48 = vpop.xlane.xlu1 %114 }
 0x10e   :  { %v117_v49 = vmul.f32 %v115_v48, %v3356_v10  ;;  %v2494_v48 = vld [vmem:[#allocation5 + $0x64] sm:$0xf] }
 0x110   :  { %v3073_v50 = vpop.eup %3072  ;;  %v119_v51 = vadd.f32 1e-05, %v117_v49 }
 0x111   :  { %v121_v52 = vmul.f32 %v3073_v50, %v118_v47  ;;  %vm127_vm2 = vweird.f32 %v3073_v50  ;;  %v2953_v47 = vld [vmem:[#allocation5 + $0xa8] sm:$0xf0] }
 0x112   :  { %3074 = vrsqrt.f32 %v119_v51  ;;  %vm128_vm4 = vmor %vm126_vm3, %vm127_vm2  ;;  %vm136_vm6 = vweird.f32 %v119_v51  ;;  %v2499_v49 = vor.u32 %v2953_v47, %v2498_v46  ;;  %v2503_v47 = vld [vmem:[#allocation5 + $0x8] sm:$0xf] }
 0x113   :  { %v122_v53 = vmul.f32 %v3073_v50, %v121_v52  ;;  %v2490_v52 = vld [vmem:[#allocation5 + $0x34] sm:$0xf] }
 0x115   :  { %v123_v54 = vmul.f32 0.5, %v122_v53  ;;  %v2951_v53 = vld [vmem:[#allocation5 + $0x48] sm:$0xf0] }
 0x117   :  { %v124_v55 = vsub.f32 1.5, %v123_v54  ;;  %v2486_v54 = vld [vmem:[#allocation5 + $0x4] sm:$0xf] }
 0x118   :  { %v3075_v56 = vpop.eup %3074 }
 0x119   :  { %v125_v57 = vmul.f32 %v3073_v50, %v124_v55  ;;  %v131_v58 = vmul.f32 %v3075_v56, %v119_v51  ;;  %vm137_vm5 = vweird.f32 %v3075_v56  ;;  %v2950_v55 = vld [vmem:[#allocation5 + $0x18] sm:$0xf0] }
 0x11a   :  { %vm138_vm7 = vmor %vm136_vm6, %vm137_vm5 }
 0x11b   :  { %v132_v59 = vmul.f32 %v3075_v56, %v131_v58  ;;  %v129_v60 = vsel %vm128_vm4, %v3073_v50, %v125_v57  ;;  %v2952_v50 = vld [vmem:[#allocation5 + $0x78] sm:$0xf0]  ;;  %v2487_v57 = vor.u32 %v2950_v55, %v2486_v54 }
 0x11c   :  { %v140_v63 = vmul.f32 %v129_v60, %v3360_v13  ;;  %v155_v13 = vld [vmem:[#allocation7] ss:$8 sm:$0x3]  ;;  %v2495_v51 = vor.u32 %v2952_v50, %v2494_v48 }
 0x11d   :  { %v133_v61 = vmul.f32 0.5, %v132_v59  ;;  %v157_v16 = vperm.slane %v155_v13, 0  ;;  %v158_v17 = vperm.slane %v155_v13, 1  ;;  %v2955_v48 = vld [vmem:[#allocation5 + $0x1c] sm:$0xf0] }
 0x11e   :  { %v142_v6 = vmul.f32 %v140_v63, %v86_v3 }
 0x11f   :  { %v134_v62 = vsub.f32 1.5, %v133_v61 }
 0x120   :  { %v144_v9 = vadd.f32 %v142_v6, %v87_v7 }
 0x121   :  { %v135_v1 = vmul.f32 %v3075_v56, %v134_v62 }
 0x123   :  { %v139_v4 = vsel %vm138_vm7, %v3075_v56, %v135_v1  ;;  %v2491_v56 = vor.u32 %v2951_v53, %v2490_v52  ;;  %v2505_v52 = vld [vmem:[#allocation5 + $0x20] sm:$0xf0] }
 0x124   :  { %v141_v5 = vmul.f32 %v139_v4, %v3367_v18 }
 0x126   :  { %v143_v8 = vmul.f32 %v141_v5, %v86_v3 }
 0x128   :  { %v145_v11 = vadd.f32 %v143_v8, %v87_v7 }
 0x12a   :  { %v154_v12 = vpack.c.bf16 %v145_v11, %v144_v9  ;;  %v385_v11 = vld [vmem:[#allocation7 + $0x1] ss:$0 sm:$0xff] }
 0x12c   :  { %2476 = vmatmul.msk.bf16.vlgmr.msra.gmra.mxu0 %vm90_vm0, %v154_v12  ;;  %2477 = vmatmul.msk.bf16.vlgmr.msra.gmra.mxu1 %vm90_vm0, %v154_v12 }
 0x1a9   :  { %v213_v14 = vpop.f32.mrf.mxu0  ;;  %v227_v15 = vpop.f32.mrf.mxu1 }
 0x1aa   :  { %v228_v18 = vadd.f32 %v227_v15, %v158_v17  ;;  %v214_v23 = vadd.f32 %v213_v14, %v157_v16 }
 0x1b1   :  { %v215_v19 = vpop.f32.mrf.mxu0  ;;  %v229_v20 = vpop.f32.mrf.mxu1 }
 0x1b2   :  { %v216_v21 = vadd.f32 %v215_v19, %v157_v16  ;;  %v230_v22 = vadd.f32 %v229_v20, %v158_v17 }
 0x1b4   :  { %316 = vmatpush.msra.mxu3 %v230_v22  ;;  %236 = vrot.lane.b32.xlu2 %v216_v21, %s3309_s2 }
 0x1b6   :  { %317 = vmatpush.msra.mxu3 %v228_v18 }
 0x1bc   :  { %234 = vrot.lane.b32.xlu2 %v214_v23, %s3309_s2 }
 0x20e   :  { %v237_v24 = vpop.permute.xlu2 %236 }
 0x20f   :  { %2478 = vmatpush.xpose.msk.msra.mxu2 %vm90_vm0, %v237_v24 }
 0x216   :  { %v235_v25 = vpop.permute.xlu2 %234 }
 0x217   :  { %2479 = vmatpush.xpose.msk.msra.mxu2 %vm90_vm0, %v235_v25 }
 0x21a   :  { %2480 = vmatmul.msk.f32.vlgmr.msra.gmra.mxu2 %vm90_vm0, %v214_v23 }
 0x222   :  { %2481 = vmatmul.msk.f32.gmra.mxu2 %vm90_vm0, %v216_v21 }
 0x29d   :  { %v263_v26 = vpop.f32.mrf.mxu2 }
 0x29e   :  { %v269_v28 = vmul.f32 0.125, %v263_v26 }
 0x2a0   :  { %v271_v29 = vadd.f32 %v269_v28, %v3384_v27  ;;  %v2527_v28 = vld [vmem:[#allocation5 + $0x98] sm:$0xf] }
 0x2a2   :  { %v274_v30 = vsel %vm273_vm8, %v271_v29, -inf }
 0x2a3   :  { %275 = vmax.xlane.f32.xlu0 %v274_v30  ;;  %v2960_v30 = vld [vmem:[#allocation5 + $0x9c] sm:$0xf] }
 0x2a5   :  { %v266_v31 = vpop.f32.mrf.mxu2 }
 0x2a6   :  { %v270_v33 = vmul.f32 0.125, %v266_v31 }
 0x2a8   :  { %v272_v34 = vadd.f32 %v270_v33, %v3388_v32  ;;  %v2529_v33 = vld [vmem:[#allocation5 + $0xb0] sm:$0xf0] }
 0x2aa   :  { %v277_v35 = vsel %vm273_vm8, %v272_v34, -inf }
 0x2ab   :  { %278 = vmax.xlane.f32.xlu1 %v277_v35  ;;  %v2519_v35 = vld [vmem:[#allocation5 + $0x68] sm:$0xf] }
 0x2c4   :  { %360 = vrot.lane.b32.xlu1 %v2499_v49, %s3309_s2  ;;  %v2954_v49 = vld [vmem:[#allocation5 + $0xc] sm:$0xf] }
 0x2c5   :  { %v2508_v54 = vor.u32 %v2954_v49, %v2505_v52 }
 0x2cc   :  { %356 = vrot.lane.b32.xlu1 %v2491_v56, %s3309_s2 }
 0x316   :  { %v276_v36 = vpop.xlane.xlu0 %275 }
 0x317   :  { %v280_v37 = vsub.f32 %v271_v29, %v276_v36  ;;  %v2961_v29 = vld [vmem:[#allocation5 + $0xac] sm:$0xf0]  ;;  %v2959_v36 = vld [vmem:[#allocation5 + $0x7c] sm:$0xf0] }
 0x318   :  { %v2528_v31 = vor.u32 %v2961_v29, %v2527_v28  ;;  %v2553_v29 = vld [vmem:[#allocation5 + $0x70] sm:$0xf] }
 0x319   :  { %v282_v38 = vmul.f32 1.442695, %v280_v37  ;;  %v2958_v37 = vld [vmem:[#allocation5 + $0x6c] sm:$0xf] }
 0x31a   :  { %499 = vmatpush.bf16.msrb.mxu2 %v2528_v31 }
 0x31b   :  { %3076 = vpow2.f32 %v282_v38  ;;  %v2520_v38 = vor.u32 %v2959_v36, %v2519_v35  ;;  %v2545_v35 = vld [vmem:[#allocation5 + $0x40] sm:$0xf]  ;;  %v2965_v36 = vld [vmem:[#allocation5 + $0x54] sm:$0xf0] }
 0x31e   :  { %v279_v39 = vpop.xlane.xlu1 %278  ;;  %500 = vmatpush.bf16.msrb.mxu2 %v2520_v38  ;;  %v2546_v38 = vor.u32 %v2965_v36, %v2545_v35 }
 0x31f   :  { %v281_v40 = vsub.f32 %v272_v34, %v279_v39  ;;  %v2532_v34 = vor.u32 %v2960_v30, %v2529_v33  ;;  %v2521_v39 = vld [vmem:[#allocation5 + $0x80] sm:$0xf0]  ;;  %v2966_v30 = vld [vmem:[#allocation5 + $0x74] sm:$0xf]  ;;  %v2555_v33 = vld [vmem:[#allocation5 + $0x88] sm:$0xf0] }
 0x321   :  { %v3077_v41 = vpop.eup %3076  ;;  %v284_v42 = vmul.f32 1.442695, %v281_v40  ;;  %v2524_v40 = vor.u32 %v2958_v37, %v2521_v39  ;;  %v2964_v37 = vld [vmem:[#allocation5 + $0x44] sm:$0xf]  ;;  %v2547_v39 = vld [vmem:[#allocation5 + $0x58] sm:$0xf0] }
 0x322   :  { %v286_v43 = vsel %vm273_vm8, %v3077_v41, 0.0 }
 0x323   :  { %3078 = vpow2.f32 %v284_v42  ;;  %287 = vadd.xlane.f32.xlu2 %v286_v43  ;;  %v2957_v42 = vld [vmem:[#allocation5 + $0x4c] sm:$0xf0]  ;;  %v2956_v43 = vld [vmem:[#allocation5 + $0x3c] sm:$0xf] }
 0x329   :  { %v3079_v44 = vpop.eup %3078 }
 0x32a   :  { %v289_v45 = vsel %vm273_vm8, %v3079_v44, 0.0 }
 0x32b   :  { %290 = vadd.xlane.f32.xlu0 %v289_v45  ;;  %v2513_v45 = vld [vmem:[#allocation5 + $0x50] sm:$0xf0] }
 0x32c   :  { %v2516_v46 = vor.u32 %v2956_v43, %v2513_v45  ;;  %v2963_v43 = vld [vmem:[#allocation5 + $0x24] sm:$0xf0] }
 0x336   :  { %v361_v1 = vpop.permute.xlu1 %360 }
 0x337   :  { %373 = vmatpush.bf16.msrb.mxu3 %v361_v1 }
 0x33e   :  { %v357_v4 = vpop.permute.xlu1 %356 }
 0x33f   :  { %358 = vrot.lane.b32.xlu0 %v2495_v51, %s3309_s2  ;;  %v2504_v51 = vor.u32 %v2955_v48, %v2503_v47 }
 0x347   :  { %354 = vrot.lane.b32.xlu0 %v2487_v57, %s3309_s2 }
 0x396   :  { %v288_v58 = vpop.xlane.xlu2 %287 }
 0x397   :  { %3080 = vrcp.f32 %v288_v58 }
 0x39d   :  { %v3081_v59 = vpop.eup %3080 }
 0x39e   :  { %v291_v60 = vpop.xlane.xlu0 %290  ;;  %v294_v61 = vmul.f32 %v3081_v59, %v3077_v41  ;;  %v2511_v41 = vld [vmem:[#allocation5 + $0x38] sm:$0xf] }
 0x39f   :  { %3082 = vrcp.f32 %v291_v60 }
 0x3a0   :  { %2482 = vmatmul.msk.f32.vlgmr.msra.gmra.mxu3 %vm273_vm8, %v294_v61 }
 0x3a5   :  { %v3083_v62 = vpop.eup %3082 }
 0x3a6   :  { %v295_v63 = vmul.f32 %v3083_v62, %v3079_v44  ;;  %v2512_v44 = vor.u32 %v2957_v42, %v2511_v41  ;;  %v446_v41 = vld [vmem:[#allocation7 + $0x6] ss:$8 sm:$0x3]  ;;  %v2537_v42 = vld [vmem:[#allocation5 + $0x10] sm:$0xf] }
 0x3a7   :  { %v2538_v45 = vor.u32 %v2963_v43, %v2537_v42  ;;  %v448_v47 = vperm.slane %v446_v41, 0  ;;  %v449_v48 = vperm.slane %v446_v41, 1 }
 0x3a8   :  { %2483 = vmatmul.msk.f32.gmra.mxu3 %vm273_vm8, %v295_v63  ;;  %501 = vmatpush.bf16.msrb.mxu2 %v2512_v44  ;;  %v2962_v44 = vld [vmem:[#allocation5 + $0x14] sm:$0xf] }
 0x3ac   :  { %502 = vmatpush.bf16.msrb.mxu2 %v2504_v51 }
 0x3b1   :  { %v359_v3 = vpop.permute.xlu0 %358 }
 0x3b2   :  { %374 = vmatpush.bf16.msrb.mxu3 %v359_v3 }
 0x3b6   :  { %375 = vmatpush.bf16.msrb.mxu3 %v357_v4 }
 0x3b9   :  { %v355_v5 = vpop.permute.xlu0 %354 }
 0x3ba   :  { %376 = vmatpush.bf16.msrb.mxu3 %v355_v5 }
 0x3be   :  { %513 = vmatpush.bf16.msra.mxu3 %v2532_v34  ;;  %v2558_v34 = vor.u32 %v2966_v30, %v2555_v33 }
 0x3c2   :  { %514 = vmatpush.bf16.msra.mxu3 %v2524_v40  ;;  %v2550_v40 = vor.u32 %v2964_v37, %v2547_v39 }
 0x3c6   :  { %515 = vmatpush.bf16.msra.mxu3 %v2516_v46  ;;  %v2539_v46 = vld [vmem:[#allocation5 + $0x28] sm:$0xf0] }
 0x3c7   :  { %v2542_v49 = vor.u32 %v2962_v44, %v2539_v46 }
 0x3ca   :  { %516 = vmatpush.bf16.msra.mxu3 %v2508_v54 }
 0x423   :  { %v319_v6 = vpop.f32.mrf.mxu3 }
 0x42b   :  { %v322_v7 = vpop.f32.mrf.mxu3 }
 0x42c   :  { %v333_v8 = vpack.c.bf16 %v322_v7, %v319_v6 }
 0x42e   :  { %2500 = vmatmul.msk.bf16.vlgmr.msrb.gmra.mxu3 %vm90_vm0, %v333_v8 }
 0x4b1   :  { %v378_v9 = vpop.f32.mrf.mxu3 }
 0x4b2   :  { %v383_v12 = vadd.f32 %v378_v9, %v3348_v0 }
 0x4b4   :  { %v3402_v14 = vadd.f32 %v385_v11, %v383_v12  ;;  %v88_v12 = vld [vmem:[#allocation7 + $0x4] ss:$0 sm:$0xff] }
 0x4b6   :  { %v388_v15 = vsel %vm90_vm0, %v3402_v14, 0.0 }
 0x4b7   :  { %389 = vadd.xlane.f32.xlu1 %v388_v15 }
 0x4b9   :  { %v380_v13 = vpop.f32.mrf.mxu3 }
 0x4ba   :  { %v384_v16 = vadd.f32 %v380_v13, %v3352_v2 }
 0x4bc   :  { %v3407_v17 = vadd.f32 %v385_v11, %v384_v16 }
 0x4be   :  { %v391_v19 = vsel %vm90_vm0, %v3407_v17, 0.0 }
 0x4bf   :  { %392 = vadd.xlane.f32.xlu2 %v391_v19  ;;  %v89_v19 = vld [vmem:[#allocation7 + $0x5] ss:$0 sm:$0xff] }
 0x52a   :  { %v390_v20 = vpop.xlane.xlu1 %389 }
 0x52b   :  { %v394_v21 = vmul.f32 %v390_v20, %v3356_v10 }
 0x52d   :  { %v3413_v0 = vsub.f32 %v3402_v14, %v394_v21 }
 0x52f   :  { %v398_v22 = vmul.f32 %v3413_v0, %v3413_v0 }
 0x531   :  { %v400_v18 = vsel %vm90_vm0, %v398_v22, 0.0 }
 0x532   :  { %401 = vadd.xlane.f32.xlu0 %v400_v18  ;;  %v393_v23 = vpop.xlane.xlu2 %392 }
 0x533   :  { %v395_v2 = vmul.f32 %v393_v23, %v3356_v10  ;;  %v2561_v23 = vld [vmem:[#allocation5 + $0xa0] sm:$0xf] }
 0x535   :  { %v3420_v24 = vsub.f32 %v3407_v17, %v395_v2  ;;  %v2969_v2 = vld [vmem:[#allocation5 + $0xb4] sm:$0xf0] }
 0x537   :  { %v399_v25 = vmul.f32 %v3420_v24, %v3420_v24 }
 0x539   :  { %v403_v26 = vsel %vm90_vm0, %v399_v25, 0.0  ;;  %v2562_v25 = vor.u32 %v2969_v2, %v2561_v23 }
 0x53a   :  { %404 = vadd.xlane.f32.xlu2 %v403_v26  ;;  %v2563_v26 = vld [vmem:[#allocation5 + $0xb8] sm:$0xf0] }
 0x53b   :  { %613 = vmatpush.bf16.xpose.msrb.mxu1 %v2562_v25 }
 0x5a5   :  { %v402_v50 = vpop.xlane.xlu0 %401 }
 0x5a6   :  { %v406_v53 = vmul.f32 %v402_v50, %v3356_v10 }
 0x5a8   :  { %v408_v55 = vadd.f32 1e-05, %v406_v53 }
 0x5aa   :  { %3084 = vrsqrt.f32 %v408_v55  ;;  %vm416_vm10 = vweird.f32 %v408_v55 }
 0x5ad   :  { %v405_v56 = vpop.xlane.xlu2 %404 }
 0x5ae   :  { %v407_v57 = vmul.f32 %v405_v56, %v3356_v10 }
 0x5b0   :  { %v3085_v58 = vpop.eup %3084  ;;  %v409_v59 = vadd.f32 1e-05, %v407_v57 }
 0x5b1   :  { %v411_v60 = vmul.f32 %v3085_v58, %v408_v55  ;;  %vm417_vm9 = vweird.f32 %v3085_v58 }
 0x5b2   :  { %3086 = vrsqrt.f32 %v409_v59  ;;  %vm418_vm11 = vmor %vm416_vm10, %vm417_vm9  ;;  %vm426_vm13 = vweird.f32 %v409_v59 }
 0x5b3   :  { %v412_v61 = vmul.f32 %v3085_v58, %v411_v60 }
 0x5b5   :  { %v413_v62 = vmul.f32 0.5, %v412_v61 }
 0x5b7   :  { %v414_v63 = vsub.f32 1.5, %v413_v62 }
 0x5b8   :  { %v3087_v1 = vpop.eup %3086 }
 0x5b9   :  { %v415_v3 = vmul.f32 %v3085_v58, %v414_v63  ;;  %v421_v4 = vmul.f32 %v3087_v1, %v409_v59  ;;  %vm427_vm12 = vweird.f32 %v3087_v1 }
 0x5ba   :  { %vm428_vm14 = vmor %vm426_vm13, %vm427_vm12  ;;  %vm1236_vm13 = vcmask 261120  }
 0x5bb   :  { %v422_v5 = vmul.f32 %v3087_v1, %v421_v4  ;;  %v419_v6 = vsel %vm418_vm11, %v3085_v58, %v415_v3 }
 0x5bc   :  { %v430_v9 = vmul.f32 %v419_v6, %v3413_v0  ;;  %v2968_v0 = vld [vmem:[#allocation5 + $0xa4] sm:$0xf] }
 0x5bd   :  { %v423_v7 = vmul.f32 0.5, %v422_v5  ;;  %v2566_v28 = vor.u32 %v2968_v0, %v2563_v26 }
 0x5be   :  { %v432_v16 = vmul.f32 %v430_v9, %v88_v12 }
 0x5bf   :  { %v424_v8 = vsub.f32 1.5, %v423_v7  ;;  %627 = vmatpush.bf16.xpose.msrb.mxu3 %v2566_v28 }
 0x5c0   :  { %v434_v21 = vadd.f32 %v432_v16, %v89_v19 }
 0x5c1   :  { %v425_v11 = vmul.f32 %v3087_v1, %v424_v8 }
 0x5c3   :  { %v429_v15 = vsel %vm428_vm14, %v3087_v1, %v425_v11 }
 0x5c4   :  { %v431_v13 = vmul.f32 %v429_v15, %v3420_v24  ;;  %v2967_v24 = vld [vmem:[#allocation5 + $0x84] sm:$0xf0] }
 0x5c5   :  { %v2554_v31 = vor.u32 %v2967_v24, %v2553_v29 }
 0x5c6   :  { %v433_v20 = vmul.f32 %v431_v13, %v88_v12 }
 0x5c7   :  { %614 = vmatpush.bf16.xpose.msrb.mxu1 %v2554_v31  ;;  %628 = vmatpush.bf16.xpose.msrb.mxu3 %v2558_v34 }
 0x5c8   :  { %v435_v22 = vadd.f32 %v433_v20, %v89_v19 }
 0x5ca   :  { %v444_v18 = vpack.c.bf16 %v435_v22, %v434_v21 }
 0x5cc   :  { %2533 = vmatmul.msk.bf16.vlgmr.msrb.gmra.mxu2 %vm90_vm0, %v444_v18  ;;  %2534 = vmatmul.msk.bf16.vlgmr.msra.gmra.mxu3 %vm90_vm0, %v444_v18 }
 0x5cf   :  { %615 = vmatpush.bf16.xpose.msrb.mxu1 %v2546_v38  ;;  %629 = vmatpush.bf16.xpose.msrb.mxu3 %v2550_v40  ;;  %v639_v40 = vld [vmem:[#allocation7 + $0x7] ss:$0 sm:$0xff] }
 0x5d7   :  { %616 = vmatpush.bf16.xpose.msrb.mxu1 %v2538_v45  ;;  %630 = vmatpush.bf16.xpose.msrb.mxu3 %v2542_v49 }
 0x64f   :  { %v504_v50 = vpop.f32.mrf.mxu2  ;;  %v518_v51 = vpop.f32.mrf.mxu3 }
 0x650   :  { %v505_v52 = vadd.f32 %v504_v50, %v448_v47  ;;  %v519_v53 = vadd.f32 %v518_v51, %v449_v48 }
 0x652   :  { %v523_v54 = vmul.f32 %v505_v52, %v505_v52  ;;  %v524_v55 = vmul.f32 %v519_v53, %v519_v53 }
 0x654   :  { %v527_v56 = vmul.f32 %v523_v54, %v505_v52  ;;  %v528_v57 = vmul.f32 %v524_v55, %v519_v53 }
 0x656   :  { %v531_v58 = vmul.f32 0.044715, %v527_v56  ;;  %v532_v59 = vmul.f32 0.044715, %v528_v57 }
 0x657   :  { %v506_v60 = vpop.f32.mrf.mxu2  ;;  %v520_v61 = vpop.f32.mrf.mxu3 }
 0x658   :  { %v535_v62 = vadd.f32 %v531_v58, %v505_v52  ;;  %v536_v63 = vadd.f32 %v532_v59, %v519_v53  ;;  %v507_v1 = vadd.f32 %v506_v60, %v448_v47  ;;  %v521_v3 = vadd.f32 %v520_v61, %v449_v48  ;;  %v2593_v58 = vld [vmem:[#allocation5 + $0x150] sm:$0xf]  ;;  %v2977_v59 = vld [vmem:[#allocation5 + $0x164] sm:$0xf0]  ;;  %v2976_v60 = vld [vmem:[#allocation5 + $0x154] sm:$0xf] }
 0x659   :  { %v2594_v61 = vor.u32 %v2977_v59, %v2593_v58 }
 0x65a   :  { %v539_v4 = vmul.f32 0.7978846, %v535_v62  ;;  %v525_v5 = vmul.f32 %v507_v1, %v507_v1  ;;  %v526_v6 = vmul.f32 %v521_v3, %v521_v3  ;;  %v540_v7 = vmul.f32 0.7978846, %v536_v63  ;;  %v2595_v62 = vld [vmem:[#allocation5 + $0x168] sm:$0xf0] }
 0x65b   :  { %v2598_v63 = vor.u32 %v2976_v60, %v2595_v62  ;;  %758 = vmatpush.bf16.msra.mxu2 %v2594_v61 }
 0x65c   :  { %v529_v8 = vmul.f32 %v525_v5, %v507_v1  ;;  %v530_v9 = vmul.f32 %v526_v6, %v521_v3  ;;  %3088 = vtanh.f32 %v539_v4  ;;  %v2974_v4 = vld [vmem:[#allocation5 + $0x124] sm:$0xf]  ;;  %v2587_v6 = vld [vmem:[#allocation5 + $0x138] sm:$0xf0] }
 0x65d   :  { %3090 = vtanh.f32 %v540_v7  ;;  %772 = vmatpush.bf16.msrb.mxu0 %v2598_v63  ;;  %v2590_v7 = vor.u32 %v2974_v4, %v2587_v6 }
 0x65e   :  { %v533_v11 = vmul.f32 0.044715, %v529_v8  ;;  %v534_v12 = vmul.f32 0.044715, %v530_v9  ;;  %v2577_v8 = vld [vmem:[#allocation5 + $0xf0] sm:$0xf] }
 0x65f   :  { %v2973_v9 = vld [vmem:[#allocation5 + $0x104] sm:$0xf0] }
 0x660   :  { %v537_v15 = vadd.f32 %v533_v11, %v507_v1  ;;  %v538_v13 = vadd.f32 %v534_v12, %v521_v3  ;;  %v2972_v11 = vld [vmem:[#allocation5 + $0xf4] sm:$0xf]  ;;  %v2578_v12 = vor.u32 %v2973_v9, %v2577_v8 }
 0x661   :  { %773 = vmatpush.bf16.msrb.mxu0 %v2590_v7 }
 0x662   :  { %v541_v16 = vmul.f32 0.7978846, %v537_v15  ;;  %v542_v19 = vmul.f32 0.7978846, %v538_v13  ;;  %v3089_v20 = vpop.eup %3088  ;;  %v2579_v15 = vld [vmem:[#allocation5 + $0x108] sm:$0xf0] }
 0x663   :  { %v3091_v21 = vpop.eup %3090  ;;  %v547_v22 = vadd.f32 1.0, %v3089_v20  ;;  %v2582_v13 = vor.u32 %v2972_v11, %v2579_v15  ;;  %v2569_v20 = vld [vmem:[#allocation5 + $0xc0] sm:$0xf] }
 0x664   :  { %3092 = vtanh.f32 %v541_v16  ;;  %v548_v18 = vadd.f32 1.0, %v3091_v21  ;;  %v2971_v21 = vld [vmem:[#allocation5 + $0xd4] sm:$0xf0] }
 0x665   :  { %3094 = vtanh.f32 %v542_v19  ;;  %v551_v25 = vmul.f32 0.5, %v547_v22  ;;  %774 = vmatpush.bf16.msrb.mxu0 %v2582_v13  ;;  %v2970_v22 = vld [vmem:[#allocation5 + $0xc4] sm:$0xf] }
 0x666   :  { %v552_v26 = vmul.f32 0.5, %v548_v18  ;;  %v2570_v18 = vor.u32 %v2971_v21, %v2569_v20 }
 0x667   :  { %v555_v30 = vmul.f32 %v551_v25, %v505_v52 }
 0x668   :  { %v556_v33 = vmul.f32 %v552_v26, %v519_v53 }
 0x66a   :  { %v3093_v23 = vpop.eup %3092 }
 0x66b   :  { %v3095_v2 = vpop.eup %3094  ;;  %v549_v0 = vadd.f32 1.0, %v3093_v23  ;;  %v2571_v23 = vld [vmem:[#allocation5 + $0xd8] sm:$0xf0] }
 0x66c   :  { %v550_v28 = vadd.f32 1.0, %v3095_v2 }
 0x66d   :  { %v553_v29 = vmul.f32 0.5, %v549_v0  ;;  %v2574_v0 = vor.u32 %v2970_v22, %v2571_v23  ;;  %v2981_v23 = vld [vmem:[#allocation5 + $0x168] sm:$0xf0] }
 0x66e   :  { %v554_v24 = vmul.f32 0.5, %v550_v28 }
 0x66f   :  { %v557_v31 = vmul.f32 %v553_v29, %v507_v1  ;;  %v2585_v1 = vld [vmem:[#allocation5 + $0x120] sm:$0xf]  ;;  %775 = vmatpush.bf16.msrb.mxu0 %v2574_v0  ;;  %v2613_v0 = vld [vmem:[#allocation5 + $0xf4] sm:$0xf] }
 0x670   :  { %v558_v34 = vmul.f32 %v554_v24, %v521_v3  ;;  %v2975_v3 = vld [vmem:[#allocation5 + $0x134] sm:$0xf0] }
 0x671   :  { %v559_v35 = vpack.c.bf16 %v557_v31, %v555_v30  ;;  %v2586_v5 = vor.u32 %v2975_v3, %v2585_v1 }
 0x672   :  { %v560_v36 = vpack.c.bf16 %v558_v34, %v556_v33 }
 0x673   :  { %617 = vmatmul.bf16.vlgmr.msrb.gmra.mxu1 %v559_v35  ;;  %759 = vmatpush.bf16.msra.mxu2 %v2586_v5 }
 0x674   :  { %631 = vmatmul.bf16.vlgmr.msrb.gmra.mxu3 %v560_v36 }
 0x677   :  { %760 = vmatpush.bf16.msra.mxu2 %v2578_v12 }
 0x67b   :  { %761 = vmatpush.bf16.msra.mxu2 %v2570_v18 }
 0x6f0   :  { %v618_v37 = vpop.f32.mrf.mxu1 }
 0x6f7   :  { %v632_v38 = vpop.f32.mrf.mxu3 }
 0x6f8   :  { %v633_v39 = vadd.f32 %v632_v38, %v618_v37  ;;  %v620_v44 = vpop.f32.mrf.mxu1 }
 0x6fa   :  { %v637_v41 = vadd.f32 %v633_v39, %v3402_v14 }
 0x6fc   :  { %v3432_v42 = vadd.f32 %v639_v40, %v637_v41 }
 0x6fe   :  { %v647_v43 = vsel %vm90_vm0, %v3432_v42, 0.0 }
 0x6ff   :  { %v634_v45 = vpop.f32.mrf.mxu3  ;;  %648 = vadd.xlane.f32.xlu2 %v647_v43  ;;  %v643_v43 = vld [vmem:[#allocation7 + $0x12] ss:$0 sm:$0xff] }
 0x700   :  { %v635_v46 = vadd.f32 %v634_v45, %v620_v44 }
 0x702   :  { %v638_v47 = vadd.f32 %v635_v46, %v3407_v17 }
 0x704   :  { %v3437_v48 = vadd.f32 %v639_v40, %v638_v47 }
 0x706   :  { %v650_v49 = vsel %vm90_vm0, %v3437_v48, 0.0 }
 0x707   :  { %651 = vadd.xlane.f32.xlu2 %v650_v49  ;;  %v644_v49 = vld [vmem:[#allocation7 + $0x13] ss:$0 sm:$0xff] }
 0x772   :  { %v649_v50 = vpop.xlane.xlu2 %648 }
 0x773   :  { %v653_v14 = vmul.f32 %v649_v50, %v3356_v10 }
 0x775   :  { %v3443_v51 = vsub.f32 %v3432_v42, %v653_v14 }
 0x777   :  { %v657_v52 = vmul.f32 %v3443_v51, %v3443_v51 }
 0x779   :  { %v659_v53 = vsel %vm90_vm0, %v657_v52, 0.0 }
 0x77a   :  { %660 = vadd.xlane.f32.xlu2 %v659_v53  ;;  %v652_v54 = vpop.xlane.xlu2 %651 }
 0x77b   :  { %v654_v17 = vmul.f32 %v652_v54, %v3356_v10 }
 0x77d   :  { %v3450_v55 = vsub.f32 %v3437_v48, %v654_v17  ;;  %v705_v17 = vld [vmem:[#allocation7 + $0x10] ss:$8 sm:$0x3] }
 0x77f   :  { %v658_v56 = vmul.f32 %v3450_v55, %v3450_v55 }
 0x781   :  { %v662_v57 = vsel %vm90_vm0, %v658_v56, 0.0 }
 0x782   :  { %663 = vadd.xlane.f32.xlu2 %v662_v57  ;;  %v708_v57 = vperm.slane %v705_v17, 1 }
 0x7ed   :  { %v661_v16 = vpop.xlane.xlu2 %660 }
 0x7ee   :  { %v665_v19 = vmul.f32 %v661_v16, %v3356_v10 }
 0x7f0   :  { %v667_v2 = vadd.f32 1e-05, %v665_v19 }
 0x7f2   :  { %3096 = vrsqrt.f32 %v667_v2  ;;  %vm675_vm1 = vweird.f32 %v667_v2 }
 0x7f5   :  { %v664_v25 = vpop.xlane.xlu2 %663 }
 0x7f6   :  { %v666_v26 = vmul.f32 %v664_v25, %v3356_v10  ;;  %v2979_v25 = vld [vmem:[#allocation5 + $0x108] sm:$0xf0] }
 0x7f8   :  { %v3097_v28 = vpop.eup %3096  ;;  %v668_v29 = vadd.f32 1e-05, %v666_v26  ;;  %v2614_v26 = vor.u32 %v2979_v25, %v2613_v0  ;;  %v2982_v0 = vld [vmem:[#allocation5 + $0xcc] sm:$0xf] }
 0x7f9   :  { %v670_v24 = vmul.f32 %v3097_v28, %v667_v2  ;;  %vm676_vm15 = vweird.f32 %v3097_v28 }
 0x7fa   :  { %3098 = vrsqrt.f32 %v668_v29  ;;  %vm677_vm2 = vmor %vm675_vm1, %vm676_vm15  ;;  %vm685_vm4 = vweird.f32 %v668_v29 }
 0x7fb   :  { %v671_v30 = vmul.f32 %v3097_v28, %v670_v24 }
 0x7fd   :  { %v672_v31 = vmul.f32 0.5, %v671_v30  ;;  %v2609_v30 = vld [vmem:[#allocation5 + $0xc4] sm:$0xf] }
 0x7ff   :  { %v673_v33 = vsub.f32 1.5, %v672_v31  ;;  %v2978_v31 = vld [vmem:[#allocation5 + $0xd8] sm:$0xf0] }
 0x800   :  { %v3099_v34 = vpop.eup %3098 }
 0x801   :  { %v674_v35 = vmul.f32 %v3097_v28, %v673_v33  ;;  %v680_v36 = vmul.f32 %v3099_v34, %v668_v29  ;;  %vm686_vm3 = vweird.f32 %v3099_v34  ;;  %v2980_v29 = vld [vmem:[#allocation5 + $0x138] sm:$0xf0]  ;;  %v2610_v33 = vor.u32 %v2978_v31, %v2609_v30 }
 0x802   :  { %vm687_vm5 = vmor %vm685_vm4, %vm686_vm3 }
 0x803   :  { %v681_v37 = vmul.f32 %v3099_v34, %v680_v36  ;;  %v678_v38 = vsel %vm677_vm2, %v3097_v28, %v674_v35  ;;  %v2617_v28 = vld [vmem:[#allocation5 + $0x124] sm:$0xf] }
 0x804   :  { %v689_v41 = vmul.f32 %v678_v38, %v3443_v51  ;;  %v707_v51 = vperm.slane %v705_v17, 0  ;;  %v2618_v24 = vor.u32 %v2980_v29, %v2617_v28 }
 0x805   :  { %v682_v39 = vmul.f32 0.5, %v681_v37 }
 0x806   :  { %v691_v46 = vmul.f32 %v689_v41, %v643_v43 }
 0x807   :  { %v683_v40 = vsub.f32 1.5, %v682_v39 }
 0x808   :  { %v693_v14 = vadd.f32 %v691_v46, %v644_v49 }
 0x809   :  { %v684_v44 = vmul.f32 %v3099_v34, %v683_v40 }
 0x80b   :  { %v688_v45 = vsel %vm687_vm5, %v3099_v34, %v684_v44 }
 0x80c   :  { %v690_v47 = vmul.f32 %v688_v45, %v3450_v55 }
 0x80e   :  { %v692_v50 = vmul.f32 %v690_v47, %v643_v43 }
 0x810   :  { %v694_v52 = vadd.f32 %v692_v50, %v644_v49  ;;  %v934_v50 = vld [vmem:[#allocation7 + $0x11] ss:$0 sm:$0xff] }
 0x812   :  { %v704_v53 = vpack.c.bf16 %v694_v52, %v693_v14 }
 0x814   :  { %2599 = vmatmul.msk.bf16.vlgmr.msra.gmra.mxu2 %vm90_vm0, %v704_v53  ;;  %2600 = vmatmul.msk.bf16.vlgmr.msrb.gmra.mxu0 %vm90_vm0, %v704_v53 }
 0x891   :  { %v777_v54 = vpop.f32.mrf.mxu0 }
 0x892   :  { %v778_v55 = vadd.f32 %v777_v54, %v708_v57 }
 0x897   :  { %v763_v56 = vpop.f32.mrf.mxu2 }
 0x898   :  { %v764_v58 = vadd.f32 %v763_v56, %v707_v51 }
 0x899   :  { %v779_v59 = vpop.f32.mrf.mxu0 }
 0x89a   :  { %v780_v60 = vadd.f32 %v779_v59, %v708_v57  ;;  %784 = vrot.lane.b32.xlu0 %v764_v58, %s3309_s2 }
 0x89c   :  { %865 = vmatpush.msra.mxu0 %v780_v60 }
 0x89e   :  { %866 = vmatpush.msra.mxu0 %v778_v55 }
 0x89f   :  { %v765_v61 = vpop.f32.mrf.mxu2 }
 0x8a0   :  { %v766_v62 = vadd.f32 %v765_v61, %v707_v51 }
 0x8a2   :  { %786 = vrot.lane.b32.xlu1 %v766_v62, %s3309_s2 }
 0x90c   :  { %v785_v1 = vpop.permute.xlu0 %784 }
 0x914   :  { %v787_v63 = vpop.permute.xlu1 %786 }
 0x915   :  { %2601 = vmatpush.xpose.msk.msrb.mxu2 %vm90_vm0, %v787_v63 }
 0x919   :  { %2602 = vmatpush.xpose.msk.msrb.mxu2 %vm90_vm0, %v785_v1  ;;  %v2650_v1 = vld [vmem:[#allocation5 + $0x158] sm:$0xf] }
 0x91c   :  { %2603 = vmatmul.msk.f32.vlgmr.msrb.gmra.mxu2 %vm90_vm0, %v764_v58 }
 0x924   :  { %2604 = vmatmul.msk.f32.gmra.mxu2 %vm90_vm0, %v766_v62 }
 0x99f   :  { %v813_v3 = vpop.f32.mrf.mxu2 }
 0x9a0   :  { %v819_v4 = vmul.f32 0.125, %v813_v3  ;;  %v2989_v3 = vld [vmem:[#allocation5 + $0x16c] sm:$0xf0] }
 0x9a2   :  { %v821_v5 = vadd.f32 %v819_v4, %v3384_v27  ;;  %v2988_v4 = vld [vmem:[#allocation5 + $0x15c] sm:$0xf] }
 0x9a4   :  { %v823_v6 = vsel %vm273_vm8, %v821_v5, -inf }
 0x9a5   :  { %824 = vmax.xlane.f32.xlu2 %v823_v6  ;;  %v2652_v6 = vld [vmem:[#allocation5 + $0x170] sm:$0xf0] }
 0x9a7   :  { %v816_v7 = vpop.f32.mrf.mxu2 }
 0x9a8   :  { %v820_v8 = vmul.f32 0.125, %v816_v7  ;;  %v2655_v7 = vor.u32 %v2988_v4, %v2652_v6  ;;  %v2678_v4 = vld [vmem:[#allocation5 + $0x148] sm:$0xf0]  ;;  %v2668_v6 = vld [vmem:[#allocation5 + $0x100] sm:$0xf] }
 0x9aa   :  { %v822_v9 = vadd.f32 %v820_v8, %v3388_v32  ;;  %v2621_v32 = vld [vmem:[#allocation5 + $0x154] sm:$0xf]  ;;  %1062 = vmatpush.bf16.msra.mxu2 %v2655_v7  ;;  %v2642_v8 = vld [vmem:[#allocation5 + $0x128] sm:$0xf]  ;;  %v2993_v7 = vld [vmem:[#allocation5 + $0x114] sm:$0xf0] }
 0x9ab   :  { %v2622_v2 = vor.u32 %v2981_v23, %v2621_v32  ;;  %v2626_v23 = vld [vmem:[#allocation5 + $0xc8] sm:$0xf] }
 0x9ac   :  { %v826_v11 = vsel %vm273_vm8, %v822_v9, -inf }
 0x9ad   :  { %827 = vmax.xlane.f32.xlu2 %v826_v11  ;;  %909 = vrot.lane.b32.xlu1 %v2622_v2, %s3309_s2  ;;  %v2986_v11 = vld [vmem:[#allocation5 + $0x12c] sm:$0xf]  ;;  %v2983_v2 = vld [vmem:[#allocation5 + $0xdc] sm:$0xf0] }
 0x9ae   :  { %v2627_v25 = vor.u32 %v2983_v2, %v2626_v23 }
 0x9b5   :  { %905 = vrot.lane.b32.xlu1 %v2614_v26, %s3309_s2  ;;  %v2628_v26 = vld [vmem:[#allocation5 + $0xe0] sm:$0xf0] }
 0x9b6   :  { %v2631_v29 = vor.u32 %v2982_v0, %v2628_v26 }
 0x9bd   :  { %903 = vrot.lane.b32.xlu1 %v2610_v33, %s3309_s2 }
 0xa18   :  { %v825_v12 = vpop.xlane.xlu2 %824 }
 0xa19   :  { %v829_v15 = vsub.f32 %v821_v5, %v825_v12  ;;  %v2651_v5 = vor.u32 %v2989_v3, %v2650_v1  ;;  %v2995_v1 = vld [vmem:[#allocation5 + $0x144] sm:$0xf0] }
 0xa1b   :  { %v831_v13 = vmul.f32 1.442695, %v829_v15  ;;  %1048 = vmatpush.bf16.msra.mxu3 %v2651_v5  ;;  %v2644_v15 = vld [vmem:[#allocation5 + $0x140] sm:$0xf0] }
 0xa1d   :  { %3100 = vpow2.f32 %v831_v13  ;;  %v2647_v13 = vor.u32 %v2986_v11, %v2644_v15  ;;  %v2670_v11 = vld [vmem:[#allocation5 + $0x118] sm:$0xf0] }
 0xa1e   :  { %v995_v15 = vld [vmem:[#allocation7 + $0x16] ss:$8 sm:$0x3] }
 0xa1f   :  { %v910_v40 = vpop.permute.xlu1 %909  ;;  %1063 = vmatpush.bf16.msra.mxu2 %v2647_v13  ;;  %v2660_v13 = vld [vmem:[#allocation5 + $0xd0] sm:$0xf] }
 0xa20   :  { %v828_v16 = vpop.xlane.xlu2 %827  ;;  %922 = vmatpush.bf16.msra.mxu1 %v910_v40 }
 0xa21   :  { %v830_v19 = vsub.f32 %v822_v9, %v828_v16  ;;  %v2987_v9 = vld [vmem:[#allocation5 + $0x13c] sm:$0xf0]  ;;  %v2634_v16 = vld [vmem:[#allocation5 + $0xf8] sm:$0xf] }
 0xa22   :  { %v2643_v12 = vor.u32 %v2987_v9, %v2642_v8  ;;  %v2992_v8 = vld [vmem:[#allocation5 + $0x104] sm:$0xf]  ;;  %v2669_v9 = vor.u32 %v2993_v7, %v2668_v6 }
 0xa23   :  { %v3101_v20 = vpop.eup %3100  ;;  %v833_v21 = vmul.f32 1.442695, %v830_v19  ;;  %v2985_v19 = vld [vmem:[#allocation5 + $0x10c] sm:$0xf0] }
 0xa24   :  { %v835_v27 = vsel %vm273_vm8, %v3101_v20, 0.0  ;;  %1049 = vmatpush.bf16.msra.mxu3 %v2643_v12  ;;  %v2673_v12 = vor.u32 %v2992_v8, %v2670_v11  ;;  %v1194_v11 = vld [vmem:[#allocation8 + $0x30] sm:$0xff] }
 0xa25   :  { %3102 = vpow2.f32 %v833_v21  ;;  %836 = vadd.xlane.f32.xlu2 %v835_v27  ;;  %v2635_v21 = vor.u32 %v2985_v19, %v2634_v16  ;;  %v2636_v27 = vld [vmem:[#allocation5 + $0x110] sm:$0xf0]  ;;  %v2991_v16 = vld [vmem:[#allocation5 + $0xe4] sm:$0xf0] }
 0xa26   :  { %v2990_v19 = vld [vmem:[#allocation5 + $0xd4] sm:$0xf] }
 0xa27   :  { %v906_v43 = vpop.permute.xlu1 %905 }
 0xa28   :  { %1050 = vmatpush.bf16.msra.mxu3 %v2635_v21  ;;  %v2662_v21 = vld [vmem:[#allocation5 + $0xe8] sm:$0xf0] }
 0xa2b   :  { %v3103_v22 = vpop.eup %3102 }
 0xa2c   :  { %v838_v18 = vsel %vm273_vm8, %v3103_v22, 0.0  ;;  %1051 = vmatpush.bf16.msra.mxu3 %v2627_v25 }
 0xa2d   :  { %839 = vadd.xlane.f32.xlu0 %v838_v18 }
 0xa2f   :  { %v904_v44 = vpop.permute.xlu1 %903 }
 0xa3d   :  { %907 = vrot.lane.b32.xlu2 %v2618_v24, %s3309_s2 }
 0xa98   :  { %v837_v34 = vpop.xlane.xlu2 %836 }
 0xa99   :  { %3104 = vrcp.f32 %v837_v34 }
 0xa9f   :  { %v3105_v35 = vpop.eup %3104 }
 0xaa0   :  { %v843_v36 = vmul.f32 %v3105_v35, %v3101_v20  ;;  %v840_v37 = vpop.xlane.xlu0 %839  ;;  %v908_v41 = vpop.permute.xlu2 %907  ;;  %v2984_v20 = vld [vmem:[#allocation5 + $0xfc] sm:$0xf] }
 0xaa1   :  { %3106 = vrcp.f32 %v840_v37  ;;  %923 = vmatpush.bf16.msra.mxu1 %v908_v41 }
 0xaa2   :  { %2605 = vmatmul.msk.f32.vlgmr.msra.gmra.mxu0 %vm273_vm8, %v843_v36 }
 0xaa5   :  { %924 = vmatpush.bf16.msra.mxu1 %v906_v43 }
 0xaa7   :  { %v3107_v38 = vpop.eup %3106 }
 0xaa8   :  { %v844_v39 = vmul.f32 %v3107_v38, %v3103_v22  ;;  %v2639_v22 = vor.u32 %v2984_v20, %v2636_v27  ;;  %v2661_v20 = vor.u32 %v2991_v16, %v2660_v13  ;;  %v997_v27 = vperm.slane %v995_v15, 0  ;;  %v1191_v13 = vld [vmem:[#allocation8 + $0x18] sm:$0xff]  ;;  %v1233_v16 = vld [vmem:[#allocation8 + $0x70] sm:$0xff] }
 0xaa9   :  { %925 = vmatpush.bf16.msra.mxu1 %v904_v44 }
 0xaaa   :  { %2606 = vmatmul.msk.f32.gmra.mxu0 %vm273_vm8, %v844_v39  ;;  %1064 = vmatpush.bf16.msra.mxu2 %v2639_v22  ;;  %v998_v22 = vperm.slane %v995_v15, 1  ;;  %v1192_v15 = vld [vmem:[#allocation8 + $0x20] sm:$0xff] }
 0xaae   :  { %1065 = vmatpush.bf16.msra.mxu2 %v2631_v29 }
 0xab2   :  { %1255 = vmatpush.msrb.mxu2 %v1233_v16 }
 0xb1f   :  { %v868_v45 = vpop.f32.mrf.mxu0 }
 0xb27   :  { %v871_v46 = vpop.f32.mrf.mxu0 }
 0xb28   :  { %v882_v47 = vpack.c.bf16 %v871_v46, %v868_v45 }
 0xb2a   :  { %2623 = vmatmul.msk.bf16.vlgmr.msra.gmra.mxu1 %vm90_vm0, %v882_v47  ;;  %v645_v47 = vld [vmem:[#allocation7 + $0x14] ss:$0 sm:$0xff] }
 0xba7   :  { %v927_v49 = vpop.f32.mrf.mxu1 }
 0xba8   :  { %v932_v14 = vadd.f32 %v927_v49, %v3432_v42 }
 0xbaa   :  { %v3481_v52 = vadd.f32 %v934_v50, %v932_v14 }
 0xbac   :  { %v937_v53 = vsel %vm90_vm0, %v3481_v52, 0.0 }
 0xbad   :  { %938 = vadd.xlane.f32.xlu1 %v937_v53 }
 0xbaf   :  { %v929_v54 = vpop.f32.mrf.mxu1 }
 0xbb0   :  { %v933_v17 = vadd.f32 %v929_v54, %v3437_v48  ;;  %v646_v54 = vld [vmem:[#allocation7 + $0x15] ss:$0 sm:$0xff] }
 0xbb2   :  { %v3486_v51 = vadd.f32 %v934_v50, %v933_v17 }
 0xbb4   :  { %v940_v56 = vsel %vm90_vm0, %v3486_v51, 0.0 }
 0xbb5   :  { %941 = vadd.xlane.f32.xlu2 %v940_v56 }
 0xc20   :  { %v939_v57 = vpop.xlane.xlu1 %938 }
 0xc21   :  { %v943_v58 = vmul.f32 %v939_v57, %v3356_v10 }
 0xc23   :  { %v3492_v42 = vsub.f32 %v3481_v52, %v943_v58 }
 0xc25   :  { %v947_v59 = vmul.f32 %v3492_v42, %v3492_v42 }
 0xc27   :  { %v949_v60 = vsel %vm90_vm0, %v947_v59, 0.0  ;;  %v2684_v59 = vld [vmem:[#allocation5 + $0x160] sm:$0xf] }
 0xc28   :  { %950 = vadd.xlane.f32.xlu0 %v949_v60  ;;  %v942_v55 = vpop.xlane.xlu2 %941  ;;  %v2997_v60 = vld [vmem:[#allocation5 + $0x174] sm:$0xf0] }
 0xc29   :  { %v944_v48 = vmul.f32 %v942_v55, %v3356_v10  ;;  %v2685_v55 = vor.u32 %v2997_v60, %v2684_v59 }
 0xc2b   :  { %v3499_v61 = vsub.f32 %v3486_v51, %v944_v48  ;;  %v2686_v48 = vld [vmem:[#allocation5 + $0x178] sm:$0xf0]  ;;  %1162 = vmatpush.bf16.xpose.msrb.mxu0 %v2685_v55 }
 0xc2d   :  { %v948_v62 = vmul.f32 %v3499_v61, %v3499_v61 }
 0xc2f   :  { %v952_v63 = vsel %vm90_vm0, %v948_v62, 0.0 }
 0xc30   :  { %953 = vadd.xlane.f32.xlu0 %v952_v63  ;;  %v2676_v63 = vld [vmem:[#allocation5 + $0x130] sm:$0xf] }
 0xc31   :  { %v2677_v3 = vor.u32 %v2995_v1, %v2676_v63 }
 0xc33   :  { %1163 = vmatpush.bf16.xpose.msrb.mxu0 %v2677_v3 }
 0xc3b   :  { %1164 = vmatpush.bf16.xpose.msrb.mxu0 %v2669_v9 }
 0xc43   :  { %1165 = vmatpush.bf16.xpose.msrb.mxu0 %v2661_v20 }
 0xc9b   :  { %v951_v18 = vpop.xlane.xlu0 %950 }
 0xc9c   :  { %v955_v32 = vmul.f32 %v951_v18, %v3356_v10  ;;  %v2665_v18 = vor.u32 %v2990_v19, %v2662_v21  ;;  %v1232_v19 = vld [vmem:[#allocation8 + $0x68] sm:$0xff] }
 0xc9d   :  { %1256 = vmatpush.msrb.mxu2 %v1232_v19 }
 0xc9e   :  { %v957_v28 = vadd.f32 1e-05, %v955_v32 }
 0xca0   :  { %3108 = vrsqrt.f32 %v957_v28  ;;  %vm965_vm7 = vweird.f32 %v957_v28 }
 0xca3   :  { %v954_v24 = vpop.xlane.xlu0 %953 }
 0xca4   :  { %v956_v30 = vmul.f32 %v954_v24, %v3356_v10  ;;  %v1198_v24 = vld [vmem:[#allocation8 + $0x50] sm:$0xff] }
 0xca5   :  { %1215 = vmatpush.msrb.mxu3 %v1198_v24  ;;  %v3067_v24 = vld [vmem:[#allocation8 + $0x78] ss:$0 sm:$0xff] }
 0xca6   :  { %v3109_v31 = vpop.eup %3108  ;;  %v958_v33 = vadd.f32 1e-05, %v956_v30  ;;  %v1197_v30 = vld [vmem:[#allocation8 + $0x48] sm:$0xff] }
 0xca7   :  { %v960_v34 = vmul.f32 %v3109_v31, %v957_v28  ;;  %vm966_vm6 = vweird.f32 %v3109_v31  ;;  %1216 = vmatpush.msrb.mxu3 %v1197_v30 }
 0xca8   :  { %3110 = vrsqrt.f32 %v958_v33  ;;  %vm967_vm9 = vmor %vm965_vm7, %vm966_vm6  ;;  %vm975_vm11 = vweird.f32 %v958_v33 }
 0xca9   :  { %v961_v35 = vmul.f32 %v3109_v31, %v960_v34  ;;  %v1196_v34 = vld [vmem:[#allocation8 + $0x40] sm:$0xff] }
 0xcaa   :  { %1217 = vmatpush.msrb.mxu3 %v1196_v34  ;;  %v3068_v34 = vld [vmem:[#allocation8 + $0x79] ss:$0 sm:$0xff] }
 0xcab   :  { %v962_v36 = vmul.f32 0.5, %v961_v35 }
 0xcad   :  { %v963_v37 = vsub.f32 1.5, %v962_v36 }
 0xcae   :  { %v3111_v38 = vpop.eup %3110 }
 0xcaf   :  { %v964_v39 = vmul.f32 %v3109_v31, %v963_v37  ;;  %v970_v40 = vmul.f32 %v3111_v38, %v958_v33  ;;  %vm976_vm10 = vweird.f32 %v3111_v38 }
 0xcb0   :  { %vm977_vm12 = vmor %vm975_vm11, %vm976_vm10 }
 0xcb1   :  { %v971_v41 = vmul.f32 %v3111_v38, %v970_v40  ;;  %v968_v43 = vsel %vm967_vm9, %v3109_v31, %v964_v39 }
 0xcb2   :  { %v979_v46 = vmul.f32 %v968_v43, %v3492_v42  ;;  %v2996_v42 = vld [vmem:[#allocation5 + $0x164] sm:$0xf] }
 0xcb3   :  { %v972_v44 = vmul.f32 0.5, %v971_v41  ;;  %v2689_v62 = vor.u32 %v2996_v42, %v2686_v48  ;;  %v1195_v41 = vld [vmem:[#allocation8 + $0x38] sm:$0xff] }
 0xcb4   :  { %v981_v14 = vmul.f32 %v979_v46, %v645_v47  ;;  %1218 = vmatpush.msrb.mxu3 %v1195_v41 }
 0xcb5   :  { %v973_v45 = vsub.f32 1.5, %v972_v44  ;;  %1176 = vmatpush.bf16.xpose.msrb.mxu1 %v2689_v62 }
 0xcb6   :  { %v983_v56 = vadd.f32 %v981_v14, %v646_v54  ;;  %1219 = vmatpush.msrb.mxu3 %v1194_v11  ;;  %v2998_v11 = vld [vmem:[#allocation5 + $0x184] sm:$0xf] }
 0xcb7   :  { %v974_v49 = vmul.f32 %v3111_v38, %v973_v45 }
 0xcb9   :  { %v978_v50 = vsel %vm977_vm12, %v3111_v38, %v974_v49 }
 0xcba   :  { %v980_v53 = vmul.f32 %v978_v50, %v3499_v61  ;;  %v2994_v61 = vld [vmem:[#allocation5 + $0x134] sm:$0xf] }
 0xcbb   :  { %v2681_v5 = vor.u32 %v2994_v61, %v2678_v4 }
 0xcbc   :  { %v982_v17 = vmul.f32 %v980_v53, %v645_v47 }
 0xcbd   :  { %1177 = vmatpush.bf16.xpose.msrb.mxu1 %v2681_v5 }
 0xcbe   :  { %v984_v57 = vadd.f32 %v982_v17, %v646_v54 }
 0xcc0   :  { %v993_v58 = vpack.c.bf16 %v984_v57, %v983_v56 }
 0xcc2   :  { %2656 = vmatmul.msk.bf16.vlgmr.msra.gmra.mxu3 %vm90_vm0, %v993_v58  ;;  %2657 = vmatmul.msk.bf16.vlgmr.msra.gmra.mxu2 %vm90_vm0, %v993_v58 }
 0xcc5   :  { %1178 = vmatpush.bf16.xpose.msrb.mxu1 %v2673_v12  ;;  %v1193_v12 = vld [vmem:[#allocation8 + $0x28] sm:$0xff] }
 0xcc6   :  { %1220 = vmatpush.msrb.mxu3 %v1193_v12 }
 0xcc8   :  { %1221 = vmatpush.msrb.mxu3 %v1192_v15  ;;  %v2698_v15 = vld [vmem:[#allocation5 + $0x198] sm:$0xf0] }
 0xcc9   :  { %v2701_v16 = vor.u32 %v2998_v11, %v2698_v15 }
 0xcca   :  { %1222 = vmatpush.msrb.mxu3 %v1191_v13 }
 0xccd   :  { %1179 = vmatpush.bf16.xpose.msrb.mxu1 %v2665_v18 }
 0xd45   :  { %v1053_v32 = vpop.f32.mrf.mxu3  ;;  %v1067_v23 = vpop.f32.mrf.mxu2 }
 0xd46   :  { %v1054_v2 = vadd.f32 %v1053_v32, %v997_v27  ;;  %v1068_v0 = vadd.f32 %v1067_v23, %v998_v22 }
 0xd48   :  { %v1072_v25 = vmul.f32 %v1054_v2, %v1054_v2  ;;  %v1073_v26 = vmul.f32 %v1068_v0, %v1068_v0 }
 0xd4a   :  { %v1076_v28 = vmul.f32 %v1072_v25, %v1054_v2  ;;  %v1077_v29 = vmul.f32 %v1073_v26, %v1068_v0 }
 0xd4c   :  { %v1080_v31 = vmul.f32 0.044715, %v1076_v28  ;;  %v1081_v33 = vmul.f32 0.044715, %v1077_v29  ;;  %v1231_v28 = vld [vmem:[#allocation8 + $0x60] sm:$0xff]  ;;  %v1230_v29 = vld [vmem:[#allocation8 + $0x58] sm:$0xff] }
 0xd4d   :  { %v1055_v35 = vpop.f32.mrf.mxu3  ;;  %v1069_v36 = vpop.f32.mrf.mxu2  ;;  %1257 = vmatpush.msrb.mxu2 %v1231_v28 }
 0xd4e   :  { %v1084_v37 = vadd.f32 %v1080_v31, %v1054_v2  ;;  %v1085_v38 = vadd.f32 %v1081_v33, %v1068_v0  ;;  %v1056_v39 = vadd.f32 %v1055_v35, %v997_v27  ;;  %v1070_v40 = vadd.f32 %v1069_v36, %v998_v22  ;;  %v1188_v22 = vld [vmem:[#allocation7 + $0x17] ss:$0 sm:$0xff] }
 0xd4f   :  { %1258 = vmatpush.msrb.mxu2 %v1230_v29 }
 0xd50   :  { %v1088_v43 = vmul.f32 0.7978846, %v1084_v37  ;;  %v1074_v44 = vmul.f32 %v1056_v39, %v1056_v39  ;;  %v1075_v45 = vmul.f32 %v1070_v40, %v1070_v40  ;;  %v1089_v46 = vmul.f32 0.7978846, %v1085_v38 }
 0xd52   :  { %v1078_v47 = vmul.f32 %v1074_v44, %v1056_v39  ;;  %v1079_v49 = vmul.f32 %v1075_v45, %v1070_v40  ;;  %3112 = vtanh.f32 %v1088_v43 }
 0xd53   :  { %3114 = vtanh.f32 %v1089_v46 }
 0xd54   :  { %v1082_v50 = vmul.f32 0.044715, %v1078_v47  ;;  %v1083_v14 = vmul.f32 0.044715, %v1079_v49 }
 0xd56   :  { %v1086_v53 = vadd.f32 %v1082_v50, %v1056_v39  ;;  %v1087_v54 = vadd.f32 %v1083_v14, %v1070_v40 }
 0xd58   :  { %v1090_v17 = vmul.f32 0.7978846, %v1086_v53  ;;  %v1091_v56 = vmul.f32 0.7978846, %v1087_v54  ;;  %v3113_v57 = vpop.eup %3112  ;;  %v2720_v53 = vld [vmem:[#allocation5 + $0x210] sm:$0xf] }
 0xd59   :  { %v3115_v58 = vpop.eup %3114  ;;  %v1096_v59 = vadd.f32 1.0, %v3113_v57  ;;  %v3005_v54 = vld [vmem:[#allocation5 + $0x224] sm:$0xf0]  ;;  %v2722_v57 = vld [vmem:[#allocation5 + $0x228] sm:$0xf0] }
 0xd5a   :  { %3116 = vtanh.f32 %v1090_v17  ;;  %v1097_v60 = vadd.f32 1.0, %v3115_v58  ;;  %v3004_v17 = vld [vmem:[#allocation5 + $0x214] sm:$0xf] }
 0xd5b   :  { %3118 = vtanh.f32 %v1091_v56  ;;  %v1100_v48 = vmul.f32 0.5, %v1096_v59  ;;  %v2721_v56 = vor.u32 %v3005_v54, %v2720_v53  ;;  %v2725_v58 = vor.u32 %v3004_v17, %v2722_v57  ;;  %v2712_v59 = vld [vmem:[#allocation5 + $0x1e0] sm:$0xf] }
 0xd5c   :  { %v1101_v63 = vmul.f32 0.5, %v1097_v60  ;;  %v3003_v60 = vld [vmem:[#allocation5 + $0x1f4] sm:$0xf0] }
 0xd5d   :  { %v1104_v4 = vmul.f32 %v1100_v48, %v1054_v2  ;;  %1382 = vmatpush.bf16.msra.mxu3 %v2721_v56  ;;  %1396 = vmatpush.bf16.msra.mxu2 %v2725_v58  ;;  %v2714_v48 = vld [vmem:[#allocation5 + $0x1f8] sm:$0xf0] }
 0xd5e   :  { %v1105_v6 = vmul.f32 %v1101_v63, %v1068_v0  ;;  %v2704_v63 = vld [vmem:[#allocation5 + $0x1b0] sm:$0xf] }
 0xd60   :  { %v3117_v42 = vpop.eup %3116 }
 0xd61   :  { %v3119_v55 = vpop.eup %3118  ;;  %v1098_v62 = vadd.f32 1.0, %v3117_v42  ;;  %v3002_v42 = vld [vmem:[#allocation5 + $0x1e4] sm:$0xf] }
 0xd62   :  { %v1099_v1 = vadd.f32 1.0, %v3119_v55  ;;  %v2713_v55 = vor.u32 %v3003_v60, %v2712_v59  ;;  %v3548_v60 = vld [vmem:[#allocation8] sm:$0xff] }
 0xd63   :  { %v1102_v61 = vmul.f32 0.5, %v1098_v62  ;;  %v2717_v62 = vor.u32 %v3002_v42, %v2714_v48 }
 0xd64   :  { %v1103_v3 = vmul.f32 0.5, %v1099_v1  ;;  %1383 = vmatpush.bf16.msra.mxu3 %v2713_v55  ;;  %v3001_v1 = vld [vmem:[#allocation5 + $0x1c4] sm:$0xf0] }
 0xd65   :  { %v1106_v5 = vmul.f32 %v1102_v61, %v1056_v39  ;;  %1397 = vmatpush.bf16.msra.mxu2 %v2717_v62  ;;  %v3000_v61 = vld [vmem:[#allocation5 + $0x1b4] sm:$0xf] }
 0xd66   :  { %v1107_v7 = vmul.f32 %v1103_v3, %v1070_v40  ;;  %v2705_v3 = vor.u32 %v3001_v1, %v2704_v63  ;;  %v3552_v63 = vld [vmem:[#allocation8 + $0x8] sm:$0xff] }
 0xd67   :  { %v1108_v8 = vpack.c.bf16 %v1106_v5, %v1104_v4  ;;  %v2706_v4 = vld [vmem:[#allocation5 + $0x1c8] sm:$0xf0] }
 0xd68   :  { %v1109_v9 = vpack.c.bf16 %v1107_v7, %v1105_v6  ;;  %v2709_v5 = vor.u32 %v3000_v61, %v2706_v4  ;;  %1384 = vmatpush.bf16.msra.mxu3 %v2705_v3 }
 0xd69   :  { %1166 = vmatmul.bf16.vlgmr.msrb.gmra.mxu0 %v1108_v8  ;;  %v2696_v8 = vld [vmem:[#allocation5 + $0x180] sm:$0xf] }
 0xd6a   :  { %1180 = vmatmul.bf16.vlgmr.msrb.gmra.mxu1 %v1109_v9  ;;  %1398 = vmatpush.bf16.msra.mxu2 %v2709_v5  ;;  %v2999_v9 = vld [vmem:[#allocation5 + $0x194] sm:$0xf0] }
 0xd6b   :  { %v2697_v12 = vor.u32 %v2999_v9, %v2696_v8 }
 0xd6d   :  { %1385 = vmatpush.bf16.msra.mxu3 %v2697_v12 }
 0xd6e   :  { %1399 = vmatpush.bf16.msra.mxu2 %v2701_v16  ;;  %v3009_v16 = vld [vmem:[#allocation5 + $0x228] sm:$0xf0] }
 0xde6   :  { %v1167_v20 = vpop.f32.mrf.mxu0 }
 0xde7   :  { %v1181_v21 = vpop.f32.mrf.mxu1 }
 0xde8   :  { %v1182_v27 = vadd.f32 %v1181_v21, %v1167_v20 }
 0xdea   :  { %v1186_v18 = vadd.f32 %v1182_v27, %v3481_v52 }
 0xdec   :  { %v1189_v32 = vadd.f32 %v1188_v22, %v1186_v18 }
 0xdee   :  { %2690 = vmatmul.msk.f32.vlgmr.msrb.gmra.mxu3 %vm90_vm0, %v1189_v32  ;;  %v1169_v23 = vpop.f32.mrf.mxu0 }
 0xdef   :  { %v1183_v2 = vpop.f32.mrf.mxu1 }
 0xdf0   :  { %v1184_v0 = vadd.f32 %v1183_v2, %v1169_v23 }
 0xdf2   :  { %v1187_v25 = vadd.f32 %v1184_v0, %v3486_v51 }
 0xdf4   :  { %v1190_v26 = vadd.f32 %v1188_v22, %v1187_v25 }
 0xdf6   :  { %2691 = vmatmul.msk.f32.gmra.mxu3 %vm90_vm0, %v1190_v26 }
 0xe71   :  { %v1224_v30 = vpop.f32.mrf.mxu3 }
 0xe72   :  { %v1225_v31 = vadd.f32 %v3067_v24, %v1224_v30 }
 0xe74   :  { %2692 = vmatmul.msk.f32.vlgmr.msrb.gmra.mxu2 %vm1236_vm13, %v1225_v31  ;;  %v1267_v31 = vld [vmem:[#allocation7 + $0x22] ss:$0 sm:$0xff] }
 0xe79   :  { %v1227_v52 = vpop.f32.mrf.mxu3 }
 0xe7a   :  { %v1228_v33 = vadd.f32 %v3067_v24, %v1227_v52 }
 0xe7c   :  { %2693 = vmatmul.msk.f32.gmra.mxu2 %vm1236_vm13, %v1228_v33 }
 0xef7   :  { %v1260_v35 = vpop.f32.mrf.mxu2 }
 0xef8   :  { %v3514_v36 = vadd.f32 %v3068_v34, %v1260_v35 }
 0xefa   :  { %v1271_v51 = vsel %vm90_vm0, %v3514_v36, 0.0 }
 0xefb   :  { %1272 = vadd.xlane.f32.xlu0 %v1271_v51  ;;  %v1268_v51 = vld [vmem:[#allocation7 + $0x23] ss:$0 sm:$0xff] }
 0xeff   :  { %v1263_v37 = vpop.f32.mrf.mxu2 }
 0xf00   :  { %v3518_v38 = vadd.f32 %v3068_v34, %v1263_v37 }
 0xf02   :  { %v1274_v39 = vsel %vm90_vm0, %v3518_v38, 0.0 }
 0xf03   :  { %1275 = vadd.xlane.f32.xlu0 %v1274_v39 }
 0xf6e   :  { %v1273_v40 = vpop.xlane.xlu0 %1272 }
 0xf6f   :  { %v1277_v41 = vmul.f32 %v1273_v40, %v3356_v10 }
 0xf71   :  { %v3524_v43 = vsub.f32 %v3514_v36, %v1277_v41 }
 0xf73   :  { %v1281_v44 = vmul.f32 %v3524_v43, %v3524_v43 }
 0xf75   :  { %v1283_v45 = vsel %vm90_vm0, %v1281_v44, 0.0  ;;  %v1329_v44 = vld [vmem:[#allocation7 + $0x20] ss:$8 sm:$0x3] }
 0xf76   :  { %1284 = vadd.xlane.f32.xlu1 %v1283_v45  ;;  %v1276_v46 = vpop.xlane.xlu0 %1275  ;;  %v1331_v45 = vperm.slane %v1329_v44, 0 }
 0xf77   :  { %v1278_v47 = vmul.f32 %v1276_v46, %v3356_v10 }
 0xf79   :  { %v3531_v49 = vsub.f32 %v3518_v38, %v1278_v47 }
 0xf7b   :  { %v1282_v50 = vmul.f32 %v3531_v49, %v3531_v49 }
 0xf7d   :  { %v1286_v14 = vsel %vm90_vm0, %v1282_v50, 0.0  ;;  %v1332_v50 = vperm.slane %v1329_v44, 1 }
 0xf7e   :  { %1287 = vadd.xlane.f32.xlu2 %v1286_v14 }
 0xfe9   :  { %v1285_v6 = vpop.xlane.xlu1 %1284 }
 0xfea   :  { %v1289_v7 = vmul.f32 %v1285_v6, %v3356_v10 }
 0xfec   :  { %v1291_v13 = vadd.f32 1e-05, %v1289_v7 }
 0xfee   :  { %3120 = vrsqrt.f32 %v1291_v13  ;;  %vm1299_vm15 = vweird.f32 %v1291_v13 }
 0xff1   :  { %v1288_v19 = vpop.xlane.xlu2 %1287 }
 0xff2   :  { %v1290_v20 = vmul.f32 %v1288_v19, %v3356_v10 }
 0xff4   :  { %v3121_v21 = vpop.eup %3120  ;;  %v1292_v27 = vadd.f32 1e-05, %v1290_v20  ;;  %v2740_v20 = vld [vmem:[#allocation5 + $0x1b4] sm:$0xf] }
 0xff5   :  { %v1294_v22 = vmul.f32 %v3121_v21, %v1291_v13  ;;  %vm1300_vm14 = vweird.f32 %v3121_v21  ;;  %v2748_v13 = vld [vmem:[#allocation5 + $0x214] sm:$0xf] }
 0xff6   :  { %3122 = vrsqrt.f32 %v1292_v27  ;;  %vm1301_vm1 = vmor %vm1299_vm15, %vm1300_vm14  ;;  %vm1309_vm3 = vweird.f32 %v1292_v27  ;;  %v2749_v19 = vor.u32 %v3009_v16, %v2748_v13 }
 0xff7   :  { %v1295_v18 = vmul.f32 %v3121_v21, %v1294_v22  ;;  %v2744_v22 = vld [vmem:[#allocation5 + $0x1e4] sm:$0xf] }
 0xff9   :  { %v1296_v32 = vmul.f32 0.5, %v1295_v18  ;;  %v3008_v18 = vld [vmem:[#allocation5 + $0x1f8] sm:$0xf0] }
 0xffb   :  { %v1297_v23 = vsub.f32 1.5, %v1296_v32  ;;  %v2745_v32 = vor.u32 %v3008_v18, %v2744_v22  ;;  %v2755_v18 = vld [vmem:[#allocation5 + $0x1a0] sm:$0xf0] }
 0xffc   :  { %v3123_v2 = vpop.eup %3122 }
 0xffd   :  { %v1298_v0 = vmul.f32 %v3121_v21, %v1297_v23  ;;  %v1304_v25 = vmul.f32 %v3123_v2, %v1292_v27  ;;  %vm1310_vm2 = vweird.f32 %v3123_v2  ;;  %v2736_v23 = vld [vmem:[#allocation5 + $0x184] sm:$0xf] }
 0xffe   :  { %vm1311_vm4 = vmor %vm1309_vm3, %vm1310_vm2 }
 0xfff   :  { %v1305_v26 = vmul.f32 %v3123_v2, %v1304_v25  ;;  %v1302_v28 = vsel %vm1301_vm1, %v3121_v21, %v1298_v0  ;;  %v3007_v21 = vld [vmem:[#allocation5 + $0x1c8] sm:$0xf0] }
0x1000   :  { %v1313_v30 = vmul.f32 %v1302_v28, %v3524_v43  ;;  %v2741_v27 = vor.u32 %v3007_v21, %v2740_v20  ;;  %v2753_v20 = vld [vmem:[#allocation5 + $0x188] sm:$0xf]  ;;  %v3011_v21 = vld [vmem:[#allocation5 + $0x19c] sm:$0xf0] }
0x1001   :  { %v1306_v29 = vmul.f32 0.5, %v1305_v26  ;;  %v2754_v22 = vor.u32 %v3011_v21, %v2753_v20 }
0x1002   :  { %v1315_v34 = vmul.f32 %v1313_v30, %v1267_v31 }
0x1003   :  { %v1307_v24 = vsub.f32 1.5, %v1306_v29 }
0x1004   :  { %v1317_v39 = vadd.f32 %v1315_v34, %v1268_v51 }
0x1005   :  { %v1308_v52 = vmul.f32 %v3123_v2, %v1307_v24 }
0x1007   :  { %v1312_v33 = vsel %vm1311_vm4, %v3123_v2, %v1308_v52  ;;  %v3006_v2 = vld [vmem:[#allocation5 + $0x198] sm:$0xf0] }
0x1008   :  { %v1314_v35 = vmul.f32 %v1312_v33, %v3531_v49  ;;  %v2737_v0 = vor.u32 %v3006_v2, %v2736_v23 }
0x100a   :  { %v1316_v37 = vmul.f32 %v1314_v35, %v1267_v31 }
0x100c   :  { %v1318_v40 = vadd.f32 %v1316_v37, %v1268_v51 }
0x100e   :  { %v1328_v41 = vpack.c.bf16 %v1318_v40, %v1317_v39  ;;  %v1558_v40 = vld [vmem:[#allocation7 + $0x21] ss:$0 sm:$0xff] }
0x1010   :  { %2726 = vmatmul.msk.bf16.vlgmr.msra.gmra.mxu3 %vm90_vm0, %v1328_v41  ;;  %2727 = vmatmul.msk.bf16.vlgmr.msra.gmra.mxu2 %vm90_vm0, %v1328_v41 }
0x1093   :  { %v1387_v43 = vpop.f32.mrf.mxu3  ;;  %v1401_v46 = vpop.f32.mrf.mxu2 }
0x1094   :  { %v1388_v47 = vadd.f32 %v1387_v43, %v1331_v45  ;;  %v1402_v17 = vadd.f32 %v1401_v46, %v1332_v50 }
0x1096   :  { %1408 = vrot.lane.b32.xlu1 %v1388_v47, %s3309_s2 }
0x109b   :  { %v1389_v14 = vpop.f32.mrf.mxu3  ;;  %v1403_v53 = vpop.f32.mrf.mxu2 }
0x109c   :  { %v1390_v49 = vadd.f32 %v1389_v14, %v1331_v45  ;;  %v1404_v54 = vadd.f32 %v1403_v53, %v1332_v50 }
0x109e   :  { %1489 = vmatpush.msra.mxu1 %v1404_v54  ;;  %1410 = vrot.lane.b32.xlu0 %v1390_v49, %s3309_s2 }
0x109f   :  { %1533 = vrot.lane.b32.xlu1 %v2749_v19, %s3309_s2 }
0x10a0   :  { %1490 = vmatpush.msra.mxu1 %v1402_v17 }
0x10a7   :  { %1529 = vrot.lane.b32.xlu1 %v2741_v27, %s3309_s2  ;;  %v3010_v27 = vld [vmem:[#allocation5 + $0x18c] sm:$0xf] }
0x10a8   :  { %v2758_v23 = vor.u32 %v3010_v27, %v2755_v18 }
0x10af   :  { %1527 = vrot.lane.b32.xlu1 %v2737_v0, %s3309_s2 }
0x1108   :  { %v1409_v57 = vpop.permute.xlu1 %1408 }
0x1110   :  { %v1411_v56 = vpop.permute.xlu0 %1410 }
0x1111   :  { %2728 = vmatpush.xpose.msk.msra.mxu0 %vm90_vm0, %v1411_v56  ;;  %v1534_v31 = vpop.permute.xlu1 %1533 }
0x1112   :  { %1546 = vmatpush.bf16.msrb.mxu3 %v1534_v31 }
0x1115   :  { %2729 = vmatpush.xpose.msk.msra.mxu0 %vm90_vm0, %v1409_v57 }
0x1118   :  { %2730 = vmatmul.msk.f32.vlgmr.msra.gmra.mxu0 %vm90_vm0, %v1388_v47 }
0x1119   :  { %v1530_v33 = vpop.permute.xlu1 %1529 }
0x1120   :  { %2731 = vmatmul.msk.f32.gmra.mxu0 %vm90_vm0, %v1390_v49 }
0x1121   :  { %v1528_v34 = vpop.permute.xlu1 %1527 }
0x1195   :  { %v1437_v58 = vpop.f32.mrf.mxu0 }
0x1196   :  { %v1443_v59 = vmul.f32 0.125, %v1437_v58 }
0x1198   :  { %v1445_v42 = vadd.f32 %v3548_v60, %v1443_v59  ;;  %v2777_v59 = vld [vmem:[#allocation5 + $0x218] sm:$0xf] }
0x119a   :  { %v1447_v55 = vsel %vm273_vm8, %v1445_v42, -inf }
0x119b   :  { %1448 = vmax.xlane.f32.xlu2 %v1447_v55  ;;  %v3016_v55 = vld [vmem:[#allocation5 + $0x21c] sm:$0xf] }
0x119d   :  { %v1440_v48 = vpop.f32.mrf.mxu0 }
0x119e   :  { %v1444_v62 = vmul.f32 0.125, %v1440_v48 }
0x11a0   :  { %v1446_v1 = vadd.f32 %v3552_v63, %v1444_v62  ;;  %v2779_v62 = vld [vmem:[#allocation5 + $0x230] sm:$0xf0] }
0x11a2   :  { %v1450_v61 = vsel %vm273_vm8, %v1446_v1, -inf }
0x11a3   :  { %1451 = vmax.xlane.f32.xlu2 %v1450_v61  ;;  %v2769_v61 = vld [vmem:[#allocation5 + $0x1e8] sm:$0xf] }
0x120e   :  { %v1449_v3 = vpop.xlane.xlu2 %1448 }
0x120f   :  { %v1453_v4 = vsub.f32 %v1445_v42, %v1449_v3  ;;  %v3017_v42 = vld [vmem:[#allocation5 + $0x22c] sm:$0xf0]  ;;  %v3015_v3 = vld [vmem:[#allocation5 + $0x1fc] sm:$0xf0] }
0x1210   :  { %v2778_v48 = vor.u32 %v3017_v42, %v2777_v59  ;;  %v3022_v42 = vld [vmem:[#allocation5 + $0x1f4] sm:$0xf] }
0x1211   :  { %v1455_v5 = vmul.f32 1.442695, %v1453_v4  ;;  %v3014_v4 = vld [vmem:[#allocation5 + $0x1ec] sm:$0xf] }
0x1212   :  { %1672 = vmatpush.bf16.msrb.mxu2 %v2778_v48  ;;  %v2803_v48 = vld [vmem:[#allocation5 + $0x1f0] sm:$0xf] }
0x1213   :  { %3124 = vpow2.f32 %v1455_v5  ;;  %v2770_v5 = vor.u32 %v3015_v3, %v2769_v61  ;;  %v3020_v61 = vld [vmem:[#allocation5 + $0x1c4] sm:$0xf]  ;;  %v2797_v3 = vld [vmem:[#allocation5 + $0x1d8] sm:$0xf0] }
0x1216   :  { %v1452_v6 = vpop.xlane.xlu2 %1451  ;;  %1673 = vmatpush.bf16.msrb.mxu2 %v2770_v5  ;;  %v2795_v5 = vld [vmem:[#allocation5 + $0x1c0] sm:$0xf] }
0x1217   :  { %v1454_v7 = vsub.f32 %v1446_v1, %v1452_v6  ;;  %v2782_v1 = vor.u32 %v3016_v55, %v2779_v62  ;;  %v2771_v6 = vld [vmem:[#allocation5 + $0x200] sm:$0xf0]  ;;  %v2805_v55 = vld [vmem:[#allocation5 + $0x208] sm:$0xf0]  ;;  %v3023_v62 = vld [vmem:[#allocation5 + $0x204] sm:$0xf0] }
0x1219   :  { %v3125_v8 = vpop.eup %3124  ;;  %v1457_v9 = vmul.f32 1.442695, %v1454_v7  ;;  %1686 = vmatpush.bf16.msrb.mxu0 %v2782_v1  ;;  %v2774_v7 = vor.u32 %v3014_v4, %v2771_v6  ;;  %v2804_v1 = vor.u32 %v3023_v62, %v2803_v48  ;;  %v2800_v4 = vor.u32 %v3020_v61, %v2797_v3  ;;  %v3021_v6 = vld [vmem:[#allocation5 + $0x1d4] sm:$0xf0] }
0x121a   :  { %v1459_v11 = vsel %vm273_vm8, %v3125_v8, 0.0 }
0x121b   :  { %3126 = vpow2.f32 %v1457_v9  ;;  %1460 = vadd.xlane.f32.xlu0 %v1459_v11  ;;  %v3013_v9 = vld [vmem:[#allocation5 + $0x1cc] sm:$0xf0]  ;;  %v3012_v11 = vld [vmem:[#allocation5 + $0x1bc] sm:$0xf] }
0x121d   :  { %1687 = vmatpush.bf16.msrb.mxu0 %v2774_v7  ;;  %v1619_v7 = vld [vmem:[#allocation7 + $0x26] ss:$8 sm:$0x3] }
0x1221   :  { %v3127_v12 = vpop.eup %3126 }
0x1222   :  { %v1462_v15 = vsel %vm273_vm8, %v3127_v12, 0.0 }
0x1223   :  { %1463 = vadd.xlane.f32.xlu2 %v1462_v15  ;;  %v2763_v15 = vld [vmem:[#allocation5 + $0x1d0] sm:$0xf0] }
0x1224   :  { %v2766_v13 = vor.u32 %v3012_v11, %v2763_v15  ;;  %v2789_v11 = vld [vmem:[#allocation5 + $0x1a8] sm:$0xf0]  ;;  %v1622_v15 = vperm.slane %v1619_v7, 1 }
0x1226   :  { %1688 = vmatpush.bf16.msrb.mxu0 %v2766_v13 }
0x122a   :  { %1689 = vmatpush.bf16.msrb.mxu0 %v2758_v23 }
0x123b   :  { %1531 = vrot.lane.b32.xlu2 %v2745_v32, %s3309_s2 }
0x128e   :  { %v1461_v25 = vpop.xlane.xlu0 %1460 }
0x128f   :  { %3128 = vrcp.f32 %v1461_v25 }
0x1295   :  { %v3129_v26 = vpop.eup %3128 }
0x1296   :  { %v1467_v28 = vmul.f32 %v3129_v26, %v3125_v8  ;;  %v1464_v29 = vpop.xlane.xlu2 %1463  ;;  %v2761_v8 = vld [vmem:[#allocation5 + $0x1b8] sm:$0xf] }
0x1297   :  { %3130 = vrcp.f32 %v1464_v29 }
0x1298   :  { %2732 = vmatmul.msk.f32.vlgmr.msra.gmra.mxu1 %vm273_vm8, %v1467_v28 }
0x129d   :  { %v3131_v24 = vpop.eup %3130 }
0x129e   :  { %v1468_v30 = vmul.f32 %v3131_v24, %v3127_v12  ;;  %v1532_v52 = vpop.permute.xlu2 %1531  ;;  %v2762_v12 = vor.u32 %v3013_v9, %v2761_v8  ;;  %v2796_v8 = vor.u32 %v3021_v6, %v2795_v5  ;;  %v3018_v9 = vld [vmem:[#allocation5 + $0x194] sm:$0xf] }
0x129f   :  { %1547 = vmatpush.bf16.msrb.mxu3 %v1532_v52 }
0x12a0   :  { %2733 = vmatmul.msk.f32.gmra.mxu1 %vm273_vm8, %v1468_v30  ;;  %1674 = vmatpush.bf16.msrb.mxu2 %v2762_v12  ;;  %v2792_v12 = vor.u32 %v3018_v9, %v2789_v11 }
0x12a3   :  { %1548 = vmatpush.bf16.msrb.mxu3 %v1530_v33 }
0x12a4   :  { %1675 = vmatpush.bf16.msrb.mxu2 %v2754_v22  ;;  %v1621_v22 = vperm.slane %v1619_v7, 0  ;;  %v1812_v7 = vld [vmem:[#allocation7 + $0x27] ss:$0 sm:$0xff] }
0x12a7   :  { %1549 = vmatpush.bf16.msrb.mxu3 %v1528_v34 }
0x1315   :  { %v1492_v35 = vpop.f32.mrf.mxu1 }
0x131d   :  { %v1495_v51 = vpop.f32.mrf.mxu1 }
0x131e   :  { %v1506_v37 = vpack.c.bf16 %v1495_v51, %v1492_v35 }
0x1320   :  { %2750 = vmatmul.msk.bf16.vlgmr.msrb.gmra.mxu3 %vm90_vm0, %v1506_v37 }
0x13a3   :  { %v1551_v39 = vpop.f32.mrf.mxu3 }
0x13a4   :  { %v1556_v41 = vadd.f32 %v1551_v39, %v3514_v36 }
0x13a6   :  { %v3566_v44 = vadd.f32 %v1558_v40, %v1556_v41 }
0x13a8   :  { %v1561_v45 = vsel %vm90_vm0, %v3566_v44, 0.0 }
0x13a9   :  { %1562 = vadd.xlane.f32.xlu1 %v1561_v45 }
0x13ab   :  { %v1553_v43 = vpop.f32.mrf.mxu3 }
0x13ac   :  { %v1557_v46 = vadd.f32 %v1553_v43, %v3518_v38 }
0x13ae   :  { %v3571_v47 = vadd.f32 %v1558_v40, %v1557_v46  ;;  %v1269_v40 = vld [vmem:[#allocation7 + $0x24] ss:$0 sm:$0xff] }
0x13b0   :  { %v1564_v50 = vsel %vm90_vm0, %v3571_v47, 0.0 }
0x13b1   :  { %1565 = vadd.xlane.f32.xlu2 %v1564_v50  ;;  %v1270_v50 = vld [vmem:[#allocation7 + $0x25] ss:$0 sm:$0xff] }
0x141c   :  { %v1563_v14 = vpop.xlane.xlu1 %1562 }
0x141d   :  { %v1567_v53 = vmul.f32 %v1563_v14, %v3356_v10 }
0x141f   :  { %v3577_v36 = vsub.f32 %v3566_v44, %v1567_v53 }
0x1421   :  { %v1571_v49 = vmul.f32 %v3577_v36, %v3577_v36 }
0x1423   :  { %v1573_v54 = vsel %vm90_vm0, %v1571_v49, 0.0 }
0x1424   :  { %1574 = vadd.xlane.f32.xlu0 %v1573_v54  ;;  %v1566_v17 = vpop.xlane.xlu2 %1565 }
0x1425   :  { %v1568_v38 = vmul.f32 %v1566_v17, %v3356_v10  ;;  %v3024_v17 = vld [vmem:[#allocation5 + $0x224] sm:$0xf] }
0x1427   :  { %v3584_v56 = vsub.f32 %v3571_v47, %v1568_v38  ;;  %v2813_v38 = vld [vmem:[#allocation5 + $0x238] sm:$0xf0] }
0x1429   :  { %v1572_v57 = vmul.f32 %v3584_v56, %v3584_v56 }
0x142b   :  { %v1576_v58 = vsel %vm90_vm0, %v1572_v57, 0.0  ;;  %v2811_v57 = vld [vmem:[#allocation5 + $0x220] sm:$0xf] }
0x142c   :  { %1577 = vadd.xlane.f32.xlu0 %v1576_v58  ;;  %v3025_v58 = vld [vmem:[#allocation5 + $0x234] sm:$0xf0] }
0x142d   :  { %v2812_v59 = vor.u32 %v3025_v58, %v2811_v57 }
0x142f   :  { %1786 = vmatpush.bf16.xpose.msrb.mxu1 %v2812_v59 }
0x1437   :  { %1787 = vmatpush.bf16.xpose.msrb.mxu1 %v2804_v1 }
0x143f   :  { %1788 = vmatpush.bf16.xpose.msrb.mxu1 %v2796_v8 }
0x1497   :  { %v1575_v16 = vpop.xlane.xlu0 %1574 }
0x1498   :  { %v1579_v19 = vmul.f32 %v1575_v16, %v3356_v10  ;;  %v2787_v16 = vld [vmem:[#allocation5 + $0x190] sm:$0xf] }
0x149a   :  { %v1581_v32 = vadd.f32 1e-05, %v1579_v19  ;;  %v3019_v19 = vld [vmem:[#allocation5 + $0x1a4] sm:$0xf0] }
0x149b   :  { %v2788_v21 = vor.u32 %v3019_v19, %v2787_v16 }
0x149c   :  { %3132 = vrsqrt.f32 %v1581_v32  ;;  %vm1589_vm6 = vweird.f32 %v1581_v32 }
0x149d   :  { %1789 = vmatpush.bf16.xpose.msrb.mxu1 %v2788_v21 }
0x149f   :  { %v1578_v2 = vpop.xlane.xlu0 %1577 }
0x14a0   :  { %v1580_v0 = vmul.f32 %v1578_v2, %v3356_v10 }
0x14a2   :  { %v3133_v25 = vpop.eup %3132  ;;  %v1582_v26 = vadd.f32 1e-05, %v1580_v0 }
0x14a3   :  { %v1584_v28 = vmul.f32 %v3133_v25, %v1581_v32  ;;  %vm1590_vm5 = vweird.f32 %v3133_v25 }
0x14a4   :  { %3134 = vrsqrt.f32 %v1582_v26  ;;  %vm1591_vm7 = vmor %vm1589_vm6, %vm1590_vm5  ;;  %vm1599_vm10 = vweird.f32 %v1582_v26 }
0x14a5   :  { %v1585_v29 = vmul.f32 %v3133_v25, %v1584_v28 }
0x14a7   :  { %v1586_v24 = vmul.f32 0.5, %v1585_v29 }
0x14a9   :  { %v1587_v30 = vsub.f32 1.5, %v1586_v24 }
0x14aa   :  { %v3135_v31 = vpop.eup %3134 }
0x14ab   :  { %v1588_v52 = vmul.f32 %v3133_v25, %v1587_v30  ;;  %v1594_v33 = vmul.f32 %v3135_v31, %v1582_v26  ;;  %vm1600_vm9 = vweird.f32 %v3135_v31 }
0x14ac   :  { %vm1601_vm11 = vmor %vm1599_vm10, %vm1600_vm9 }
0x14ad   :  { %v1595_v34 = vmul.f32 %v3135_v31, %v1594_v33  ;;  %v1592_v35 = vsel %vm1591_vm7, %v3133_v25, %v1588_v52 }
0x14ae   :  { %v1603_v39 = vmul.f32 %v1592_v35, %v3577_v36  ;;  %v2816_v36 = vor.u32 %v3024_v17, %v2813_v38 }
0x14af   :  { %v1596_v51 = vmul.f32 0.5, %v1595_v34 }
0x14b0   :  { %v1605_v43 = vmul.f32 %v1603_v39, %v1269_v40  ;;  %1800 = vmatpush.bf16.xpose.msra.mxu3 %v2816_v36 }
0x14b1   :  { %v1597_v37 = vsub.f32 1.5, %v1596_v51 }
0x14b2   :  { %v1607_v53 = vadd.f32 %v1605_v43, %v1270_v50 }
0x14b3   :  { %v1598_v41 = vmul.f32 %v3135_v31, %v1597_v37 }
0x14b5   :  { %v1602_v45 = vsel %vm1601_vm11, %v3135_v31, %v1598_v41 }
0x14b6   :  { %v1604_v46 = vmul.f32 %v1602_v45, %v3584_v56  ;;  %v2808_v56 = vor.u32 %v3022_v42, %v2805_v55 }
0x14b8   :  { %v1606_v14 = vmul.f32 %v1604_v46, %v1269_v40  ;;  %1801 = vmatpush.bf16.xpose.msra.mxu3 %v2808_v56 }
0x14ba   :  { %v1608_v49 = vadd.f32 %v1606_v14, %v1270_v50 }
0x14bc   :  { %v1617_v54 = vpack.c.bf16 %v1608_v49, %v1607_v53 }
0x14be   :  { %2783 = vmatmul.msk.bf16.vlgmr.msrb.gmra.mxu2 %vm90_vm0, %v1617_v54  ;;  %2784 = vmatmul.msk.bf16.vlgmr.msrb.gmra.mxu0 %vm90_vm0, %v1617_v54 }
0x14c0   :  { %1802 = vmatpush.bf16.xpose.msra.mxu3 %v2800_v4 }
0x14c8   :  { %1803 = vmatpush.bf16.xpose.msra.mxu3 %v2792_v12 }
0x153b   :  { %v1691_v13 = vpop.f32.mrf.mxu0 }
0x153c   :  { %v1692_v20 = vadd.f32 %v1691_v13, %v1622_v15 }
0x153e   :  { %v1697_v27 = vmul.f32 %v1692_v20, %v1692_v20 }
0x1540   :  { %v1701_v18 = vmul.f32 %v1697_v27, %v1692_v20 }
0x1541   :  { %v1677_v32 = vpop.f32.mrf.mxu2 }
0x1542   :  { %v1705_v23 = vmul.f32 0.044715, %v1701_v18  ;;  %v1678_v2 = vadd.f32 %v1677_v32, %v1621_v22 }
0x1543   :  { %v1693_v0 = vpop.f32.mrf.mxu0 }
0x1544   :  { %v1709_v25 = vadd.f32 %v1705_v23, %v1692_v20  ;;  %v1696_v26 = vmul.f32 %v1678_v2, %v1678_v2  ;;  %v1694_v28 = vadd.f32 %v1693_v0, %v1622_v15 }
0x1546   :  { %v1713_v29 = vmul.f32 0.7978846, %v1709_v25  ;;  %v1700_v24 = vmul.f32 %v1696_v26, %v1678_v2  ;;  %v1699_v30 = vmul.f32 %v1694_v28, %v1694_v28  ;;  %v2843_v25 = vld [vmem:[#allocation5 + $0x2d0] sm:$0xf]  ;;  %v3033_v26 = vld [vmem:[#allocation5 + $0x2e4] sm:$0xf0] }
0x1548   :  { %v1704_v31 = vmul.f32 0.044715, %v1700_v24  ;;  %v1703_v52 = vmul.f32 %v1699_v30, %v1694_v28  ;;  %3136 = vtanh.f32 %v1713_v29  ;;  %v2844_v29 = vor.u32 %v3033_v26, %v2843_v25  ;;  %v2845_v24 = vld [vmem:[#allocation5 + $0x2e8] sm:$0xf0] }
0x1549   :  { %v1679_v33 = vpop.f32.mrf.mxu2 }
0x154a   :  { %v1708_v34 = vadd.f32 %v1704_v31, %v1678_v2  ;;  %v1707_v35 = vmul.f32 0.044715, %v1703_v52  ;;  %v1680_v51 = vadd.f32 %v1679_v33, %v1621_v22  ;;  %1931 = vmatpush.bf16.msra.mxu2 %v2844_v29  ;;  %v2835_v31 = vld [vmem:[#allocation5 + $0x2a0] sm:$0xf]  ;;  %v3031_v52 = vld [vmem:[#allocation5 + $0x2b4] sm:$0xf0] }
0x154b   :  { %v3030_v33 = vld [vmem:[#allocation5 + $0x2a4] sm:$0xf] }
0x154c   :  { %v1712_v37 = vmul.f32 0.7978846, %v1708_v34  ;;  %v1711_v39 = vadd.f32 %v1707_v35, %v1694_v28  ;;  %v1698_v40 = vmul.f32 %v1680_v51, %v1680_v51  ;;  %v2836_v34 = vor.u32 %v3031_v52, %v2835_v31  ;;  %v2837_v35 = vld [vmem:[#allocation5 + $0x2b8] sm:$0xf0] }
0x154e   :  { %v1715_v41 = vmul.f32 0.7978846, %v1711_v39  ;;  %v1702_v45 = vmul.f32 %v1698_v40, %v1680_v51  ;;  %3138 = vtanh.f32 %v1712_v37  ;;  %v3137_v43 = vpop.eup %3136  ;;  %1932 = vmatpush.bf16.msra.mxu2 %v2836_v34  ;;  %v2827_v37 = vld [vmem:[#allocation5 + $0x270] sm:$0xf]  ;;  %v3029_v39 = vld [vmem:[#allocation5 + $0x284] sm:$0xf0] }
0x154f   :  { %v1721_v14 = vadd.f32 1.0, %v3137_v43  ;;  %v3028_v40 = vld [vmem:[#allocation5 + $0x274] sm:$0xf] }
0x1550   :  { %3140 = vtanh.f32 %v1715_v41  ;;  %v1706_v46 = vmul.f32 0.044715, %v1702_v45  ;;  %v2828_v41 = vor.u32 %v3029_v39, %v2827_v37  ;;  %v2829_v45 = vld [vmem:[#allocation5 + $0x288] sm:$0xf0] }
0x1551   :  { %v1725_v17 = vmul.f32 0.5, %v1721_v14  ;;  %v2832_v43 = vor.u32 %v3028_v40, %v2829_v45  ;;  %v2819_v14 = vld [vmem:[#allocation5 + $0x240] sm:$0xf] }
0x1552   :  { %v1710_v50 = vadd.f32 %v1706_v46, %v1680_v51  ;;  %1933 = vmatpush.bf16.msra.mxu2 %v2828_v41 }
0x1553   :  { %v1729_v58 = vmul.f32 %v1725_v17, %v1692_v20  ;;  %v2821_v17 = vld [vmem:[#allocation5 + $0x258] sm:$0xf0] }
0x1554   :  { %v1714_v53 = vmul.f32 0.7978846, %v1710_v50  ;;  %v3139_v49 = vpop.eup %3138 }
0x1555   :  { %v1720_v36 = vadd.f32 1.0, %v3139_v49  ;;  %v3026_v49 = vld [vmem:[#allocation5 + $0x244] sm:$0xf] }
0x1556   :  { %v3141_v54 = vpop.eup %3140  ;;  %3142 = vtanh.f32 %v1714_v53  ;;  %v3027_v53 = vld [vmem:[#allocation5 + $0x254] sm:$0xf0] }
0x1557   :  { %v1723_v38 = vadd.f32 1.0, %v3141_v54  ;;  %v1724_v55 = vmul.f32 0.5, %v1720_v36  ;;  %v2820_v54 = vor.u32 %v3027_v53, %v2819_v14  ;;  %v2824_v36 = vor.u32 %v3026_v49, %v2821_v17  ;;  %v3037_v17 = vld [vmem:[#allocation5 + $0x2e8] sm:$0xf0] }
0x1559   :  { %v1727_v57 = vmul.f32 0.5, %v1723_v38  ;;  %v1728_v1 = vmul.f32 %v1724_v55, %v1678_v2  ;;  %1934 = vmatpush.bf16.msra.mxu2 %v2820_v54 }
0x155b   :  { %v1731_v59 = vmul.f32 %v1727_v57, %v1694_v28  ;;  %v3032_v28 = vld [vmem:[#allocation5 + $0x2d4] sm:$0xf] }
0x155c   :  { %v3143_v42 = vpop.eup %3142  ;;  %v2848_v30 = vor.u32 %v3032_v28, %v2845_v24 }
0x155d   :  { %v1722_v56 = vadd.f32 1.0, %v3143_v42  ;;  %v1733_v48 = vpack.c.bf16 %v1731_v59, %v1729_v58 }
0x155e   :  { %1945 = vmatpush.bf16.msra.mxu0 %v2848_v30 }
0x155f   :  { %v1726_v62 = vmul.f32 0.5, %v1722_v56  ;;  %1804 = vmatmul.bf16.vlgmr.msra.gmra.mxu3 %v1733_v48 }
0x1561   :  { %v1730_v61 = vmul.f32 %v1726_v62, %v1680_v51  ;;  %v2840_v51 = vor.u32 %v3030_v33, %v2837_v35 }
0x1563   :  { %v1732_v3 = vpack.c.bf16 %v1730_v61, %v1728_v1  ;;  %1946 = vmatpush.bf16.msra.mxu0 %v2840_v51 }
0x1565   :  { %1790 = vmatmul.bf16.vlgmr.msrb.gmra.mxu1 %v1732_v3 }
0x1567   :  { %1947 = vmatpush.bf16.msra.mxu0 %v2832_v43 }
0x156b   :  { %1948 = vmatpush.bf16.msra.mxu0 %v2824_v36  ;;  %v2867_v36 = vld [vmem:[#allocation5 + $0x2a4] sm:$0xf] }
0x15e2   :  { %v1791_v4 = vpop.f32.mrf.mxu1  ;;  %v1805_v5 = vpop.f32.mrf.mxu3 }
0x15e3   :  { %v1806_v6 = vadd.f32 %v1805_v5, %v1791_v4 }
0x15e5   :  { %v1810_v8 = vadd.f32 %v1806_v6, %v3566_v44 }
0x15e7   :  { %v3596_v9 = vadd.f32 %v1812_v7, %v1810_v8 }
0x15e9   :  { %v1820_v11 = vsel %vm90_vm0, %v3596_v9, 0.0 }
0x15ea   :  { %v1807_v12 = vpop.f32.mrf.mxu3  ;;  %1821 = vadd.xlane.f32.xlu0 %v1820_v11  ;;  %v1793_v15 = vpop.f32.mrf.mxu1  ;;  %v1816_v11 = vld [vmem:[#allocation7 + $0x32] ss:$0 sm:$0xff] }
0x15eb   :  { %v1808_v13 = vadd.f32 %v1807_v12, %v1793_v15 }
0x15ed   :  { %v1811_v16 = vadd.f32 %v1808_v13, %v3571_v47 }
0x15ef   :  { %v3601_v19 = vadd.f32 %v1812_v7, %v1811_v16 }
0x15f1   :  { %v1823_v20 = vsel %vm90_vm0, %v3601_v19, 0.0 }
0x15f2   :  { %1824 = vadd.xlane.f32.xlu0 %v1823_v20  ;;  %v1817_v20 = vld [vmem:[#allocation7 + $0x33] ss:$0 sm:$0xff] }
0x165d   :  { %v1822_v21 = vpop.xlane.xlu0 %1821 }
0x165e   :  { %v1826_v44 = vmul.f32 %v1822_v21, %v3356_v10 }
0x1660   :  { %v3607_v27 = vsub.f32 %v3596_v9, %v1826_v44 }
0x1662   :  { %v1830_v22 = vmul.f32 %v3607_v27, %v3607_v27 }
0x1664   :  { %v1832_v18 = vsel %vm90_vm0, %v1830_v22, 0.0 }
0x1665   :  { %1833 = vadd.xlane.f32.xlu1 %v1832_v18  ;;  %v1825_v32 = vpop.xlane.xlu0 %1824 }
0x1666   :  { %v1827_v47 = vmul.f32 %v1825_v32, %v3356_v10 }
0x1668   :  { %v3614_v23 = vsub.f32 %v3601_v19, %v1827_v47  ;;  %v1878_v47 = vld [vmem:[#allocation7 + $0x30] ss:$8 sm:$0x3] }
0x166a   :  { %v1831_v2 = vmul.f32 %v3614_v23, %v3614_v23 }
0x166c   :  { %v1835_v0 = vsel %vm90_vm0, %v1831_v2, 0.0 }
0x166d   :  { %1836 = vadd.xlane.f32.xlu0 %v1835_v0  ;;  %v1881_v0 = vperm.slane %v1878_v47, 1 }
0x16d8   :  { %v1834_v46 = vpop.xlane.xlu1 %1833 }
0x16d9   :  { %v1838_v50 = vmul.f32 %v1834_v46, %v3356_v10 }
0x16db   :  { %v1840_v38 = vadd.f32 1e-05, %v1838_v50 }
0x16dd   :  { %3144 = vrsqrt.f32 %v1840_v38  ;;  %vm1848_vm13 = vweird.f32 %v1840_v38 }
0x16e0   :  { %v1837_v57 = vpop.xlane.xlu0 %1836 }
0x16e1   :  { %v1839_v58 = vmul.f32 %v1837_v57, %v3356_v10  ;;  %v3036_v57 = vld [vmem:[#allocation5 + $0x2b8] sm:$0xf0] }
0x16e3   :  { %v3145_v59 = vpop.eup %3144  ;;  %v1841_v42 = vadd.f32 1e-05, %v1839_v58  ;;  %v2868_v58 = vor.u32 %v3036_v57, %v2867_v36  ;;  %v3038_v36 = vld [vmem:[#allocation5 + $0x24c] sm:$0xf] }
0x16e4   :  { %v1843_v55 = vmul.f32 %v3145_v59, %v1840_v38  ;;  %vm1849_vm12 = vweird.f32 %v3145_v59 }
0x16e5   :  { %3146 = vrsqrt.f32 %v1841_v42  ;;  %vm1850_vm14 = vmor %vm1848_vm13, %vm1849_vm12  ;;  %vm1858_vm1 = vweird.f32 %v1841_v42 }
0x16e6   :  { %v1844_v56 = vmul.f32 %v3145_v59, %v1843_v55 }
0x16e8   :  { %v1845_v48 = vmul.f32 0.5, %v1844_v56  ;;  %v2859_v56 = vld [vmem:[#allocation5 + $0x244] sm:$0xf] }
0x16ea   :  { %v1846_v62 = vsub.f32 1.5, %v1845_v48  ;;  %v3034_v48 = vld [vmem:[#allocation5 + $0x258] sm:$0xf0] }
0x16eb   :  { %v3147_v1 = vpop.eup %3146 }
0x16ec   :  { %v1847_v61 = vmul.f32 %v3145_v59, %v1846_v62  ;;  %v1853_v3 = vmul.f32 %v3147_v1, %v1841_v42  ;;  %vm1859_vm15 = vweird.f32 %v3147_v1  ;;  %v3035_v42 = vld [vmem:[#allocation5 + $0x288] sm:$0xf0]  ;;  %v2860_v62 = vor.u32 %v3034_v48, %v2859_v56 }
0x16ed   :  { %vm1860_vm2 = vmor %vm1858_vm1, %vm1859_vm15 }
0x16ee   :  { %v1854_v4 = vmul.f32 %v3147_v1, %v1853_v3  ;;  %v1851_v5 = vsel %vm1850_vm14, %v3145_v59, %v1847_v61  ;;  %v2863_v59 = vld [vmem:[#allocation5 + $0x274] sm:$0xf] }
0x16ef   :  { %v1862_v8 = vmul.f32 %v1851_v5, %v3607_v27  ;;  %v1880_v27 = vperm.slane %v1878_v47, 0  ;;  %v2864_v55 = vor.u32 %v3035_v42, %v2863_v59 }
0x16f0   :  { %v1855_v6 = vmul.f32 0.5, %v1854_v4 }
0x16f1   :  { %v1864_v13 = vmul.f32 %v1862_v8, %v1816_v11 }
0x16f2   :  { %v1856_v7 = vsub.f32 1.5, %v1855_v6 }
0x16f3   :  { %v1866_v44 = vadd.f32 %v1864_v13, %v1817_v20 }
0x16f4   :  { %v1857_v12 = vmul.f32 %v3147_v1, %v1856_v7 }
0x16f6   :  { %v1861_v15 = vsel %vm1860_vm2, %v3147_v1, %v1857_v12 }
0x16f7   :  { %v1863_v16 = vmul.f32 %v1861_v15, %v3614_v23 }
0x16f9   :  { %v1865_v21 = vmul.f32 %v1863_v16, %v1816_v11 }
0x16fb   :  { %v1867_v22 = vadd.f32 %v1865_v21, %v1817_v20  ;;  %v2107_v21 = vld [vmem:[#allocation7 + $0x31] ss:$0 sm:$0xff] }
0x16fd   :  { %v1877_v18 = vpack.c.bf16 %v1867_v22, %v1866_v44 }
0x16ff   :  { %2849 = vmatmul.msk.bf16.vlgmr.msra.gmra.mxu2 %vm90_vm0, %v1877_v18  ;;  %2850 = vmatmul.msk.bf16.vlgmr.msra.gmra.mxu0 %vm90_vm0, %v1877_v18 }
0x177c   :  { %v1950_v32 = vpop.f32.mrf.mxu0 }
0x177d   :  { %v1951_v23 = vadd.f32 %v1950_v32, %v1881_v0 }
0x1782   :  { %v1936_v2 = vpop.f32.mrf.mxu2 }
0x1783   :  { %v1937_v25 = vadd.f32 %v1936_v2, %v1880_v27 }
0x1784   :  { %v1952_v26 = vpop.f32.mrf.mxu0 }
0x1785   :  { %v1953_v28 = vadd.f32 %v1952_v26, %v1881_v0  ;;  %1957 = vrot.lane.b32.xlu1 %v1937_v25, %s3309_s2 }
0x1787   :  { %2038 = vmatpush.msrb.mxu0 %v1953_v28 }
0x1789   :  { %2039 = vmatpush.msrb.mxu0 %v1951_v23 }
0x178a   :  { %v1938_v29 = vpop.f32.mrf.mxu2 }
0x178b   :  { %v1939_v24 = vadd.f32 %v1938_v29, %v1880_v27 }
0x178d   :  { %1959 = vrot.lane.b32.xlu2 %v1939_v24, %s3309_s2  ;;  %2080 = vrot.lane.b32.xlu1 %v2868_v58, %s3309_s2  ;;  %v2878_v58 = vld [vmem:[#allocation5 + $0x260] sm:$0xf0] }
0x178e   :  { %v2881_v42 = vor.u32 %v3038_v36, %v2878_v58 }
0x1795   :  { %2078 = vrot.lane.b32.xlu1 %v2864_v55, %s3309_s2 }
0x179d   :  { %2076 = vrot.lane.b32.xlu1 %v2860_v62, %s3309_s2 }
0x17e7   :  { %v1960_v30 = vpop.permute.xlu2 %1959 }
0x17e8   :  { %2851 = vmatpush.xpose.msk.msrb.mxu2 %vm90_vm0, %v1960_v30 }
0x17f7   :  { %v1958_v31 = vpop.permute.xlu1 %1957 }
0x17f8   :  { %2852 = vmatpush.xpose.msk.msrb.mxu2 %vm90_vm0, %v1958_v31  ;;  %v2900_v31 = vld [vmem:[#allocation5 + $0x2d8] sm:$0xf] }
0x17fb   :  { %2853 = vmatmul.msk.f32.vlgmr.msrb.gmra.mxu2 %vm90_vm0, %v1937_v25 }
0x17ff   :  { %v2081_v8 = vpop.permute.xlu1 %2080 }
0x1803   :  { %2854 = vmatmul.msk.f32.gmra.mxu2 %vm90_vm0, %v1939_v24 }
0x1807   :  { %v2079_v11 = vpop.permute.xlu1 %2078 }
0x180f   :  { %v2077_v12 = vpop.permute.xlu1 %2076 }
0x187e   :  { %v1986_v52 = vpop.f32.mrf.mxu2 }
0x187f   :  { %v1992_v33 = vmul.f32 0.125, %v1986_v52  ;;  %v3045_v52 = vld [vmem:[#allocation5 + $0x2ec] sm:$0xf0] }
0x1881   :  { %v1994_v34 = vadd.f32 %v3548_v60, %v1992_v33  ;;  %v3044_v33 = vld [vmem:[#allocation5 + $0x2dc] sm:$0xf] }
0x1883   :  { %v1996_v35 = vsel %vm273_vm8, %v1994_v34, -inf }
0x1884   :  { %1997 = vmax.xlane.f32.xlu0 %v1996_v35  ;;  %v2902_v35 = vld [vmem:[#allocation5 + $0x2f0] sm:$0xf0] }
0x1886   :  { %v1989_v51 = vpop.f32.mrf.mxu2 }
0x1887   :  { %v1993_v37 = vmul.f32 0.125, %v1989_v51  ;;  %v2905_v51 = vor.u32 %v3044_v33, %v2902_v35  ;;  %v3049_v35 = vld [vmem:[#allocation5 + $0x294] sm:$0xf0] }
0x1889   :  { %v1995_v39 = vadd.f32 %v3552_v63, %v1993_v37  ;;  %v2871_v63 = vld [vmem:[#allocation5 + $0x2d4] sm:$0xf]  ;;  %2235 = vmatpush.bf16.msra.mxu2 %v2905_v51  ;;  %v2892_v37 = vld [vmem:[#allocation5 + $0x2a8] sm:$0xf]  ;;  %v3048_v51 = vld [vmem:[#allocation5 + $0x284] sm:$0xf] }
0x188a   :  { %v2872_v38 = vor.u32 %v3037_v17, %v2871_v63  ;;  %v2876_v17 = vld [vmem:[#allocation5 + $0x248] sm:$0xf] }
0x188b   :  { %v1999_v40 = vsel %vm273_vm8, %v1995_v39, -inf }
0x188c   :  { %2000 = vmax.xlane.f32.xlu0 %v1999_v40  ;;  %v3042_v40 = vld [vmem:[#allocation5 + $0x2ac] sm:$0xf] }
0x18f7   :  { %v1998_v41 = vpop.xlane.xlu0 %1997 }
0x18f8   :  { %v2002_v45 = vsub.f32 %v1994_v34, %v1998_v41  ;;  %v2901_v34 = vor.u32 %v3045_v52, %v2900_v31  ;;  %v2928_v52 = vld [vmem:[#allocation5 + $0x2c8] sm:$0xf0] }
0x18fa   :  { %v2004_v43 = vmul.f32 1.442695, %v2002_v45  ;;  %2221 = vmatpush.bf16.msrb.mxu3 %v2901_v34  ;;  %v2894_v45 = vld [vmem:[#allocation5 + $0x2c0] sm:$0xf0]  ;;  %v2918_v34 = vld [vmem:[#allocation5 + $0x280] sm:$0xf] }
0x18fc   :  { %3148 = vpow2.f32 %v2004_v43  ;;  %v2897_v43 = vor.u32 %v3042_v40, %v2894_v45  ;;  %v2910_v45 = vld [vmem:[#allocation5 + $0x250] sm:$0xf] }
0x18fe   :  { %2236 = vmatpush.bf16.msra.mxu2 %v2897_v43  ;;  %v3047_v43 = vld [vmem:[#allocation5 + $0x264] sm:$0xf0] }
0x18ff   :  { %v2001_v46 = vpop.xlane.xlu0 %2000 }
0x1900   :  { %v2003_v50 = vsub.f32 %v1995_v39, %v2001_v46  ;;  %v3043_v39 = vld [vmem:[#allocation5 + $0x2bc] sm:$0xf0]  ;;  %v2884_v46 = vld [vmem:[#allocation5 + $0x278] sm:$0xf] }
0x1901   :  { %v2893_v41 = vor.u32 %v3043_v39, %v2892_v37  ;;  %v2919_v37 = vor.u32 %v3049_v35, %v2918_v34  ;;  %v2920_v39 = vld [vmem:[#allocation5 + $0x298] sm:$0xf0]  ;;  %v2394_v34 = vld [vmem:[#allocation8 + $0xb0] sm:$0xff]  ;;  %v2393_v35 = vld [vmem:[#allocation8 + $0xa8] sm:$0xff] }
0x1902   :  { %v3149_v14 = vpop.eup %3148  ;;  %v2006_v53 = vmul.f32 1.442695, %v2003_v50  ;;  %v3041_v50 = vld [vmem:[#allocation5 + $0x28c] sm:$0xf0]  ;;  %v2923_v40 = vor.u32 %v3048_v51, %v2920_v39  ;;  %v2392_v51 = vld [vmem:[#allocation8 + $0xa0] sm:$0xff] }
0x1903   :  { %v2008_v60 = vsel %vm273_vm8, %v3149_v14, 0.0  ;;  %2222 = vmatpush.bf16.msrb.mxu3 %v2893_v41  ;;  %v2168_v41 = vld [vmem:[#allocation7 + $0x36] ss:$8 sm:$0x3] }
0x1904   :  { %3150 = vpow2.f32 %v2006_v53  ;;  %2009 = vadd.xlane.f32.xlu0 %v2008_v60  ;;  %v2885_v53 = vor.u32 %v3041_v50, %v2884_v46  ;;  %v2886_v60 = vld [vmem:[#allocation5 + $0x290] sm:$0xf0]  ;;  %v2911_v50 = vor.u32 %v3047_v43, %v2910_v45 }
0x1905   :  { %v3046_v46 = vld [vmem:[#allocation5 + $0x254] sm:$0xf] }
0x1906   :  { %v2390_v39 = vld [vmem:[#allocation8 + $0x90] sm:$0xff] }
0x1907   :  { %2223 = vmatpush.bf16.msrb.mxu3 %v2885_v53  ;;  %v2170_v53 = vperm.slane %v2168_v41, 0 }
0x190a   :  { %v3151_v49 = vpop.eup %3150 }
0x190b   :  { %v2011_v54 = vsel %vm273_vm8, %v3151_v49, 0.0 }
0x190c   :  { %2012 = vadd.xlane.f32.xlu2 %v2011_v54 }
0x1918   :  { %2082 = vrot.lane.b32.xlu0 %v2872_v38, %s3309_s2  ;;  %v3039_v38 = vld [vmem:[#allocation5 + $0x25c] sm:$0xf0] }
0x1919   :  { %v2877_v57 = vor.u32 %v3039_v38, %v2876_v17 }
0x191b   :  { %2224 = vmatpush.bf16.msrb.mxu3 %v2877_v57 }
0x1977   :  { %v2010_v1 = vpop.xlane.xlu0 %2009 }
0x1978   :  { %3152 = vrcp.f32 %v2010_v1 }
0x197e   :  { %v3153_v61 = vpop.eup %3152 }
0x197f   :  { %v2016_v3 = vmul.f32 %v3153_v61, %v3149_v14  ;;  %v2013_v4 = vpop.xlane.xlu2 %2012  ;;  %v3040_v14 = vld [vmem:[#allocation5 + $0x27c] sm:$0xf] }
0x1980   :  { %3154 = vrcp.f32 %v2013_v4 }
0x1981   :  { %2855 = vmatmul.msk.f32.vlgmr.msrb.gmra.mxu0 %vm273_vm8, %v2016_v3 }
0x1986   :  { %v3155_v5 = vpop.eup %3154 }
0x1987   :  { %v2017_v6 = vmul.f32 %v3155_v5, %v3151_v49  ;;  %v2889_v49 = vor.u32 %v3040_v14, %v2886_v60  ;;  %v2912_v14 = vld [vmem:[#allocation5 + $0x268] sm:$0xf0]  ;;  %v2171_v60 = vperm.slane %v2168_v41, 1  ;;  %v2388_v41 = vld [vmem:[#allocation8 + $0x80] sm:$0xff] }
0x1989   :  { %2856 = vmatmul.msk.f32.gmra.mxu0 %vm273_vm8, %v2017_v6  ;;  %2237 = vmatpush.bf16.msra.mxu2 %v2889_v49  ;;  %v2915_v49 = vor.u32 %v3046_v46, %v2912_v14 }
0x198a   :  { %v2083_v7 = vpop.permute.xlu0 %2082 }
0x198b   :  { %2095 = vmatpush.bf16.msra.mxu1 %v2083_v7 }
0x198d   :  { %2238 = vmatpush.bf16.msra.mxu2 %v2881_v42 }
0x198f   :  { %2096 = vmatpush.bf16.msra.mxu1 %v2081_v8 }
0x1993   :  { %2097 = vmatpush.bf16.msra.mxu1 %v2079_v11 }
0x1997   :  { %2098 = vmatpush.bf16.msra.mxu1 %v2077_v12 }
0x19fe   :  { %v2041_v15 = vpop.f32.mrf.mxu0 }
0x1a06   :  { %v2044_v13 = vpop.f32.mrf.mxu0 }
0x1a07   :  { %v2055_v16 = vpack.c.bf16 %v2044_v13, %v2041_v15  ;;  %v1818_v13 = vld [vmem:[#allocation7 + $0x34] ss:$0 sm:$0xff] }
0x1a09   :  { %2873 = vmatmul.msk.bf16.vlgmr.msra.gmra.mxu1 %vm90_vm0, %v2055_v16 }
0x1a86   :  { %v2100_v20 = vpop.f32.mrf.mxu1 }
0x1a87   :  { %v2105_v44 = vadd.f32 %v2100_v20, %v3596_v9 }
0x1a89   :  { %v3645_v22 = vadd.f32 %v2107_v21, %v2105_v44 }
0x1a8b   :  { %v2110_v18 = vsel %vm90_vm0, %v3645_v22, 0.0 }
0x1a8c   :  { %2111 = vadd.xlane.f32.xlu0 %v2110_v18  ;;  %v1819_v18 = vld [vmem:[#allocation7 + $0x35] ss:$0 sm:$0xff] }
0x1a8e   :  { %v2102_v32 = vpop.f32.mrf.mxu1 }
0x1a8f   :  { %v2106_v47 = vadd.f32 %v2102_v32, %v3601_v19 }
0x1a91   :  { %v3650_v27 = vadd.f32 %v2107_v21, %v2106_v47 }
0x1a93   :  { %v2113_v2 = vsel %vm90_vm0, %v3650_v27, 0.0 }
0x1a94   :  { %2114 = vadd.xlane.f32.xlu1 %v2113_v2 }
0x1aff   :  { %v2112_v0 = vpop.xlane.xlu0 %2111 }
0x1b00   :  { %v2116_v25 = vmul.f32 %v2112_v0, %v3356_v10 }
0x1b02   :  { %v3656_v9 = vsub.f32 %v3645_v22, %v2116_v25  ;;  %v2934_v25 = vld [vmem:[#allocation5 + $0x2e0] sm:$0xf] }
0x1b04   :  { %v2120_v26 = vmul.f32 %v3656_v9, %v3656_v9 }
0x1b06   :  { %v2122_v28 = vsel %vm90_vm0, %v2120_v26, 0.0  ;;  %v3053_v26 = vld [vmem:[#allocation5 + $0x2f4] sm:$0xf0] }
0x1b07   :  { %2123 = vadd.xlane.f32.xlu2 %v2122_v28  ;;  %v2115_v23 = vpop.xlane.xlu1 %2114  ;;  %v2935_v28 = vor.u32 %v3053_v26, %v2934_v25 }
0x1b08   :  { %v2117_v19 = vmul.f32 %v2115_v23, %v3356_v10  ;;  %v2936_v23 = vld [vmem:[#allocation5 + $0x2f8] sm:$0xf0] }
0x1b09   :  { %2335 = vmatpush.bf16.xpose.msra.mxu0 %v2935_v28 }
0x1b0a   :  { %v3663_v29 = vsub.f32 %v3650_v27, %v2117_v19 }
0x1b0c   :  { %v2121_v24 = vmul.f32 %v3663_v29, %v3663_v29 }
0x1b0e   :  { %v2125_v30 = vsel %vm90_vm0, %v2121_v24, 0.0  ;;  %v2926_v24 = vld [vmem:[#allocation5 + $0x2b0] sm:$0xf] }
0x1b0f   :  { %2126 = vadd.xlane.f32.xlu2 %v2125_v30  ;;  %v3051_v30 = vld [vmem:[#allocation5 + $0x2c4] sm:$0xf0] }
0x1b10   :  { %v2927_v31 = vor.u32 %v3051_v30, %v2926_v24 }
0x1b12   :  { %2336 = vmatpush.bf16.xpose.msra.mxu0 %v2927_v31 }
0x1b1a   :  { %2337 = vmatpush.bf16.xpose.msra.mxu0 %v2919_v37  ;;  %v2391_v37 = vld [vmem:[#allocation8 + $0x98] sm:$0xff] }
0x1b22   :  { %2338 = vmatpush.bf16.xpose.msra.mxu0 %v2911_v50 }
0x1b7a   :  { %v2124_v54 = vpop.xlane.xlu2 %2123 }
0x1b7b   :  { %v2128_v63 = vmul.f32 %v2124_v54, %v3356_v10 }
0x1b7d   :  { %v2130_v59 = vadd.f32 1e-05, %v2128_v63 }
0x1b7f   :  { %3156 = vrsqrt.f32 %v2130_v59  ;;  %vm2138_vm4 = vweird.f32 %v2130_v59 }
0x1b82   :  { %v2127_v55 = vpop.xlane.xlu2 %2126 }
0x1b83   :  { %v2129_v56 = vmul.f32 %v2127_v55, %v3356_v10 }
0x1b85   :  { %v3157_v48 = vpop.eup %3156  ;;  %v2131_v62 = vadd.f32 1e-05, %v2129_v56 }
0x1b86   :  { %v2133_v1 = vmul.f32 %v3157_v48, %v2130_v59  ;;  %vm2139_vm3 = vweird.f32 %v3157_v48 }
0x1b87   :  { %3158 = vrsqrt.f32 %v2131_v62  ;;  %vm2140_vm5 = vmor %vm2138_vm4, %vm2139_vm3  ;;  %vm2148_vm7 = vweird.f32 %v2131_v62 }
0x1b88   :  { %v2134_v61 = vmul.f32 %v3157_v48, %v2133_v1 }
0x1b8a   :  { %v2135_v3 = vmul.f32 0.5, %v2134_v61 }
0x1b8c   :  { %v2136_v4 = vsub.f32 1.5, %v2135_v3 }
0x1b8d   :  { %v3159_v5 = vpop.eup %3158 }
0x1b8e   :  { %v2137_v6 = vmul.f32 %v3157_v48, %v2136_v4  ;;  %v2143_v7 = vmul.f32 %v3159_v5, %v2131_v62  ;;  %vm2149_vm6 = vweird.f32 %v3159_v5 }
0x1b8f   :  { %vm2150_vm9 = vmor %vm2148_vm7, %vm2149_vm6 }
0x1b90   :  { %v2144_v8 = vmul.f32 %v3159_v5, %v2143_v7  ;;  %v2141_v11 = vsel %vm2140_vm5, %v3157_v48, %v2137_v6 }
0x1b91   :  { %v2152_v10 = vmul.f32 %v2141_v11, %v3656_v9  ;;  %v3052_v9 = vld [vmem:[#allocation5 + $0x2e4] sm:$0xf] }
0x1b92   :  { %v2145_v12 = vmul.f32 0.5, %v2144_v8  ;;  %v2939_v19 = vor.u32 %v3052_v9, %v2936_v23 }
0x1b93   :  { %v2154_v21 = vmul.f32 %v2152_v10, %v1818_v13 }
0x1b94   :  { %v2146_v15 = vsub.f32 1.5, %v2145_v12  ;;  %2349 = vmatpush.bf16.xpose.msrb.mxu1 %v2939_v19 }
0x1b95   :  { %v2156_v47 = vadd.f32 %v2154_v21, %v1819_v18 }
0x1b96   :  { %v2147_v16 = vmul.f32 %v3159_v5, %v2146_v15 }
0x1b98   :  { %v2151_v20 = vsel %vm2150_vm9, %v3159_v5, %v2147_v16 }
0x1b99   :  { %v2153_v44 = vmul.f32 %v2151_v20, %v3663_v29  ;;  %v3050_v29 = vld [vmem:[#allocation5 + $0x2b4] sm:$0xf] }
0x1b9a   :  { %v2931_v33 = vor.u32 %v3050_v29, %v2928_v52 }
0x1b9b   :  { %v2155_v32 = vmul.f32 %v2153_v44, %v1818_v13 }
0x1b9c   :  { %2350 = vmatpush.bf16.xpose.msrb.mxu1 %v2931_v33  ;;  %v2395_v33 = vld [vmem:[#allocation8 + $0xb8] sm:$0xff] }
0x1b9d   :  { %v2157_v2 = vadd.f32 %v2155_v32, %v1819_v18  ;;  %2409 = vmatpush.msrb.mxu2 %v2395_v33 }
0x1b9f   :  { %v2166_v0 = vpack.c.bf16 %v2157_v2, %v2156_v47  ;;  %2410 = vmatpush.msrb.mxu2 %v2394_v34 }
0x1ba1   :  { %2906 = vmatmul.msk.bf16.vlgmr.msrb.gmra.mxu3 %vm90_vm0, %v2166_v0  ;;  %2907 = vmatmul.msk.bf16.vlgmr.msra.gmra.mxu2 %vm90_vm0, %v2166_v0 }
0x1ba2   :  { %2411 = vmatpush.msrb.mxu2 %v2393_v35 }
0x1ba4   :  { %2351 = vmatpush.bf16.xpose.msrb.mxu1 %v2923_v40  ;;  %2412 = vmatpush.msrb.mxu2 %v2392_v51  ;;  %v2389_v40 = vld [vmem:[#allocation8 + $0x88] sm:$0xff] }
0x1ba6   :  { %2413 = vmatpush.msrb.mxu2 %v2391_v37 }
0x1ba8   :  { %2414 = vmatpush.msrb.mxu2 %v2390_v39 }
0x1baa   :  { %2415 = vmatpush.msrb.mxu2 %v2389_v40 }
0x1bac   :  { %2352 = vmatpush.bf16.xpose.msrb.mxu1 %v2915_v49  ;;  %2416 = vmatpush.msrb.mxu2 %v2388_v41 }
0x1c24   :  { %v2226_v54 = vpop.f32.mrf.mxu3  ;;  %v2240_v63 = vpop.f32.mrf.mxu2 }
0x1c25   :  { %v2227_v17 = vadd.f32 %v2226_v54, %v2170_v53  ;;  %v2241_v38 = vadd.f32 %v2240_v63, %v2171_v60  ;;  %v2361_v54 = vld [vmem:[#allocation7 + $0x37] ss:$0 sm:$0xff] }
0x1c27   :  { %v2245_v36 = vmul.f32 %v2227_v17, %v2227_v17  ;;  %v2246_v57 = vmul.f32 %v2241_v38, %v2241_v38 }
0x1c29   :  { %v2249_v58 = vmul.f32 %v2245_v36, %v2227_v17  ;;  %v2250_v59 = vmul.f32 %v2246_v57, %v2241_v38  ;;  %v3069_v57 = vld [vmem:[#allocation8 + $0xc0] ss:$0 sm:$0xff] }
0x1c2b   :  { %v2253_v42 = vmul.f32 0.044715, %v2249_v58  ;;  %v2254_v55 = vmul.f32 0.044715, %v2250_v59 }
0x1c2c   :  { %v2228_v56 = vpop.f32.mrf.mxu3  ;;  %v2242_v48 = vpop.f32.mrf.mxu2 }
0x1c2d   :  { %v2257_v62 = vadd.f32 %v2253_v42, %v2227_v17  ;;  %v2258_v1 = vadd.f32 %v2254_v55, %v2241_v38  ;;  %v2229_v61 = vadd.f32 %v2228_v56, %v2170_v53  ;;  %v2243_v3 = vadd.f32 %v2242_v48, %v2171_v60 }
0x1c2f   :  { %v2261_v4 = vmul.f32 0.7978846, %v2257_v62  ;;  %v2247_v5 = vmul.f32 %v2229_v61, %v2229_v61  ;;  %v2248_v6 = vmul.f32 %v2243_v3, %v2243_v3  ;;  %v2262_v7 = vmul.f32 0.7978846, %v2258_v1 }
0x1c31   :  { %v2251_v8 = vmul.f32 %v2247_v5, %v2229_v61  ;;  %v2252_v11 = vmul.f32 %v2248_v6, %v2243_v3  ;;  %3160 = vtanh.f32 %v2261_v4 }
0x1c32   :  { %3162 = vtanh.f32 %v2262_v7 }
0x1c33   :  { %v2255_v12 = vmul.f32 0.044715, %v2251_v8  ;;  %v2256_v15 = vmul.f32 0.044715, %v2252_v11 }
0x1c35   :  { %v2259_v10 = vadd.f32 %v2255_v12, %v2229_v61  ;;  %v2260_v13 = vadd.f32 %v2256_v15, %v2243_v3 }
0x1c37   :  { %v2263_v16 = vmul.f32 0.7978846, %v2259_v10  ;;  %v2264_v20 = vmul.f32 0.7978846, %v2260_v13  ;;  %v3161_v21 = vpop.eup %3160 }
0x1c38   :  { %v3163_v44 = vpop.eup %3162  ;;  %v2269_v18 = vadd.f32 1.0, %v3161_v21 }
0x1c39   :  { %3164 = vtanh.f32 %v2263_v16  ;;  %v2270_v32 = vadd.f32 1.0, %v3163_v44 }
0x1c3a   :  { %3166 = vtanh.f32 %v2264_v20  ;;  %v2273_v0 = vmul.f32 0.5, %v2269_v18 }
0x1c3b   :  { %v2274_v26 = vmul.f32 0.5, %v2270_v32 }
0x1c3c   :  { %v2277_v19 = vmul.f32 %v2273_v0, %v2227_v17 }
0x1c3d   :  { %v2278_v30 = vmul.f32 %v2274_v26, %v2241_v38  ;;  %v2364_v38 = vld [vmem:[#allocation8 + $0x10] sm:$0xff] }
0x1c3f   :  { %v3165_v47 = vpop.eup %3164 }
0x1c40   :  { %v3167_v2 = vpop.eup %3166  ;;  %v2271_v25 = vadd.f32 1.0, %v3165_v47 }
0x1c41   :  { %v2272_v9 = vadd.f32 1.0, %v3167_v2 }
0x1c42   :  { %v2275_v28 = vmul.f32 0.5, %v2271_v25 }
0x1c43   :  { %v2276_v23 = vmul.f32 0.5, %v2272_v9 }
0x1c44   :  { %v2279_v24 = vmul.f32 %v2275_v28, %v2229_v61 }
0x1c45   :  { %v2280_v29 = vmul.f32 %v2276_v23, %v2243_v3 }
0x1c46   :  { %v2281_v31 = vpack.c.bf16 %v2279_v24, %v2277_v19 }
0x1c47   :  { %v2282_v52 = vpack.c.bf16 %v2280_v29, %v2278_v30 }
0x1c48   :  { %2339 = vmatmul.bf16.vlgmr.msra.gmra.mxu0 %v2281_v31 }
0x1c49   :  { %2353 = vmatmul.bf16.vlgmr.msrb.gmra.mxu1 %v2282_v52 }
0x1cc5   :  { %v2340_v45 = vpop.f32.mrf.mxu0 }
0x1cc6   :  { %v2354_v43 = vpop.f32.mrf.mxu1 }
0x1cc7   :  { %v2355_v46 = vadd.f32 %v2354_v43, %v2340_v45 }
0x1cc9   :  { %v2359_v60 = vadd.f32 %v2355_v46, %v3645_v22 }
0x1ccb   :  { %v2362_v17 = vadd.f32 %v2361_v54, %v2359_v60 }
0x1ccd   :  { %v2342_v50 = vpop.f32.mrf.mxu0 }
0x1cce   :  { %v2356_v14 = vpop.f32.mrf.mxu1 }
0x1ccf   :  { %v2357_v53 = vadd.f32 %v2356_v14, %v2342_v50 }
0x1cd1   :  { %v2360_v49 = vadd.f32 %v2357_v53, %v3650_v27 }
0x1cd3   :  { %v2363_v63 = vadd.f32 %v2361_v54, %v2360_v49 }
0x1cd5   :  { %2382 = vmatpush.msra.mxu3 %v2363_v63 }
0x1cd7   :  { %2383 = vmatpush.msra.mxu3 %v2362_v17 }
0x1cd8   :  { %2940 = vmatmul.msk.f32.vlgmr.msra.gmra.mxu3 %vm273_vm8, %v2364_v38 }
0x1d5b   :  { %v2385_v36 = vpop.f32.mrf.mxu3 }
0x1d5c   :  { %2941 = vmatmul.msk.f32.vlgmr.msrb.gmra.mxu2 %vm90_vm0, %v2385_v36 }
0x1ddf   :  { %v2418_v22 = vpop.f32.mrf.mxu2 }
0x1de0   :  { %v2419_v27 = vadd.f32 %v3069_v57, %v2418_v22 }
0x1de2   :  { %2421 = vst [vmem:[#allocation10] sm:$0xff] %v2419_v27 }
0x1de3   :  { %2432 = dma.vmem_to_hbm [thread:$0]  %s2428_s13, 128, %s2430_s16, [#allocation4]  }
0x1de4   :  { %3296 = dma.done.wait [#allocation4], 128  }
0x1de5   :  { %3297 = vsyncadd [#allocation4], 4294967168 }
0x1de6   :  { %2437 = vsyncpa [#allocation3], 1 }
0x1de7   :  { %2438 = vsyncpa [#allocation6], 1 }
0x1de8   :  { %2439 = vsyncpa [#allocation9], 1 }
0x1de9   :  { %2440 = vsyncpa [#allocation4], 1 }

</bundles_post_ra>
